<compile_context>
chip_gen: v7x
topology: tpu7x:2x2x1
jax: 0.10.0
libtpu: 0.0.40
codegen_flags: <defaults>
</compile_context>

<pallas_src>
import functools

import jax
import jax.numpy as jnp
from jax import lax
from jax.experimental import pallas as pl
from jax.experimental.pallas import tpu as pltpu


def stmem_kernel(x_ref, w1_ref, b1_ref, w2_ref, b2_ref, o_ref,
                 pad_ref, maxd_ref, *, new_length, H, W, TH):
    C = new_length * 3            # channels of one reshaped frame group
    Wp = W + 2
    n_strips = H // TH

    # ---- fill the padded planes ---------------------------------------------
    # Interior (rows 1..H, cols 1..W) <- this sample's planes.  Border rows are
    # zeroed every step (megacore-safe, tiny); border columns stay
    # uninitialized and are masked out of the combine below.
    zrow = jnp.zeros((1, Wp), jnp.float32)
    for ci in range(C):
        pad_ref[ci, pl.ds(0, 1), :] = zrow
        pad_ref[ci, pl.ds(H + 1, 1), :] = zrow
        pad_ref[ci, pl.ds(1, H), pl.ds(1, W)] = x_ref[0, ci]

    # ---- hoisted constants (JAX does not CSE broadcast_in_dim) --------------
    col = lax.broadcasted_iota(jnp.int32, (TH, W), 1)
    not_first_col = col != 0          # kills the kw=0 tap at output column 0
    not_last_col = col != (W - 1)     # kills the kw=2 tap at output column W-1

    def conv3x3(load_plane, n_in, w_ref, b_ref):
        """3x3 stride-1 conv (n_in -> 3) on one padded row strip, on the VPU.

        kw is deferred: three width-Wp partial sums per output channel are
        accumulated against the *unshifted* plane and combined with two lane
        slices (+ the two border-column masks) per output channel at the end.
        No per-tap lane shift is ever materialized.
        """
        acc = [[None for _ in range(3)] for _ in range(3)]   # [kw][co]
        for ci in range(n_in):
            for kh in range(3):
                win = load_plane(ci, kh)                      # (TH, Wp)
                for co in range(3):
                    base = (co * n_in + ci) * 9 + kh * 3
                    for kw in range(3):
                        term = w_ref[base + kw] * win
                        acc[kw][co] = (term if acc[kw][co] is None
                                       else acc[kw][co] + term)
        outs = []
        for co in range(3):
            a0 = jnp.where(not_first_col, acc[0][co][:, 0:W], 0.0)
            a1 = acc[1][co][:, 1:1 + W]
            a2 = jnp.where(not_last_col, acc[2][co][:, 2:2 + W], 0.0)
            outs.append(a0 + a1 + a2 + b_ref[co])
        return outs

    # ---- strip loop (single body; bounded live ranges) ----------------------
    def strip(s, carry):
        r0 = pl.multiple_of(s * TH, TH)

        # conv1 first; (c1 + b1) is parked in o_ref so it is not live later.
        c1 = conv3x3(lambda ci, kh: pad_ref[ci, pl.ds(r0 + kh, TH), :],
                     C, w1_ref, b1_ref)
        for co in range(3):
            o_ref[0, co, pl.ds(r0, TH), :] = c1[co].astype(o_ref.dtype)

        # group-max of frame diffs for this strip (incl. halo rows) -> scratch,
        # so conv2 ref-loads rows instead of holding three live planes.
        for c in range(3):
            m = (pad_ref[3 + c, pl.ds(r0, TH + 2), :]
                 - pad_ref[c, pl.ds(r0, TH + 2), :])
            for g in range(1, new_length - 1):
                d = (pad_ref[(g + 1) * 3 + c, pl.ds(r0, TH + 2), :]
                     - pad_ref[g * 3 + c, pl.ds(r0, TH + 2), :])
                m = jnp.maximum(m, d)
            maxd_ref[c] = m

        # conv2 + sigmoid gate, then in-place gating of the parked conv1 strip.
        c2 = conv3x3(lambda ci, kh: maxd_ref[ci, pl.ds(kh, TH), :],
                     3, w2_ref, b2_ref)
        for co in range(3):
            o_ref[0, co, pl.ds(r0, TH), :] = (
                o_ref[0, co, pl.ds(r0, TH), :] * jax.nn.sigmoid(c2[co])
            ).astype(o_ref.dtype)
        return carry

    lax.fori_loop(0, n_strips, strip, 0)


def _pick_tile_h(H, tile_h):
    th = max(1, min(tile_h, H))
    while H % th:
        th -= 1
    return th


def stmem_forward(x, w1, b1, w2, b2, *, num_segments, new_length, tile_h=16):
    """x: (B, num_segments*new_length*3, H, W) float32 (NCHW)."""
    B, SLC, H, W = x.shape
    C = new_length * 3
    C1 = (2 * new_length - 1) * 3
    assert new_length >= 2 and SLC == num_segments * C
    assert w1.shape == (3, C1, 3, 3) and w2.shape == (3, 3, 3, 3)
    N = B * num_segments

    xr = x.reshape(N, C, H, W)

    # Fold the frame-diff channels into conv1's weights (conv is linear):
    #   w1_eff[:, ci] = w1[:, ci] + w1[:, C+ci-3] (ci>=3) - w1[:, C+ci] (ci<C-3)
    w_main, w_diff = w1[:, :C], w1[:, C:]
    w1_eff = (w_main
              + jnp.pad(w_diff, ((0, 0), (3, 0), (0, 0), (0, 0)))
              - jnp.pad(w_diff, ((0, 0), (0, 3), (0, 0), (0, 0))))

    TH = _pick_tile_h(H, tile_h)
    Hp, Wp = H + 2, W + 2

    kernel = functools.partial(stmem_kernel, new_length=new_length,
                               H=H, W=W, TH=TH)
    smem = pl.BlockSpec(memory_space=pltpu.MemorySpace.SMEM)

    def padded_bytes(c, h, w):          # f32, (8,128)-tile padded
        return c * (-(-h // 8) * 8) * (-(-w // 128) * 128) * 4

    vmem_need = (2 * padded_bytes(C, H, W)        # double-buffered input block
                 + 2 * padded_bytes(3, H, W)      # double-buffered output block
                 + padded_bytes(C, Hp, Wp)        # padded-plane scratch
                 + padded_bytes(3, TH + 2, Wp))   # group-max strip scratch
    # <= 48 MiB so the same budget also leaves headroom on v7x (64 MiB / TC).
    vmem_limit = int(min(max(vmem_need + (8 << 20), 16 << 20), 48 << 20))

    cost = pl.CostEstimate(
        flops=2 * N * H * W * 3 * 9 * (C + 3),    # conv1 (folded) + conv2 MACs
        transcendentals=N * 3 * H * W,            # sigmoid
        bytes_accessed=4 * N * H * W * (C + 3))

    # NOTE: for deployments with W < 128 the (H, W) planes are lane-sparse;
    # folding rows / frame groups into the lane dim would help there.  At the
    # intended 224-wide frames the lanes are ~88% dense, so layout stays simple.
    # NOTE: grid=(N,) + "parallel" only fills both v7x TensorCores when N >= 2;
    # for N == 1 the strip loop would have to become a second parallel axis.
    return pl.pallas_call(
        kernel,
        out_shape=jax.ShapeDtypeStruct((N, 3, H, W), jnp.float32),
        grid=(N,),
        in_specs=[
            pl.BlockSpec((1, C, H, W), lambda n: (n, 0, 0, 0)),
            smem,  # folded conv1 weights, flat (3*C*9,)
            smem,  # b1 (3,)
            smem,  # conv2 weights, flat (81,)
            smem,  # b2 (3,)
        ],
        out_specs=pl.BlockSpec((1, 3, H, W), lambda n: (n, 0, 0, 0)),
        scratch_shapes=[pltpu.VMEM((C, Hp, Wp), jnp.float32),
                        pltpu.VMEM((3, TH + 2, Wp), jnp.float32)],
        compiler_params=pltpu.CompilerParams(
            dimension_semantics=("parallel",),
            vmem_limit_bytes=vmem_limit),
        cost_estimate=cost,
    )(xr, w1_eff.reshape(-1), b1, w2.reshape(-1), b2)


def stmem_reference(x, w1, b1, w2, b2, *, num_segments, new_length):
    """Pure-JAX reference mirroring the PyTorch forward (uses unfolded w1)."""
    B, SLC, H, W = x.shape
    N = B * num_segments
    xr = x.reshape(N, new_length * 3, H, W)
    nd = (new_length - 1) * 3
    diff = xr[:, 3:] - xr[:, :nd]
    cat = jnp.concatenate([xr, diff], axis=1)
    conv1 = lax.conv_general_dilated(
        cat, w1, (1, 1), ((1, 1), (1, 1)),
        dimension_numbers=("NCHW", "OIHW", "NCHW")) + b1[None, :, None, None]
    d = diff.reshape(N, new_length - 1, 3, H, W).max(axis=1)
    conv2 = lax.conv_general_dilated(
        d, w2, (1, 1), ((1, 1), (1, 1)),
        dimension_numbers=("NCHW", "OIHW", "NCHW")) + b2[None, :, None, None]
    return jax.nn.sigmoid(conv2) * conv1


if __name__ == "__main__":
    num_segments = 2
    new_length = 2
    B, S = 2, 16                              # small spatial instead of 224
    C1 = (new_length * 2 - 1) * 3             # conv1 in-channels

    key = jax.random.PRNGKey(0)
    kx, kw1, kb1, kw2, kb2 = jax.random.split(key, 5)

    x = jax.random.normal(kx, (B, num_segments * new_length * 3, S, S),
                          dtype=jnp.float32)
    w1 = jax.random.normal(kw1, (3, C1, 3, 3), dtype=jnp.float32) * 0.1
    b1 = jax.random.normal(kb1, (3,), dtype=jnp.float32) * 0.1
    w2 = jax.random.normal(kw2, (3, 3, 3, 3), dtype=jnp.float32) * 0.1
    b2 = jax.random.normal(kb2, (3,), dtype=jnp.float32) * 0.1

    out = stmem_forward(x, w1, b1, w2, b2,
                        num_segments=num_segments, new_length=new_length)
    out = jax.block_until_ready(out)

    ref = stmem_reference(x, w1, b1, w2, b2,
                          num_segments=num_segments, new_length=new_length)
    assert out.shape == (B * num_segments, 3, S, S)
    assert jnp.allclose(out, ref, rtol=1e-4, atol=1e-4), (
        float(jnp.max(jnp.abs(out - ref))))

    print("KERNEL_OK")
</pallas_src>

<mosaic_0001>
module attributes {stable_mosaic.version = 11 : i64} {
  func.func @stmem_kernel(%arg0: i32, %arg1: memref<1x6x16x16xf32, #tpu.memory_space<vmem>>, %arg2: memref<162xf32, #tpu.memory_space<smem>>, %arg3: memref<3xf32, #tpu.memory_space<smem>>, %arg4: memref<81xf32, #tpu.memory_space<smem>>, %arg5: memref<3xf32, #tpu.memory_space<smem>>, %arg6: memref<1x3x16x16xf32, #tpu.memory_space<vmem>>, %arg7: memref<6x18x18xf32, #tpu.memory_space<vmem>>, %arg8: memref<3x18x18xf32, #tpu.memory_space<vmem>>) attributes {dimension_semantics = [#tpu.dimension_semantics<parallel>], iteration_bounds = array<i64: 4>, scalar_prefetch = 0 : i64, scratch_operands = 2 : i64, tpu.core_type = #tpu.core_type<tc>, window_params = [{transform_indices = @transform_0, window_bounds = array<i64: 1, 6, 16, 16>}, {transform_indices = @transform_1, window_bounds = array<i64: 162>}, {transform_indices = @transform_2, window_bounds = array<i64: 3>}, {transform_indices = @transform_3, window_bounds = array<i64: 81>}, {transform_indices = @transform_4, window_bounds = array<i64: 3>}, {transform_indices = @transform_5, window_bounds = array<i64: 1, 3, 16, 16>}]} {
    %cst = arith.constant 0.000000e+00 : f32
    %0 = vector.broadcast %cst : f32 to vector<1x18xf32>
    %c0 = arith.constant 0 : index
    %c0_0 = arith.constant 0 : index
    %c0_1 = arith.constant 0 : index
    %1 = vector.load %arg7[%c0, %c0_0, %c0_1] : memref<6x18x18xf32, #tpu.memory_space<vmem>>, vector<1x1x18xf32>
    %2 = vector.shape_cast %1 : vector<1x1x18xf32> to vector<1x18xf32>
    %3 = vector.shape_cast %0 : vector<1x18xf32> to vector<1x1x18xf32>
    tpu.vector_store %arg7[%c0, %c0_0, %c0_1], %3 {strides = array<i32>} : memref<6x18x18xf32, #tpu.memory_space<vmem>>, vector<1x1x18xf32>,
    %c0_2 = arith.constant 0 : index
    %c17 = arith.constant 17 : index
    %c0_3 = arith.constant 0 : index
    %4 = vector.load %arg7[%c0_2, %c17, %c0_3] : memref<6x18x18xf32, #tpu.memory_space<vmem>>, vector<1x1x18xf32>
    %5 = vector.shape_cast %4 : vector<1x1x18xf32> to vector<1x18xf32>
    %6 = vector.shape_cast %0 : vector<1x18xf32> to vector<1x1x18xf32>
    tpu.vector_store %arg7[%c0_2, %c17, %c0_3], %6 {strides = array<i32>} : memref<6x18x18xf32, #tpu.memory_space<vmem>>, vector<1x1x18xf32>,
    %c0_4 = arith.constant 0 : index
    %c0_5 = arith.constant 0 : index
    %c0_6 = arith.constant 0 : index
    %c0_7 = arith.constant 0 : index
    %7 = vector.load %arg1[%c0_4, %c0_5, %c0_6, %c0_7] : memref<1x6x16x16xf32, #tpu.memory_space<vmem>>, vector<1x1x16x16xf32>
    %8 = vector.shape_cast %7 : vector<1x1x16x16xf32> to vector<16x16xf32>
    %c0_8 = arith.constant 0 : index
    %c1 = arith.constant 1 : index
    %c1_9 = arith.constant 1 : index
    %9 = vector.load %arg7[%c0_8, %c1, %c1_9] : memref<6x18x18xf32, #tpu.memory_space<vmem>>, vector<1x16x16xf32>
    %10 = vector.shape_cast %9 : vector<1x16x16xf32> to vector<16x16xf32>
    %11 = vector.shape_cast %8 : vector<16x16xf32> to vector<1x16x16xf32>
    tpu.vector_store %arg7[%c0_8, %c1, %c1_9], %11 {strides = array<i32>} : memref<6x18x18xf32, #tpu.memory_space<vmem>>, vector<1x16x16xf32>,
    %c1_10 = arith.constant 1 : index
    %c0_11 = arith.constant 0 : index
    %c0_12 = arith.constant 0 : index
    %12 = vector.load %arg7[%c1_10, %c0_11, %c0_12] : memref<6x18x18xf32, #tpu.memory_space<vmem>>, vector<1x1x18xf32>
    %13 = vector.shape_cast %12 : vector<1x1x18xf32> to vector<1x18xf32>
    %14 = vector.shape_cast %0 : vector<1x18xf32> to vector<1x1x18xf32>
    tpu.vector_store %arg7[%c1_10, %c0_11, %c0_12], %14 {strides = array<i32>} : memref<6x18x18xf32, #tpu.memory_space<vmem>>, vector<1x1x18xf32>,
    %c1_13 = arith.constant 1 : index
    %c17_14 = arith.constant 17 : index
    %c0_15 = arith.constant 0 : index
    %15 = vector.load %arg7[%c1_13, %c17_14, %c0_15] : memref<6x18x18xf32, #tpu.memory_space<vmem>>, vector<1x1x18xf32>
    %16 = vector.shape_cast %15 : vector<1x1x18xf32> to vector<1x18xf32>
    %17 = vector.shape_cast %0 : vector<1x18xf32> to vector<1x1x18xf32>
    tpu.vector_store %arg7[%c1_13, %c17_14, %c0_15], %17 {strides = array<i32>} : memref<6x18x18xf32, #tpu.memory_space<vmem>>, vector<1x1x18xf32>,
    %c0_16 = arith.constant 0 : index
    %c1_17 = arith.constant 1 : index
    %c0_18 = arith.constant 0 : index
    %c0_19 = arith.constant 0 : index
    %18 = vector.load %arg1[%c0_16, %c1_17, %c0_18, %c0_19] : memref<1x6x16x16xf32, #tpu.memory_space<vmem>>, vector<1x1x16x16xf32>
    %19 = vector.shape_cast %18 : vector<1x1x16x16xf32> to vector<16x16xf32>
    %c1_20 = arith.constant 1 : index
    %c1_21 = arith.constant 1 : index
    %c1_22 = arith.constant 1 : index
    %20 = vector.load %arg7[%c1_20, %c1_21, %c1_22] : memref<6x18x18xf32, #tpu.memory_space<vmem>>, vector<1x16x16xf32>
    %21 = vector.shape_cast %20 : vector<1x16x16xf32> to vector<16x16xf32>
    %22 = vector.shape_cast %19 : vector<16x16xf32> to vector<1x16x16xf32>
    tpu.vector_store %arg7[%c1_20, %c1_21, %c1_22], %22 {strides = array<i32>} : memref<6x18x18xf32, #tpu.memory_space<vmem>>, vector<1x16x16xf32>,
    %c2 = arith.constant 2 : index
    %c0_23 = arith.constant 0 : index
    %c0_24 = arith.constant 0 : index
    %23 = vector.load %arg7[%c2, %c0_23, %c0_24] : memref<6x18x18xf32, #tpu.memory_space<vmem>>, vector<1x1x18xf32>
    %24 = vector.shape_cast %23 : vector<1x1x18xf32> to vector<1x18xf32>
    %25 = vector.shape_cast %0 : vector<1x18xf32> to vector<1x1x18xf32>
    tpu.vector_store %arg7[%c2, %c0_23, %c0_24], %25 {strides = array<i32>} : memref<6x18x18xf32, #tpu.memory_space<vmem>>, vector<1x1x18xf32>,
    %c2_25 = arith.constant 2 : index
    %c17_26 = arith.constant 17 : index
    %c0_27 = arith.constant 0 : index
    %26 = vector.load %arg7[%c2_25, %c17_26, %c0_27] : memref<6x18x18xf32, #tpu.memory_space<vmem>>, vector<1x1x18xf32>
    %27 = vector.shape_cast %26 : vector<1x1x18xf32> to vector<1x18xf32>
    %28 = vector.shape_cast %0 : vector<1x18xf32> to vector<1x1x18xf32>
    tpu.vector_store %arg7[%c2_25, %c17_26, %c0_27], %28 {strides = array<i32>} : memref<6x18x18xf32, #tpu.memory_space<vmem>>, vector<1x1x18xf32>,
    %c0_28 = arith.constant 0 : index
    %c2_29 = arith.constant 2 : index
    %c0_30 = arith.constant 0 : index
    %c0_31 = arith.constant 0 : index
    %29 = vector.load %arg1[%c0_28, %c2_29, %c0_30, %c0_31] : memref<1x6x16x16xf32, #tpu.memory_space<vmem>>, vector<1x1x16x16xf32>
    %30 = vector.shape_cast %29 : vector<1x1x16x16xf32> to vector<16x16xf32>
    %c2_32 = arith.constant 2 : index
    %c1_33 = arith.constant 1 : index
    %c1_34 = arith.constant 1 : index
    %31 = vector.load %arg7[%c2_32, %c1_33, %c1_34] : memref<6x18x18xf32, #tpu.memory_space<vmem>>, vector<1x16x16xf32>
    %32 = vector.shape_cast %31 : vector<1x16x16xf32> to vector<16x16xf32>
    %33 = vector.shape_cast %30 : vector<16x16xf32> to vector<1x16x16xf32>
    tpu.vector_store %arg7[%c2_32, %c1_33, %c1_34], %33 {strides = array<i32>} : memref<6x18x18xf32, #tpu.memory_space<vmem>>, vector<1x16x16xf32>,
    %c3 = arith.constant 3 : index
    %c0_35 = arith.constant 0 : index
    %c0_36 = arith.constant 0 : index
    %34 = vector.load %arg7[%c3, %c0_35, %c0_36] : memref<6x18x18xf32, #tpu.memory_space<vmem>>, vector<1x1x18xf32>
    %35 = vector.shape_cast %34 : vector<1x1x18xf32> to vector<1x18xf32>
    %36 = vector.shape_cast %0 : vector<1x18xf32> to vector<1x1x18xf32>
    tpu.vector_store %arg7[%c3, %c0_35, %c0_36], %36 {strides = array<i32>} : memref<6x18x18xf32, #tpu.memory_space<vmem>>, vector<1x1x18xf32>,
    %c3_37 = arith.constant 3 : index
    %c17_38 = arith.constant 17 : index
    %c0_39 = arith.constant 0 : index
    %37 = vector.load %arg7[%c3_37, %c17_38, %c0_39] : memref<6x18x18xf32, #tpu.memory_space<vmem>>, vector<1x1x18xf32>
    %38 = vector.shape_cast %37 : vector<1x1x18xf32> to vector<1x18xf32>
    %39 = vector.shape_cast %0 : vector<1x18xf32> to vector<1x1x18xf32>
    tpu.vector_store %arg7[%c3_37, %c17_38, %c0_39], %39 {strides = array<i32>} : memref<6x18x18xf32, #tpu.memory_space<vmem>>, vector<1x1x18xf32>,
    %c0_40 = arith.constant 0 : index
    %c3_41 = arith.constant 3 : index
    %c0_42 = arith.constant 0 : index
    %c0_43 = arith.constant 0 : index
    %40 = vector.load %arg1[%c0_40, %c3_41, %c0_42, %c0_43] : memref<1x6x16x16xf32, #tpu.memory_space<vmem>>, vector<1x1x16x16xf32>
    %41 = vector.shape_cast %40 : vector<1x1x16x16xf32> to vector<16x16xf32>
    %c3_44 = arith.constant 3 : index
    %c1_45 = arith.constant 1 : index
    %c1_46 = arith.constant 1 : index
    %42 = vector.load %arg7[%c3_44, %c1_45, %c1_46] : memref<6x18x18xf32, #tpu.memory_space<vmem>>, vector<1x16x16xf32>
    %43 = vector.shape_cast %42 : vector<1x16x16xf32> to vector<16x16xf32>
    %44 = vector.shape_cast %41 : vector<16x16xf32> to vector<1x16x16xf32>
    tpu.vector_store %arg7[%c3_44, %c1_45, %c1_46], %44 {strides = array<i32>} : memref<6x18x18xf32, #tpu.memory_space<vmem>>, vector<1x16x16xf32>,
    %c4 = arith.constant 4 : index
    %c0_47 = arith.constant 0 : index
    %c0_48 = arith.constant 0 : index
    %45 = vector.load %arg7[%c4, %c0_47, %c0_48] : memref<6x18x18xf32, #tpu.memory_space<vmem>>, vector<1x1x18xf32>
    %46 = vector.shape_cast %45 : vector<1x1x18xf32> to vector<1x18xf32>
    %47 = vector.shape_cast %0 : vector<1x18xf32> to vector<1x1x18xf32>
    tpu.vector_store %arg7[%c4, %c0_47, %c0_48], %47 {strides = array<i32>} : memref<6x18x18xf32, #tpu.memory_space<vmem>>, vector<1x1x18xf32>,
    %c4_49 = arith.constant 4 : index
    %c17_50 = arith.constant 17 : index
    %c0_51 = arith.constant 0 : index
    %48 = vector.load %arg7[%c4_49, %c17_50, %c0_51] : memref<6x18x18xf32, #tpu.memory_space<vmem>>, vector<1x1x18xf32>
    %49 = vector.shape_cast %48 : vector<1x1x18xf32> to vector<1x18xf32>
    %50 = vector.shape_cast %0 : vector<1x18xf32> to vector<1x1x18xf32>
    tpu.vector_store %arg7[%c4_49, %c17_50, %c0_51], %50 {strides = array<i32>} : memref<6x18x18xf32, #tpu.memory_space<vmem>>, vector<1x1x18xf32>,
    %c0_52 = arith.constant 0 : index
    %c4_53 = arith.constant 4 : index
    %c0_54 = arith.constant 0 : index
    %c0_55 = arith.constant 0 : index
    %51 = vector.load %arg1[%c0_52, %c4_53, %c0_54, %c0_55] : memref<1x6x16x16xf32, #tpu.memory_space<vmem>>, vector<1x1x16x16xf32>
    %52 = vector.shape_cast %51 : vector<1x1x16x16xf32> to vector<16x16xf32>
    %c4_56 = arith.constant 4 : index
    %c1_57 = arith.constant 1 : index
    %c1_58 = arith.constant 1 : index
    %53 = vector.load %arg7[%c4_56, %c1_57, %c1_58] : memref<6x18x18xf32, #tpu.memory_space<vmem>>, vector<1x16x16xf32>
    %54 = vector.shape_cast %53 : vector<1x16x16xf32> to vector<16x16xf32>
    %55 = vector.shape_cast %52 : vector<16x16xf32> to vector<1x16x16xf32>
    tpu.vector_store %arg7[%c4_56, %c1_57, %c1_58], %55 {strides = array<i32>} : memref<6x18x18xf32, #tpu.memory_space<vmem>>, vector<1x16x16xf32>,
    %c5 = arith.constant 5 : index
    %c0_59 = arith.constant 0 : index
    %c0_60 = arith.constant 0 : index
    %56 = vector.load %arg7[%c5, %c0_59, %c0_60] : memref<6x18x18xf32, #tpu.memory_space<vmem>>, vector<1x1x18xf32>
    %57 = vector.shape_cast %56 : vector<1x1x18xf32> to vector<1x18xf32>
    %58 = vector.shape_cast %0 : vector<1x18xf32> to vector<1x1x18xf32>
    tpu.vector_store %arg7[%c5, %c0_59, %c0_60], %58 {strides = array<i32>} : memref<6x18x18xf32, #tpu.memory_space<vmem>>, vector<1x1x18xf32>,
    %c5_61 = arith.constant 5 : index
    %c17_62 = arith.constant 17 : index
    %c0_63 = arith.constant 0 : index
    %59 = vector.load %arg7[%c5_61, %c17_62, %c0_63] : memref<6x18x18xf32, #tpu.memory_space<vmem>>, vector<1x1x18xf32>
    %60 = vector.shape_cast %59 : vector<1x1x18xf32> to vector<1x18xf32>
    %61 = vector.shape_cast %0 : vector<1x18xf32> to vector<1x1x18xf32>
    tpu.vector_store %arg7[%c5_61, %c17_62, %c0_63], %61 {strides = array<i32>} : memref<6x18x18xf32, #tpu.memory_space<vmem>>, vector<1x1x18xf32>,
    %c0_64 = arith.constant 0 : index
    %c5_65 = arith.constant 5 : index
    %c0_66 = arith.constant 0 : index
    %c0_67 = arith.constant 0 : index
    %62 = vector.load %arg1[%c0_64, %c5_65, %c0_66, %c0_67] : memref<1x6x16x16xf32, #tpu.memory_space<vmem>>, vector<1x1x16x16xf32>
    %63 = vector.shape_cast %62 : vector<1x1x16x16xf32> to vector<16x16xf32>
    %c5_68 = arith.constant 5 : index
    %c1_69 = arith.constant 1 : index
    %c1_70 = arith.constant 1 : index
    %64 = vector.load %arg7[%c5_68, %c1_69, %c1_70] : memref<6x18x18xf32, #tpu.memory_space<vmem>>, vector<1x16x16xf32>
    %65 = vector.shape_cast %64 : vector<1x16x16xf32> to vector<16x16xf32>
    %66 = vector.shape_cast %63 : vector<16x16xf32> to vector<1x16x16xf32>
    tpu.vector_store %arg7[%c5_68, %c1_69, %c1_70], %66 {strides = array<i32>} : memref<6x18x18xf32, #tpu.memory_space<vmem>>, vector<1x16x16xf32>,
    %67 = tpu.iota {dimensions = array<i32: 1>} : vector<16x16xi32>
    %c0_i32 = arith.constant 0 : i32
    %68 = vector.broadcast %c0_i32 : i32 to vector<16x16xi32>
    %69 = arith.cmpi ne, %67, %68 : vector<16x16xi32>
    %c15_i32 = arith.constant 15 : i32
    %70 = vector.broadcast %c15_i32 : i32 to vector<16x16xi32>
    %71 = arith.cmpi ne, %67, %70 : vector<16x16xi32>
    %c0_i32_71 = arith.constant 0 : i32
    %c16_i32 = arith.constant 16 : i32
    %72 = arith.muli %c0_i32_71, %c16_i32 : i32
    %73 = tpu.assume_multiple %72, 16 : i32
    %c0_i32_72 = arith.constant 0 : i32
    %74 = arith.addi %73, %c0_i32_72 : i32
    %c0_73 = arith.constant 0 : index
    %75 = arith.index_cast %74 : i32 to index
    %c0_74 = arith.constant 0 : index
    %76 = vector.load %arg7[%c0_73, %75, %c0_74] : memref<6x18x18xf32, #tpu.memory_space<vmem>>, vector<1x16x18xf32>
    %77 = vector.shape_cast %76 : vector<1x16x18xf32> to vector<16x18xf32>
    %c0_75 = arith.constant 0 : index
    %78 = memref.load %arg2[%c0_75] : memref<162xf32, #tpu.memory_space<smem>>
    %79 = vector.broadcast %78 : f32 to vector<16x18xf32>
    %80 = arith.mulf %79, %77 : vector<16x18xf32>
    %c1_76 = arith.constant 1 : index
    %81 = memref.load %arg2[%c1_76] : memref<162xf32, #tpu.memory_space<smem>>
    %82 = vector.broadcast %81 : f32 to vector<16x18xf32>
    %83 = arith.mulf %82, %77 : vector<16x18xf32>
    %c2_77 = arith.constant 2 : index
    %84 = memref.load %arg2[%c2_77] : memref<162xf32, #tpu.memory_space<smem>>
    %85 = vector.broadcast %84 : f32 to vector<16x18xf32>
    %86 = arith.mulf %85, %77 : vector<16x18xf32>
    %c54 = arith.constant 54 : index
    %87 = memref.load %arg2[%c54] : memref<162xf32, #tpu.memory_space<smem>>
    %88 = vector.broadcast %87 : f32 to vector<16x18xf32>
    %89 = arith.mulf %88, %77 : vector<16x18xf32>
    %c55 = arith.constant 55 : index
    %90 = memref.load %arg2[%c55] : memref<162xf32, #tpu.memory_space<smem>>
    %91 = vector.broadcast %90 : f32 to vector<16x18xf32>
    %92 = arith.mulf %91, %77 : vector<16x18xf32>
    %c56 = arith.constant 56 : index
    %93 = memref.load %arg2[%c56] : memref<162xf32, #tpu.memory_space<smem>>
    %94 = vector.broadcast %93 : f32 to vector<16x18xf32>
    %95 = arith.mulf %94, %77 : vector<16x18xf32>
    %c108 = arith.constant 108 : index
    %96 = memref.load %arg2[%c108] : memref<162xf32, #tpu.memory_space<smem>>
    %97 = vector.broadcast %96 : f32 to vector<16x18xf32>
    %98 = arith.mulf %97, %77 : vector<16x18xf32>
    %c109 = arith.constant 109 : index
    %99 = memref.load %arg2[%c109] : memref<162xf32, #tpu.memory_space<smem>>
    %100 = vector.broadcast %99 : f32 to vector<16x18xf32>
    %101 = arith.mulf %100, %77 : vector<16x18xf32>
    %c110 = arith.constant 110 : index
    %102 = memref.load %arg2[%c110] : memref<162xf32, #tpu.memory_space<smem>>
    %103 = vector.broadcast %102 : f32 to vector<16x18xf32>
    %104 = arith.mulf %103, %77 : vector<16x18xf32>
    %c1_i32 = arith.constant 1 : i32
    %105 = arith.addi %73, %c1_i32 : i32
    %c0_78 = arith.constant 0 : index
    %106 = arith.index_cast %105 : i32 to index
    %c0_79 = arith.constant 0 : index
    %107 = vector.load %arg7[%c0_78, %106, %c0_79] : memref<6x18x18xf32, #tpu.memory_space<vmem>>, vector<1x16x18xf32>
    %108 = vector.shape_cast %107 : vector<1x16x18xf32> to vector<16x18xf32>
    %c3_80 = arith.constant 3 : index
    %109 = memref.load %arg2[%c3_80] : memref<162xf32, #tpu.memory_space<smem>>
    %110 = vector.broadcast %109 : f32 to vector<16x18xf32>
    %111 = arith.mulf %110, %108 : vector<16x18xf32>
    %112 = arith.addf %80, %111 : vector<16x18xf32>
    %c4_81 = arith.constant 4 : index
    %113 = memref.load %arg2[%c4_81] : memref<162xf32, #tpu.memory_space<smem>>
    %114 = vector.broadcast %113 : f32 to vector<16x18xf32>
    %115 = arith.mulf %114, %108 : vector<16x18xf32>
    %116 = arith.addf %83, %115 : vector<16x18xf32>
    %c5_82 = arith.constant 5 : index
    %117 = memref.load %arg2[%c5_82] : memref<162xf32, #tpu.memory_space<smem>>
    %118 = vector.broadcast %117 : f32 to vector<16x18xf32>
    %119 = arith.mulf %118, %108 : vector<16x18xf32>
    %120 = arith.addf %86, %119 : vector<16x18xf32>
    %c57 = arith.constant 57 : index
    %121 = memref.load %arg2[%c57] : memref<162xf32, #tpu.memory_space<smem>>
    %122 = vector.broadcast %121 : f32 to vector<16x18xf32>
    %123 = arith.mulf %122, %108 : vector<16x18xf32>
    %124 = arith.addf %89, %123 : vector<16x18xf32>
    %c58 = arith.constant 58 : index
    %125 = memref.load %arg2[%c58] : memref<162xf32, #tpu.memory_space<smem>>
    %126 = vector.broadcast %125 : f32 to vector<16x18xf32>
    %127 = arith.mulf %126, %108 : vector<16x18xf32>
    %128 = arith.addf %92, %127 : vector<16x18xf32>
    %c59 = arith.constant 59 : index
    %129 = memref.load %arg2[%c59] : memref<162xf32, #tpu.memory_space<smem>>
    %130 = vector.broadcast %129 : f32 to vector<16x18xf32>
    %131 = arith.mulf %130, %108 : vector<16x18xf32>
    %132 = arith.addf %95, %131 : vector<16x18xf32>
    %c111 = arith.constant 111 : index
    %133 = memref.load %arg2[%c111] : memref<162xf32, #tpu.memory_space<smem>>
    %134 = vector.broadcast %133 : f32 to vector<16x18xf32>
    %135 = arith.mulf %134, %108 : vector<16x18xf32>
    %136 = arith.addf %98, %135 : vector<16x18xf32>
    %c112 = arith.constant 112 : index
    %137 = memref.load %arg2[%c112] : memref<162xf32, #tpu.memory_space<smem>>
    %138 = vector.broadcast %137 : f32 to vector<16x18xf32>
    %139 = arith.mulf %138, %108 : vector<16x18xf32>
    %140 = arith.addf %101, %139 : vector<16x18xf32>
    %c113 = arith.constant 113 : index
    %141 = memref.load %arg2[%c113] : memref<162xf32, #tpu.memory_space<smem>>
    %142 = vector.broadcast %141 : f32 to vector<16x18xf32>
    %143 = arith.mulf %142, %108 : vector<16x18xf32>
    %144 = arith.addf %104, %143 : vector<16x18xf32>
    %c2_i32 = arith.constant 2 : i32
    %145 = arith.addi %73, %c2_i32 : i32
    %c0_83 = arith.constant 0 : index
    %146 = arith.index_cast %145 : i32 to index
    %c0_84 = arith.constant 0 : index
    %147 = vector.load %arg7[%c0_83, %146, %c0_84] : memref<6x18x18xf32, #tpu.memory_space<vmem>>, vector<1x16x18xf32>
    %148 = vector.shape_cast %147 : vector<1x16x18xf32> to vector<16x18xf32>
    %c6 = arith.constant 6 : index
    %149 = memref.load %arg2[%c6] : memref<162xf32, #tpu.memory_space<smem>>
    %150 = vector.broadcast %149 : f32 to vector<16x18xf32>
    %151 = arith.mulf %150, %148 : vector<16x18xf32>
    %152 = arith.addf %112, %151 : vector<16x18xf32>
    %c7 = arith.constant 7 : index
    %153 = memref.load %arg2[%c7] : memref<162xf32, #tpu.memory_space<smem>>
    %154 = vector.broadcast %153 : f32 to vector<16x18xf32>
    %155 = arith.mulf %154, %148 : vector<16x18xf32>
    %156 = arith.addf %116, %155 : vector<16x18xf32>
    %c8 = arith.constant 8 : index
    %157 = memref.load %arg2[%c8] : memref<162xf32, #tpu.memory_space<smem>>
    %158 = vector.broadcast %157 : f32 to vector<16x18xf32>
    %159 = arith.mulf %158, %148 : vector<16x18xf32>
    %160 = arith.addf %120, %159 : vector<16x18xf32>
    %c60 = arith.constant 60 : index
    %161 = memref.load %arg2[%c60] : memref<162xf32, #tpu.memory_space<smem>>
    %162 = vector.broadcast %161 : f32 to vector<16x18xf32>
    %163 = arith.mulf %162, %148 : vector<16x18xf32>
    %164 = arith.addf %124, %163 : vector<16x18xf32>
    %c61 = arith.constant 61 : index
    %165 = memref.load %arg2[%c61] : memref<162xf32, #tpu.memory_space<smem>>
    %166 = vector.broadcast %165 : f32 to vector<16x18xf32>
    %167 = arith.mulf %166, %148 : vector<16x18xf32>
    %168 = arith.addf %128, %167 : vector<16x18xf32>
    %c62 = arith.constant 62 : index
    %169 = memref.load %arg2[%c62] : memref<162xf32, #tpu.memory_space<smem>>
    %170 = vector.broadcast %169 : f32 to vector<16x18xf32>
    %171 = arith.mulf %170, %148 : vector<16x18xf32>
    %172 = arith.addf %132, %171 : vector<16x18xf32>
    %c114 = arith.constant 114 : index
    %173 = memref.load %arg2[%c114] : memref<162xf32, #tpu.memory_space<smem>>
    %174 = vector.broadcast %173 : f32 to vector<16x18xf32>
    %175 = arith.mulf %174, %148 : vector<16x18xf32>
    %176 = arith.addf %136, %175 : vector<16x18xf32>
    %c115 = arith.constant 115 : index
    %177 = memref.load %arg2[%c115] : memref<162xf32, #tpu.memory_space<smem>>
    %178 = vector.broadcast %177 : f32 to vector<16x18xf32>
    %179 = arith.mulf %178, %148 : vector<16x18xf32>
    %180 = arith.addf %140, %179 : vector<16x18xf32>
    %c116 = arith.constant 116 : index
    %181 = memref.load %arg2[%c116] : memref<162xf32, #tpu.memory_space<smem>>
    %182 = vector.broadcast %181 : f32 to vector<16x18xf32>
    %183 = arith.mulf %182, %148 : vector<16x18xf32>
    %184 = arith.addf %144, %183 : vector<16x18xf32>
    %c0_i32_85 = arith.constant 0 : i32
    %185 = arith.addi %73, %c0_i32_85 : i32
    %c1_86 = arith.constant 1 : index
    %186 = arith.index_cast %185 : i32 to index
    %c0_87 = arith.constant 0 : index
    %187 = vector.load %arg7[%c1_86, %186, %c0_87] : memref<6x18x18xf32, #tpu.memory_space<vmem>>, vector<1x16x18xf32>
    %188 = vector.shape_cast %187 : vector<1x16x18xf32> to vector<16x18xf32>
    %c9 = arith.constant 9 : index
    %189 = memref.load %arg2[%c9] : memref<162xf32, #tpu.memory_space<smem>>
    %190 = vector.broadcast %189 : f32 to vector<16x18xf32>
    %191 = arith.mulf %190, %188 : vector<16x18xf32>
    %192 = arith.addf %152, %191 : vector<16x18xf32>
    %c10 = arith.constant 10 : index
    %193 = memref.load %arg2[%c10] : memref<162xf32, #tpu.memory_space<smem>>
    %194 = vector.broadcast %193 : f32 to vector<16x18xf32>
    %195 = arith.mulf %194, %188 : vector<16x18xf32>
    %196 = arith.addf %156, %195 : vector<16x18xf32>
    %c11 = arith.constant 11 : index
    %197 = memref.load %arg2[%c11] : memref<162xf32, #tpu.memory_space<smem>>
    %198 = vector.broadcast %197 : f32 to vector<16x18xf32>
    %199 = arith.mulf %198, %188 : vector<16x18xf32>
    %200 = arith.addf %160, %199 : vector<16x18xf32>
    %c63 = arith.constant 63 : index
    %201 = memref.load %arg2[%c63] : memref<162xf32, #tpu.memory_space<smem>>
    %202 = vector.broadcast %201 : f32 to vector<16x18xf32>
    %203 = arith.mulf %202, %188 : vector<16x18xf32>
    %204 = arith.addf %164, %203 : vector<16x18xf32>
    %c64 = arith.constant 64 : index
    %205 = memref.load %arg2[%c64] : memref<162xf32, #tpu.memory_space<smem>>
    %206 = vector.broadcast %205 : f32 to vector<16x18xf32>
    %207 = arith.mulf %206, %188 : vector<16x18xf32>
    %208 = arith.addf %168, %207 : vector<16x18xf32>
    %c65 = arith.constant 65 : index
    %209 = memref.load %arg2[%c65] : memref<162xf32, #tpu.memory_space<smem>>
    %210 = vector.broadcast %209 : f32 to vector<16x18xf32>
    %211 = arith.mulf %210, %188 : vector<16x18xf32>
    %212 = arith.addf %172, %211 : vector<16x18xf32>
    %c117 = arith.constant 117 : index
    %213 = memref.load %arg2[%c117] : memref<162xf32, #tpu.memory_space<smem>>
    %214 = vector.broadcast %213 : f32 to vector<16x18xf32>
    %215 = arith.mulf %214, %188 : vector<16x18xf32>
    %216 = arith.addf %176, %215 : vector<16x18xf32>
    %c118 = arith.constant 118 : index
    %217 = memref.load %arg2[%c118] : memref<162xf32, #tpu.memory_space<smem>>
    %218 = vector.broadcast %217 : f32 to vector<16x18xf32>
    %219 = arith.mulf %218, %188 : vector<16x18xf32>
    %220 = arith.addf %180, %219 : vector<16x18xf32>
    %c119 = arith.constant 119 : index
    %221 = memref.load %arg2[%c119] : memref<162xf32, #tpu.memory_space<smem>>
    %222 = vector.broadcast %221 : f32 to vector<16x18xf32>
    %223 = arith.mulf %222, %188 : vector<16x18xf32>
    %224 = arith.addf %184, %223 : vector<16x18xf32>
    %c1_i32_88 = arith.constant 1 : i32
    %225 = arith.addi %73, %c1_i32_88 : i32
    %c1_89 = arith.constant 1 : index
    %226 = arith.index_cast %225 : i32 to index
    %c0_90 = arith.constant 0 : index
    %227 = vector.load %arg7[%c1_89, %226, %c0_90] : memref<6x18x18xf32, #tpu.memory_space<vmem>>, vector<1x16x18xf32>
    %228 = vector.shape_cast %227 : vector<1x16x18xf32> to vector<16x18xf32>
    %c12 = arith.constant 12 : index
    %229 = memref.load %arg2[%c12] : memref<162xf32, #tpu.memory_space<smem>>
    %230 = vector.broadcast %229 : f32 to vector<16x18xf32>
    %231 = arith.mulf %230, %228 : vector<16x18xf32>
    %232 = arith.addf %192, %231 : vector<16x18xf32>
    %c13 = arith.constant 13 : index
    %233 = memref.load %arg2[%c13] : memref<162xf32, #tpu.memory_space<smem>>
    %234 = vector.broadcast %233 : f32 to vector<16x18xf32>
    %235 = arith.mulf %234, %228 : vector<16x18xf32>
    %236 = arith.addf %196, %235 : vector<16x18xf32>
    %c14 = arith.constant 14 : index
    %237 = memref.load %arg2[%c14] : memref<162xf32, #tpu.memory_space<smem>>
    %238 = vector.broadcast %237 : f32 to vector<16x18xf32>
    %239 = arith.mulf %238, %228 : vector<16x18xf32>
    %240 = arith.addf %200, %239 : vector<16x18xf32>
    %c66 = arith.constant 66 : index
    %241 = memref.load %arg2[%c66] : memref<162xf32, #tpu.memory_space<smem>>
    %242 = vector.broadcast %241 : f32 to vector<16x18xf32>
    %243 = arith.mulf %242, %228 : vector<16x18xf32>
    %244 = arith.addf %204, %243 : vector<16x18xf32>
    %c67 = arith.constant 67 : index
    %245 = memref.load %arg2[%c67] : memref<162xf32, #tpu.memory_space<smem>>
    %246 = vector.broadcast %245 : f32 to vector<16x18xf32>
    %247 = arith.mulf %246, %228 : vector<16x18xf32>
    %248 = arith.addf %208, %247 : vector<16x18xf32>
    %c68 = arith.constant 68 : index
    %249 = memref.load %arg2[%c68] : memref<162xf32, #tpu.memory_space<smem>>
    %250 = vector.broadcast %249 : f32 to vector<16x18xf32>
    %251 = arith.mulf %250, %228 : vector<16x18xf32>
    %252 = arith.addf %212, %251 : vector<16x18xf32>
    %c120 = arith.constant 120 : index
    %253 = memref.load %arg2[%c120] : memref<162xf32, #tpu.memory_space<smem>>
    %254 = vector.broadcast %253 : f32 to vector<16x18xf32>
    %255 = arith.mulf %254, %228 : vector<16x18xf32>
    %256 = arith.addf %216, %255 : vector<16x18xf32>
    %c121 = arith.constant 121 : index
    %257 = memref.load %arg2[%c121] : memref<162xf32, #tpu.memory_space<smem>>
    %258 = vector.broadcast %257 : f32 to vector<16x18xf32>
    %259 = arith.mulf %258, %228 : vector<16x18xf32>
    %260 = arith.addf %220, %259 : vector<16x18xf32>
    %c122 = arith.constant 122 : index
    %261 = memref.load %arg2[%c122] : memref<162xf32, #tpu.memory_space<smem>>
    %262 = vector.broadcast %261 : f32 to vector<16x18xf32>
    %263 = arith.mulf %262, %228 : vector<16x18xf32>
    %264 = arith.addf %224, %263 : vector<16x18xf32>
    %c2_i32_91 = arith.constant 2 : i32
    %265 = arith.addi %73, %c2_i32_91 : i32
    %c1_92 = arith.constant 1 : index
    %266 = arith.index_cast %265 : i32 to index
    %c0_93 = arith.constant 0 : index
    %267 = vector.load %arg7[%c1_92, %266, %c0_93] : memref<6x18x18xf32, #tpu.memory_space<vmem>>, vector<1x16x18xf32>
    %268 = vector.shape_cast %267 : vector<1x16x18xf32> to vector<16x18xf32>
    %c15 = arith.constant 15 : index
    %269 = memref.load %arg2[%c15] : memref<162xf32, #tpu.memory_space<smem>>
    %270 = vector.broadcast %269 : f32 to vector<16x18xf32>
    %271 = arith.mulf %270, %268 : vector<16x18xf32>
    %272 = arith.addf %232, %271 : vector<16x18xf32>
    %c16 = arith.constant 16 : index
    %273 = memref.load %arg2[%c16] : memref<162xf32, #tpu.memory_space<smem>>
    %274 = vector.broadcast %273 : f32 to vector<16x18xf32>
    %275 = arith.mulf %274, %268 : vector<16x18xf32>
    %276 = arith.addf %236, %275 : vector<16x18xf32>
    %c17_94 = arith.constant 17 : index
    %277 = memref.load %arg2[%c17_94] : memref<162xf32, #tpu.memory_space<smem>>
    %278 = vector.broadcast %277 : f32 to vector<16x18xf32>
    %279 = arith.mulf %278, %268 : vector<16x18xf32>
    %280 = arith.addf %240, %279 : vector<16x18xf32>
    %c69 = arith.constant 69 : index
    %281 = memref.load %arg2[%c69] : memref<162xf32, #tpu.memory_space<smem>>
    %282 = vector.broadcast %281 : f32 to vector<16x18xf32>
    %283 = arith.mulf %282, %268 : vector<16x18xf32>
    %284 = arith.addf %244, %283 : vector<16x18xf32>
    %c70 = arith.constant 70 : index
    %285 = memref.load %arg2[%c70] : memref<162xf32, #tpu.memory_space<smem>>
    %286 = vector.broadcast %285 : f32 to vector<16x18xf32>
    %287 = arith.mulf %286, %268 : vector<16x18xf32>
    %288 = arith.addf %248, %287 : vector<16x18xf32>
    %c71 = arith.constant 71 : index
    %289 = memref.load %arg2[%c71] : memref<162xf32, #tpu.memory_space<smem>>
    %290 = vector.broadcast %289 : f32 to vector<16x18xf32>
    %291 = arith.mulf %290, %268 : vector<16x18xf32>
    %292 = arith.addf %252, %291 : vector<16x18xf32>
    %c123 = arith.constant 123 : index
    %293 = memref.load %arg2[%c123] : memref<162xf32, #tpu.memory_space<smem>>
    %294 = vector.broadcast %293 : f32 to vector<16x18xf32>
    %295 = arith.mulf %294, %268 : vector<16x18xf32>
    %296 = arith.addf %256, %295 : vector<16x18xf32>
    %c124 = arith.constant 124 : index
    %297 = memref.load %arg2[%c124] : memref<162xf32, #tpu.memory_space<smem>>
    %298 = vector.broadcast %297 : f32 to vector<16x18xf32>
    %299 = arith.mulf %298, %268 : vector<16x18xf32>
    %300 = arith.addf %260, %299 : vector<16x18xf32>
    %c125 = arith.constant 125 : index
    %301 = memref.load %arg2[%c125] : memref<162xf32, #tpu.memory_space<smem>>
    %302 = vector.broadcast %301 : f32 to vector<16x18xf32>
    %303 = arith.mulf %302, %268 : vector<16x18xf32>
    %304 = arith.addf %264, %303 : vector<16x18xf32>
    %c0_i32_95 = arith.constant 0 : i32
    %305 = arith.addi %73, %c0_i32_95 : i32
    %c2_96 = arith.constant 2 : index
    %306 = arith.index_cast %305 : i32 to index
    %c0_97 = arith.constant 0 : index
    %307 = vector.load %arg7[%c2_96, %306, %c0_97] : memref<6x18x18xf32, #tpu.memory_space<vmem>>, vector<1x16x18xf32>
    %308 = vector.shape_cast %307 : vector<1x16x18xf32> to vector<16x18xf32>
    %c18 = arith.constant 18 : index
    %309 = memref.load %arg2[%c18] : memref<162xf32, #tpu.memory_space<smem>>
    %310 = vector.broadcast %309 : f32 to vector<16x18xf32>
    %311 = arith.mulf %310, %308 : vector<16x18xf32>
    %312 = arith.addf %272, %311 : vector<16x18xf32>
    %c19 = arith.constant 19 : index
    %313 = memref.load %arg2[%c19] : memref<162xf32, #tpu.memory_space<smem>>
    %314 = vector.broadcast %313 : f32 to vector<16x18xf32>
    %315 = arith.mulf %314, %308 : vector<16x18xf32>
    %316 = arith.addf %276, %315 : vector<16x18xf32>
    %c20 = arith.constant 20 : index
    %317 = memref.load %arg2[%c20] : memref<162xf32, #tpu.memory_space<smem>>
    %318 = vector.broadcast %317 : f32 to vector<16x18xf32>
    %319 = arith.mulf %318, %308 : vector<16x18xf32>
    %320 = arith.addf %280, %319 : vector<16x18xf32>
    %c72 = arith.constant 72 : index
    %321 = memref.load %arg2[%c72] : memref<162xf32, #tpu.memory_space<smem>>
    %322 = vector.broadcast %321 : f32 to vector<16x18xf32>
    %323 = arith.mulf %322, %308 : vector<16x18xf32>
    %324 = arith.addf %284, %323 : vector<16x18xf32>
    %c73 = arith.constant 73 : index
    %325 = memref.load %arg2[%c73] : memref<162xf32, #tpu.memory_space<smem>>
    %326 = vector.broadcast %325 : f32 to vector<16x18xf32>
    %327 = arith.mulf %326, %308 : vector<16x18xf32>
    %328 = arith.addf %288, %327 : vector<16x18xf32>
    %c74 = arith.constant 74 : index
    %329 = memref.load %arg2[%c74] : memref<162xf32, #tpu.memory_space<smem>>
    %330 = vector.broadcast %329 : f32 to vector<16x18xf32>
    %331 = arith.mulf %330, %308 : vector<16x18xf32>
    %332 = arith.addf %292, %331 : vector<16x18xf32>
    %c126 = arith.constant 126 : index
    %333 = memref.load %arg2[%c126] : memref<162xf32, #tpu.memory_space<smem>>
    %334 = vector.broadcast %333 : f32 to vector<16x18xf32>
    %335 = arith.mulf %334, %308 : vector<16x18xf32>
    %336 = arith.addf %296, %335 : vector<16x18xf32>
    %c127 = arith.constant 127 : index
    %337 = memref.load %arg2[%c127] : memref<162xf32, #tpu.memory_space<smem>>
    %338 = vector.broadcast %337 : f32 to vector<16x18xf32>
    %339 = arith.mulf %338, %308 : vector<16x18xf32>
    %340 = arith.addf %300, %339 : vector<16x18xf32>
    %c128 = arith.constant 128 : index
    %341 = memref.load %arg2[%c128] : memref<162xf32, #tpu.memory_space<smem>>
    %342 = vector.broadcast %341 : f32 to vector<16x18xf32>
    %343 = arith.mulf %342, %308 : vector<16x18xf32>
    %344 = arith.addf %304, %343 : vector<16x18xf32>
    %c1_i32_98 = arith.constant 1 : i32
    %345 = arith.addi %73, %c1_i32_98 : i32
    %c2_99 = arith.constant 2 : index
    %346 = arith.index_cast %345 : i32 to index
    %c0_100 = arith.constant 0 : index
    %347 = vector.load %arg7[%c2_99, %346, %c0_100] : memref<6x18x18xf32, #tpu.memory_space<vmem>>, vector<1x16x18xf32>
    %348 = vector.shape_cast %347 : vector<1x16x18xf32> to vector<16x18xf32>
    %c21 = arith.constant 21 : index
    %349 = memref.load %arg2[%c21] : memref<162xf32, #tpu.memory_space<smem>>
    %350 = vector.broadcast %349 : f32 to vector<16x18xf32>
    %351 = arith.mulf %350, %348 : vector<16x18xf32>
    %352 = arith.addf %312, %351 : vector<16x18xf32>
    %c22 = arith.constant 22 : index
    %353 = memref.load %arg2[%c22] : memref<162xf32, #tpu.memory_space<smem>>
    %354 = vector.broadcast %353 : f32 to vector<16x18xf32>
    %355 = arith.mulf %354, %348 : vector<16x18xf32>
    %356 = arith.addf %316, %355 : vector<16x18xf32>
    %c23 = arith.constant 23 : index
    %357 = memref.load %arg2[%c23] : memref<162xf32, #tpu.memory_space<smem>>
    %358 = vector.broadcast %357 : f32 to vector<16x18xf32>
    %359 = arith.mulf %358, %348 : vector<16x18xf32>
    %360 = arith.addf %320, %359 : vector<16x18xf32>
    %c75 = arith.constant 75 : index
    %361 = memref.load %arg2[%c75] : memref<162xf32, #tpu.memory_space<smem>>
    %362 = vector.broadcast %361 : f32 to vector<16x18xf32>
    %363 = arith.mulf %362, %348 : vector<16x18xf32>
    %364 = arith.addf %324, %363 : vector<16x18xf32>
    %c76 = arith.constant 76 : index
    %365 = memref.load %arg2[%c76] : memref<162xf32, #tpu.memory_space<smem>>
    %366 = vector.broadcast %365 : f32 to vector<16x18xf32>
    %367 = arith.mulf %366, %348 : vector<16x18xf32>
    %368 = arith.addf %328, %367 : vector<16x18xf32>
    %c77 = arith.constant 77 : index
    %369 = memref.load %arg2[%c77] : memref<162xf32, #tpu.memory_space<smem>>
    %370 = vector.broadcast %369 : f32 to vector<16x18xf32>
    %371 = arith.mulf %370, %348 : vector<16x18xf32>
    %372 = arith.addf %332, %371 : vector<16x18xf32>
    %c129 = arith.constant 129 : index
    %373 = memref.load %arg2[%c129] : memref<162xf32, #tpu.memory_space<smem>>
    %374 = vector.broadcast %373 : f32 to vector<16x18xf32>
    %375 = arith.mulf %374, %348 : vector<16x18xf32>
    %376 = arith.addf %336, %375 : vector<16x18xf32>
    %c130 = arith.constant 130 : index
    %377 = memref.load %arg2[%c130] : memref<162xf32, #tpu.memory_space<smem>>
    %378 = vector.broadcast %377 : f32 to vector<16x18xf32>
    %379 = arith.mulf %378, %348 : vector<16x18xf32>
    %380 = arith.addf %340, %379 : vector<16x18xf32>
    %c131 = arith.constant 131 : index
    %381 = memref.load %arg2[%c131] : memref<162xf32, #tpu.memory_space<smem>>
    %382 = vector.broadcast %381 : f32 to vector<16x18xf32>
    %383 = arith.mulf %382, %348 : vector<16x18xf32>
    %384 = arith.addf %344, %383 : vector<16x18xf32>
    %c2_i32_101 = arith.constant 2 : i32
    %385 = arith.addi %73, %c2_i32_101 : i32
    %c2_102 = arith.constant 2 : index
    %386 = arith.index_cast %385 : i32 to index
    %c0_103 = arith.constant 0 : index
    %387 = vector.load %arg7[%c2_102, %386, %c0_103] : memref<6x18x18xf32, #tpu.memory_space<vmem>>, vector<1x16x18xf32>
    %388 = vector.shape_cast %387 : vector<1x16x18xf32> to vector<16x18xf32>
    %c24 = arith.constant 24 : index
    %389 = memref.load %arg2[%c24] : memref<162xf32, #tpu.memory_space<smem>>
    %390 = vector.broadcast %389 : f32 to vector<16x18xf32>
    %391 = arith.mulf %390, %388 : vector<16x18xf32>
    %392 = arith.addf %352, %391 : vector<16x18xf32>
    %c25 = arith.constant 25 : index
    %393 = memref.load %arg2[%c25] : memref<162xf32, #tpu.memory_space<smem>>
    %394 = vector.broadcast %393 : f32 to vector<16x18xf32>
    %395 = arith.mulf %394, %388 : vector<16x18xf32>
    %396 = arith.addf %356, %395 : vector<16x18xf32>
    %c26 = arith.constant 26 : index
    %397 = memref.load %arg2[%c26] : memref<162xf32, #tpu.memory_space<smem>>
    %398 = vector.broadcast %397 : f32 to vector<16x18xf32>
    %399 = arith.mulf %398, %388 : vector<16x18xf32>
    %400 = arith.addf %360, %399 : vector<16x18xf32>
    %c78 = arith.constant 78 : index
    %401 = memref.load %arg2[%c78] : memref<162xf32, #tpu.memory_space<smem>>
    %402 = vector.broadcast %401 : f32 to vector<16x18xf32>
    %403 = arith.mulf %402, %388 : vector<16x18xf32>
    %404 = arith.addf %364, %403 : vector<16x18xf32>
    %c79 = arith.constant 79 : index
    %405 = memref.load %arg2[%c79] : memref<162xf32, #tpu.memory_space<smem>>
    %406 = vector.broadcast %405 : f32 to vector<16x18xf32>
    %407 = arith.mulf %406, %388 : vector<16x18xf32>
    %408 = arith.addf %368, %407 : vector<16x18xf32>
    %c80 = arith.constant 80 : index
    %409 = memref.load %arg2[%c80] : memref<162xf32, #tpu.memory_space<smem>>
    %410 = vector.broadcast %409 : f32 to vector<16x18xf32>
    %411 = arith.mulf %410, %388 : vector<16x18xf32>
    %412 = arith.addf %372, %411 : vector<16x18xf32>
    %c132 = arith.constant 132 : index
    %413 = memref.load %arg2[%c132] : memref<162xf32, #tpu.memory_space<smem>>
    %414 = vector.broadcast %413 : f32 to vector<16x18xf32>
    %415 = arith.mulf %414, %388 : vector<16x18xf32>
    %416 = arith.addf %376, %415 : vector<16x18xf32>
    %c133 = arith.constant 133 : index
    %417 = memref.load %arg2[%c133] : memref<162xf32, #tpu.memory_space<smem>>
    %418 = vector.broadcast %417 : f32 to vector<16x18xf32>
    %419 = arith.mulf %418, %388 : vector<16x18xf32>
    %420 = arith.addf %380, %419 : vector<16x18xf32>
    %c134 = arith.constant 134 : index
    %421 = memref.load %arg2[%c134] : memref<162xf32, #tpu.memory_space<smem>>
    %422 = vector.broadcast %421 : f32 to vector<16x18xf32>
    %423 = arith.mulf %422, %388 : vector<16x18xf32>
    %424 = arith.addf %384, %423 : vector<16x18xf32>
    %c0_i32_104 = arith.constant 0 : i32
    %425 = arith.addi %73, %c0_i32_104 : i32
    %c3_105 = arith.constant 3 : index
    %426 = arith.index_cast %425 : i32 to index
    %c0_106 = arith.constant 0 : index
    %427 = vector.load %arg7[%c3_105, %426, %c0_106] : memref<6x18x18xf32, #tpu.memory_space<vmem>>, vector<1x16x18xf32>
    %428 = vector.shape_cast %427 : vector<1x16x18xf32> to vector<16x18xf32>
    %c27 = arith.constant 27 : index
    %429 = memref.load %arg2[%c27] : memref<162xf32, #tpu.memory_space<smem>>
    %430 = vector.broadcast %429 : f32 to vector<16x18xf32>
    %431 = arith.mulf %430, %428 : vector<16x18xf32>
    %432 = arith.addf %392, %431 : vector<16x18xf32>
    %c28 = arith.constant 28 : index
    %433 = memref.load %arg2[%c28] : memref<162xf32, #tpu.memory_space<smem>>
    %434 = vector.broadcast %433 : f32 to vector<16x18xf32>
    %435 = arith.mulf %434, %428 : vector<16x18xf32>
    %436 = arith.addf %396, %435 : vector<16x18xf32>
    %c29 = arith.constant 29 : index
    %437 = memref.load %arg2[%c29] : memref<162xf32, #tpu.memory_space<smem>>
    %438 = vector.broadcast %437 : f32 to vector<16x18xf32>
    %439 = arith.mulf %438, %428 : vector<16x18xf32>
    %440 = arith.addf %400, %439 : vector<16x18xf32>
    %c81 = arith.constant 81 : index
    %441 = memref.load %arg2[%c81] : memref<162xf32, #tpu.memory_space<smem>>
    %442 = vector.broadcast %441 : f32 to vector<16x18xf32>
    %443 = arith.mulf %442, %428 : vector<16x18xf32>
    %444 = arith.addf %404, %443 : vector<16x18xf32>
    %c82 = arith.constant 82 : index
    %445 = memref.load %arg2[%c82] : memref<162xf32, #tpu.memory_space<smem>>
    %446 = vector.broadcast %445 : f32 to vector<16x18xf32>
    %447 = arith.mulf %446, %428 : vector<16x18xf32>
    %448 = arith.addf %408, %447 : vector<16x18xf32>
    %c83 = arith.constant 83 : index
    %449 = memref.load %arg2[%c83] : memref<162xf32, #tpu.memory_space<smem>>
    %450 = vector.broadcast %449 : f32 to vector<16x18xf32>
    %451 = arith.mulf %450, %428 : vector<16x18xf32>
    %452 = arith.addf %412, %451 : vector<16x18xf32>
    %c135 = arith.constant 135 : index
    %453 = memref.load %arg2[%c135] : memref<162xf32, #tpu.memory_space<smem>>
    %454 = vector.broadcast %453 : f32 to vector<16x18xf32>
    %455 = arith.mulf %454, %428 : vector<16x18xf32>
    %456 = arith.addf %416, %455 : vector<16x18xf32>
    %c136 = arith.constant 136 : index
    %457 = memref.load %arg2[%c136] : memref<162xf32, #tpu.memory_space<smem>>
    %458 = vector.broadcast %457 : f32 to vector<16x18xf32>
    %459 = arith.mulf %458, %428 : vector<16x18xf32>
    %460 = arith.addf %420, %459 : vector<16x18xf32>
    %c137 = arith.constant 137 : index
    %461 = memref.load %arg2[%c137] : memref<162xf32, #tpu.memory_space<smem>>
    %462 = vector.broadcast %461 : f32 to vector<16x18xf32>
    %463 = arith.mulf %462, %428 : vector<16x18xf32>
    %464 = arith.addf %424, %463 : vector<16x18xf32>
    %c1_i32_107 = arith.constant 1 : i32
    %465 = arith.addi %73, %c1_i32_107 : i32
    %c3_108 = arith.constant 3 : index
    %466 = arith.index_cast %465 : i32 to index
    %c0_109 = arith.constant 0 : index
    %467 = vector.load %arg7[%c3_108, %466, %c0_109] : memref<6x18x18xf32, #tpu.memory_space<vmem>>, vector<1x16x18xf32>
    %468 = vector.shape_cast %467 : vector<1x16x18xf32> to vector<16x18xf32>
    %c30 = arith.constant 30 : index
    %469 = memref.load %arg2[%c30] : memref<162xf32, #tpu.memory_space<smem>>
    %470 = vector.broadcast %469 : f32 to vector<16x18xf32>
    %471 = arith.mulf %470, %468 : vector<16x18xf32>
    %472 = arith.addf %432, %471 : vector<16x18xf32>
    %c31 = arith.constant 31 : index
    %473 = memref.load %arg2[%c31] : memref<162xf32, #tpu.memory_space<smem>>
    %474 = vector.broadcast %473 : f32 to vector<16x18xf32>
    %475 = arith.mulf %474, %468 : vector<16x18xf32>
    %476 = arith.addf %436, %475 : vector<16x18xf32>
    %c32 = arith.constant 32 : index
    %477 = memref.load %arg2[%c32] : memref<162xf32, #tpu.memory_space<smem>>
    %478 = vector.broadcast %477 : f32 to vector<16x18xf32>
    %479 = arith.mulf %478, %468 : vector<16x18xf32>
    %480 = arith.addf %440, %479 : vector<16x18xf32>
    %c84 = arith.constant 84 : index
    %481 = memref.load %arg2[%c84] : memref<162xf32, #tpu.memory_space<smem>>
    %482 = vector.broadcast %481 : f32 to vector<16x18xf32>
    %483 = arith.mulf %482, %468 : vector<16x18xf32>
    %484 = arith.addf %444, %483 : vector<16x18xf32>
    %c85 = arith.constant 85 : index
    %485 = memref.load %arg2[%c85] : memref<162xf32, #tpu.memory_space<smem>>
    %486 = vector.broadcast %485 : f32 to vector<16x18xf32>
    %487 = arith.mulf %486, %468 : vector<16x18xf32>
    %488 = arith.addf %448, %487 : vector<16x18xf32>
    %c86 = arith.constant 86 : index
    %489 = memref.load %arg2[%c86] : memref<162xf32, #tpu.memory_space<smem>>
    %490 = vector.broadcast %489 : f32 to vector<16x18xf32>
    %491 = arith.mulf %490, %468 : vector<16x18xf32>
    %492 = arith.addf %452, %491 : vector<16x18xf32>
    %c138 = arith.constant 138 : index
    %493 = memref.load %arg2[%c138] : memref<162xf32, #tpu.memory_space<smem>>
    %494 = vector.broadcast %493 : f32 to vector<16x18xf32>
    %495 = arith.mulf %494, %468 : vector<16x18xf32>
    %496 = arith.addf %456, %495 : vector<16x18xf32>
    %c139 = arith.constant 139 : index
    %497 = memref.load %arg2[%c139] : memref<162xf32, #tpu.memory_space<smem>>
    %498 = vector.broadcast %497 : f32 to vector<16x18xf32>
    %499 = arith.mulf %498, %468 : vector<16x18xf32>
    %500 = arith.addf %460, %499 : vector<16x18xf32>
    %c140 = arith.constant 140 : index
    %501 = memref.load %arg2[%c140] : memref<162xf32, #tpu.memory_space<smem>>
    %502 = vector.broadcast %501 : f32 to vector<16x18xf32>
    %503 = arith.mulf %502, %468 : vector<16x18xf32>
    %504 = arith.addf %464, %503 : vector<16x18xf32>
    %c2_i32_110 = arith.constant 2 : i32
    %505 = arith.addi %73, %c2_i32_110 : i32
    %c3_111 = arith.constant 3 : index
    %506 = arith.index_cast %505 : i32 to index
    %c0_112 = arith.constant 0 : index
    %507 = vector.load %arg7[%c3_111, %506, %c0_112] : memref<6x18x18xf32, #tpu.memory_space<vmem>>, vector<1x16x18xf32>
    %508 = vector.shape_cast %507 : vector<1x16x18xf32> to vector<16x18xf32>
    %c33 = arith.constant 33 : index
    %509 = memref.load %arg2[%c33] : memref<162xf32, #tpu.memory_space<smem>>
    %510 = vector.broadcast %509 : f32 to vector<16x18xf32>
    %511 = arith.mulf %510, %508 : vector<16x18xf32>
    %512 = arith.addf %472, %511 : vector<16x18xf32>
    %c34 = arith.constant 34 : index
    %513 = memref.load %arg2[%c34] : memref<162xf32, #tpu.memory_space<smem>>
    %514 = vector.broadcast %513 : f32 to vector<16x18xf32>
    %515 = arith.mulf %514, %508 : vector<16x18xf32>
    %516 = arith.addf %476, %515 : vector<16x18xf32>
    %c35 = arith.constant 35 : index
    %517 = memref.load %arg2[%c35] : memref<162xf32, #tpu.memory_space<smem>>
    %518 = vector.broadcast %517 : f32 to vector<16x18xf32>
    %519 = arith.mulf %518, %508 : vector<16x18xf32>
    %520 = arith.addf %480, %519 : vector<16x18xf32>
    %c87 = arith.constant 87 : index
    %521 = memref.load %arg2[%c87] : memref<162xf32, #tpu.memory_space<smem>>
    %522 = vector.broadcast %521 : f32 to vector<16x18xf32>
    %523 = arith.mulf %522, %508 : vector<16x18xf32>
    %524 = arith.addf %484, %523 : vector<16x18xf32>
    %c88 = arith.constant 88 : index
    %525 = memref.load %arg2[%c88] : memref<162xf32, #tpu.memory_space<smem>>
    %526 = vector.broadcast %525 : f32 to vector<16x18xf32>
    %527 = arith.mulf %526, %508 : vector<16x18xf32>
    %528 = arith.addf %488, %527 : vector<16x18xf32>
    %c89 = arith.constant 89 : index
    %529 = memref.load %arg2[%c89] : memref<162xf32, #tpu.memory_space<smem>>
    %530 = vector.broadcast %529 : f32 to vector<16x18xf32>
    %531 = arith.mulf %530, %508 : vector<16x18xf32>
    %532 = arith.addf %492, %531 : vector<16x18xf32>
    %c141 = arith.constant 141 : index
    %533 = memref.load %arg2[%c141] : memref<162xf32, #tpu.memory_space<smem>>
    %534 = vector.broadcast %533 : f32 to vector<16x18xf32>
    %535 = arith.mulf %534, %508 : vector<16x18xf32>
    %536 = arith.addf %496, %535 : vector<16x18xf32>
    %c142 = arith.constant 142 : index
    %537 = memref.load %arg2[%c142] : memref<162xf32, #tpu.memory_space<smem>>
    %538 = vector.broadcast %537 : f32 to vector<16x18xf32>
    %539 = arith.mulf %538, %508 : vector<16x18xf32>
    %540 = arith.addf %500, %539 : vector<16x18xf32>
    %c143 = arith.constant 143 : index
    %541 = memref.load %arg2[%c143] : memref<162xf32, #tpu.memory_space<smem>>
    %542 = vector.broadcast %541 : f32 to vector<16x18xf32>
    %543 = arith.mulf %542, %508 : vector<16x18xf32>
    %544 = arith.addf %504, %543 : vector<16x18xf32>
    %c0_i32_113 = arith.constant 0 : i32
    %545 = arith.addi %73, %c0_i32_113 : i32
    %c4_114 = arith.constant 4 : index
    %546 = arith.index_cast %545 : i32 to index
    %c0_115 = arith.constant 0 : index
    %547 = vector.load %arg7[%c4_114, %546, %c0_115] : memref<6x18x18xf32, #tpu.memory_space<vmem>>, vector<1x16x18xf32>
    %548 = vector.shape_cast %547 : vector<1x16x18xf32> to vector<16x18xf32>
    %c36 = arith.constant 36 : index
    %549 = memref.load %arg2[%c36] : memref<162xf32, #tpu.memory_space<smem>>
    %550 = vector.broadcast %549 : f32 to vector<16x18xf32>
    %551 = arith.mulf %550, %548 : vector<16x18xf32>
    %552 = arith.addf %512, %551 : vector<16x18xf32>
    %c37 = arith.constant 37 : index
    %553 = memref.load %arg2[%c37] : memref<162xf32, #tpu.memory_space<smem>>
    %554 = vector.broadcast %553 : f32 to vector<16x18xf32>
    %555 = arith.mulf %554, %548 : vector<16x18xf32>
    %556 = arith.addf %516, %555 : vector<16x18xf32>
    %c38 = arith.constant 38 : index
    %557 = memref.load %arg2[%c38] : memref<162xf32, #tpu.memory_space<smem>>
    %558 = vector.broadcast %557 : f32 to vector<16x18xf32>
    %559 = arith.mulf %558, %548 : vector<16x18xf32>
    %560 = arith.addf %520, %559 : vector<16x18xf32>
    %c90 = arith.constant 90 : index
    %561 = memref.load %arg2[%c90] : memref<162xf32, #tpu.memory_space<smem>>
    %562 = vector.broadcast %561 : f32 to vector<16x18xf32>
    %563 = arith.mulf %562, %548 : vector<16x18xf32>
    %564 = arith.addf %524, %563 : vector<16x18xf32>
    %c91 = arith.constant 91 : index
    %565 = memref.load %arg2[%c91] : memref<162xf32, #tpu.memory_space<smem>>
    %566 = vector.broadcast %565 : f32 to vector<16x18xf32>
    %567 = arith.mulf %566, %548 : vector<16x18xf32>
    %568 = arith.addf %528, %567 : vector<16x18xf32>
    %c92 = arith.constant 92 : index
    %569 = memref.load %arg2[%c92] : memref<162xf32, #tpu.memory_space<smem>>
    %570 = vector.broadcast %569 : f32 to vector<16x18xf32>
    %571 = arith.mulf %570, %548 : vector<16x18xf32>
    %572 = arith.addf %532, %571 : vector<16x18xf32>
    %c144 = arith.constant 144 : index
    %573 = memref.load %arg2[%c144] : memref<162xf32, #tpu.memory_space<smem>>
    %574 = vector.broadcast %573 : f32 to vector<16x18xf32>
    %575 = arith.mulf %574, %548 : vector<16x18xf32>
    %576 = arith.addf %536, %575 : vector<16x18xf32>
    %c145 = arith.constant 145 : index
    %577 = memref.load %arg2[%c145] : memref<162xf32, #tpu.memory_space<smem>>
    %578 = vector.broadcast %577 : f32 to vector<16x18xf32>
    %579 = arith.mulf %578, %548 : vector<16x18xf32>
    %580 = arith.addf %540, %579 : vector<16x18xf32>
    %c146 = arith.constant 146 : index
    %581 = memref.load %arg2[%c146] : memref<162xf32, #tpu.memory_space<smem>>
    %582 = vector.broadcast %581 : f32 to vector<16x18xf32>
    %583 = arith.mulf %582, %548 : vector<16x18xf32>
    %584 = arith.addf %544, %583 : vector<16x18xf32>
    %c1_i32_116 = arith.constant 1 : i32
    %585 = arith.addi %73, %c1_i32_116 : i32
    %c4_117 = arith.constant 4 : index
    %586 = arith.index_cast %585 : i32 to index
    %c0_118 = arith.constant 0 : index
    %587 = vector.load %arg7[%c4_117, %586, %c0_118] : memref<6x18x18xf32, #tpu.memory_space<vmem>>, vector<1x16x18xf32>
    %588 = vector.shape_cast %587 : vector<1x16x18xf32> to vector<16x18xf32>
    %c39 = arith.constant 39 : index
    %589 = memref.load %arg2[%c39] : memref<162xf32, #tpu.memory_space<smem>>
    %590 = vector.broadcast %589 : f32 to vector<16x18xf32>
    %591 = arith.mulf %590, %588 : vector<16x18xf32>
    %592 = arith.addf %552, %591 : vector<16x18xf32>
    %c40 = arith.constant 40 : index
    %593 = memref.load %arg2[%c40] : memref<162xf32, #tpu.memory_space<smem>>
    %594 = vector.broadcast %593 : f32 to vector<16x18xf32>
    %595 = arith.mulf %594, %588 : vector<16x18xf32>
    %596 = arith.addf %556, %595 : vector<16x18xf32>
    %c41 = arith.constant 41 : index
    %597 = memref.load %arg2[%c41] : memref<162xf32, #tpu.memory_space<smem>>
    %598 = vector.broadcast %597 : f32 to vector<16x18xf32>
    %599 = arith.mulf %598, %588 : vector<16x18xf32>
    %600 = arith.addf %560, %599 : vector<16x18xf32>
    %c93 = arith.constant 93 : index
    %601 = memref.load %arg2[%c93] : memref<162xf32, #tpu.memory_space<smem>>
    %602 = vector.broadcast %601 : f32 to vector<16x18xf32>
    %603 = arith.mulf %602, %588 : vector<16x18xf32>
    %604 = arith.addf %564, %603 : vector<16x18xf32>
    %c94 = arith.constant 94 : index
    %605 = memref.load %arg2[%c94] : memref<162xf32, #tpu.memory_space<smem>>
    %606 = vector.broadcast %605 : f32 to vector<16x18xf32>
    %607 = arith.mulf %606, %588 : vector<16x18xf32>
    %608 = arith.addf %568, %607 : vector<16x18xf32>
    %c95 = arith.constant 95 : index
    %609 = memref.load %arg2[%c95] : memref<162xf32, #tpu.memory_space<smem>>
    %610 = vector.broadcast %609 : f32 to vector<16x18xf32>
    %611 = arith.mulf %610, %588 : vector<16x18xf32>
    %612 = arith.addf %572, %611 : vector<16x18xf32>
    %c147 = arith.constant 147 : index
    %613 = memref.load %arg2[%c147] : memref<162xf32, #tpu.memory_space<smem>>
    %614 = vector.broadcast %613 : f32 to vector<16x18xf32>
    %615 = arith.mulf %614, %588 : vector<16x18xf32>
    %616 = arith.addf %576, %615 : vector<16x18xf32>
    %c148 = arith.constant 148 : index
    %617 = memref.load %arg2[%c148] : memref<162xf32, #tpu.memory_space<smem>>
    %618 = vector.broadcast %617 : f32 to vector<16x18xf32>
    %619 = arith.mulf %618, %588 : vector<16x18xf32>
    %620 = arith.addf %580, %619 : vector<16x18xf32>
    %c149 = arith.constant 149 : index
    %621 = memref.load %arg2[%c149] : memref<162xf32, #tpu.memory_space<smem>>
    %622 = vector.broadcast %621 : f32 to vector<16x18xf32>
    %623 = arith.mulf %622, %588 : vector<16x18xf32>
    %624 = arith.addf %584, %623 : vector<16x18xf32>
    %c2_i32_119 = arith.constant 2 : i32
    %625 = arith.addi %73, %c2_i32_119 : i32
    %c4_120 = arith.constant 4 : index
    %626 = arith.index_cast %625 : i32 to index
    %c0_121 = arith.constant 0 : index
    %627 = vector.load %arg7[%c4_120, %626, %c0_121] : memref<6x18x18xf32, #tpu.memory_space<vmem>>, vector<1x16x18xf32>
    %628 = vector.shape_cast %627 : vector<1x16x18xf32> to vector<16x18xf32>
    %c42 = arith.constant 42 : index
    %629 = memref.load %arg2[%c42] : memref<162xf32, #tpu.memory_space<smem>>
    %630 = vector.broadcast %629 : f32 to vector<16x18xf32>
    %631 = arith.mulf %630, %628 : vector<16x18xf32>
    %632 = arith.addf %592, %631 : vector<16x18xf32>
    %c43 = arith.constant 43 : index
    %633 = memref.load %arg2[%c43] : memref<162xf32, #tpu.memory_space<smem>>
    %634 = vector.broadcast %633 : f32 to vector<16x18xf32>
    %635 = arith.mulf %634, %628 : vector<16x18xf32>
    %636 = arith.addf %596, %635 : vector<16x18xf32>
    %c44 = arith.constant 44 : index
    %637 = memref.load %arg2[%c44] : memref<162xf32, #tpu.memory_space<smem>>
    %638 = vector.broadcast %637 : f32 to vector<16x18xf32>
    %639 = arith.mulf %638, %628 : vector<16x18xf32>
    %640 = arith.addf %600, %639 : vector<16x18xf32>
    %c96 = arith.constant 96 : index
    %641 = memref.load %arg2[%c96] : memref<162xf32, #tpu.memory_space<smem>>
    %642 = vector.broadcast %641 : f32 to vector<16x18xf32>
    %643 = arith.mulf %642, %628 : vector<16x18xf32>
    %644 = arith.addf %604, %643 : vector<16x18xf32>
    %c97 = arith.constant 97 : index
    %645 = memref.load %arg2[%c97] : memref<162xf32, #tpu.memory_space<smem>>
    %646 = vector.broadcast %645 : f32 to vector<16x18xf32>
    %647 = arith.mulf %646, %628 : vector<16x18xf32>
    %648 = arith.addf %608, %647 : vector<16x18xf32>
    %c98 = arith.constant 98 : index
    %649 = memref.load %arg2[%c98] : memref<162xf32, #tpu.memory_space<smem>>
    %650 = vector.broadcast %649 : f32 to vector<16x18xf32>
    %651 = arith.mulf %650, %628 : vector<16x18xf32>
    %652 = arith.addf %612, %651 : vector<16x18xf32>
    %c150 = arith.constant 150 : index
    %653 = memref.load %arg2[%c150] : memref<162xf32, #tpu.memory_space<smem>>
    %654 = vector.broadcast %653 : f32 to vector<16x18xf32>
    %655 = arith.mulf %654, %628 : vector<16x18xf32>
    %656 = arith.addf %616, %655 : vector<16x18xf32>
    %c151 = arith.constant 151 : index
    %657 = memref.load %arg2[%c151] : memref<162xf32, #tpu.memory_space<smem>>
    %658 = vector.broadcast %657 : f32 to vector<16x18xf32>
    %659 = arith.mulf %658, %628 : vector<16x18xf32>
    %660 = arith.addf %620, %659 : vector<16x18xf32>
    %c152 = arith.constant 152 : index
    %661 = memref.load %arg2[%c152] : memref<162xf32, #tpu.memory_space<smem>>
    %662 = vector.broadcast %661 : f32 to vector<16x18xf32>
    %663 = arith.mulf %662, %628 : vector<16x18xf32>
    %664 = arith.addf %624, %663 : vector<16x18xf32>
    %c0_i32_122 = arith.constant 0 : i32
    %665 = arith.addi %73, %c0_i32_122 : i32
    %c5_123 = arith.constant 5 : index
    %666 = arith.index_cast %665 : i32 to index
    %c0_124 = arith.constant 0 : index
    %667 = vector.load %arg7[%c5_123, %666, %c0_124] : memref<6x18x18xf32, #tpu.memory_space<vmem>>, vector<1x16x18xf32>
    %668 = vector.shape_cast %667 : vector<1x16x18xf32> to vector<16x18xf32>
    %c45 = arith.constant 45 : index
    %669 = memref.load %arg2[%c45] : memref<162xf32, #tpu.memory_space<smem>>
    %670 = vector.broadcast %669 : f32 to vector<16x18xf32>
    %671 = arith.mulf %670, %668 : vector<16x18xf32>
    %672 = arith.addf %632, %671 : vector<16x18xf32>
    %c46 = arith.constant 46 : index
    %673 = memref.load %arg2[%c46] : memref<162xf32, #tpu.memory_space<smem>>
    %674 = vector.broadcast %673 : f32 to vector<16x18xf32>
    %675 = arith.mulf %674, %668 : vector<16x18xf32>
    %676 = arith.addf %636, %675 : vector<16x18xf32>
    %c47 = arith.constant 47 : index
    %677 = memref.load %arg2[%c47] : memref<162xf32, #tpu.memory_space<smem>>
    %678 = vector.broadcast %677 : f32 to vector<16x18xf32>
    %679 = arith.mulf %678, %668 : vector<16x18xf32>
    %680 = arith.addf %640, %679 : vector<16x18xf32>
    %c99 = arith.constant 99 : index
    %681 = memref.load %arg2[%c99] : memref<162xf32, #tpu.memory_space<smem>>
    %682 = vector.broadcast %681 : f32 to vector<16x18xf32>
    %683 = arith.mulf %682, %668 : vector<16x18xf32>
    %684 = arith.addf %644, %683 : vector<16x18xf32>
    %c100 = arith.constant 100 : index
    %685 = memref.load %arg2[%c100] : memref<162xf32, #tpu.memory_space<smem>>
    %686 = vector.broadcast %685 : f32 to vector<16x18xf32>
    %687 = arith.mulf %686, %668 : vector<16x18xf32>
    %688 = arith.addf %648, %687 : vector<16x18xf32>
    %c101 = arith.constant 101 : index
    %689 = memref.load %arg2[%c101] : memref<162xf32, #tpu.memory_space<smem>>
    %690 = vector.broadcast %689 : f32 to vector<16x18xf32>
    %691 = arith.mulf %690, %668 : vector<16x18xf32>
    %692 = arith.addf %652, %691 : vector<16x18xf32>
    %c153 = arith.constant 153 : index
    %693 = memref.load %arg2[%c153] : memref<162xf32, #tpu.memory_space<smem>>
    %694 = vector.broadcast %693 : f32 to vector<16x18xf32>
    %695 = arith.mulf %694, %668 : vector<16x18xf32>
    %696 = arith.addf %656, %695 : vector<16x18xf32>
    %c154 = arith.constant 154 : index
    %697 = memref.load %arg2[%c154] : memref<162xf32, #tpu.memory_space<smem>>
    %698 = vector.broadcast %697 : f32 to vector<16x18xf32>
    %699 = arith.mulf %698, %668 : vector<16x18xf32>
    %700 = arith.addf %660, %699 : vector<16x18xf32>
    %c155 = arith.constant 155 : index
    %701 = memref.load %arg2[%c155] : memref<162xf32, #tpu.memory_space<smem>>
    %702 = vector.broadcast %701 : f32 to vector<16x18xf32>
    %703 = arith.mulf %702, %668 : vector<16x18xf32>
    %704 = arith.addf %664, %703 : vector<16x18xf32>
    %c1_i32_125 = arith.constant 1 : i32
    %705 = arith.addi %73, %c1_i32_125 : i32
    %c5_126 = arith.constant 5 : index
    %706 = arith.index_cast %705 : i32 to index
    %c0_127 = arith.constant 0 : index
    %707 = vector.load %arg7[%c5_126, %706, %c0_127] : memref<6x18x18xf32, #tpu.memory_space<vmem>>, vector<1x16x18xf32>
    %708 = vector.shape_cast %707 : vector<1x16x18xf32> to vector<16x18xf32>
    %c48 = arith.constant 48 : index
    %709 = memref.load %arg2[%c48] : memref<162xf32, #tpu.memory_space<smem>>
    %710 = vector.broadcast %709 : f32 to vector<16x18xf32>
    %711 = arith.mulf %710, %708 : vector<16x18xf32>
    %712 = arith.addf %672, %711 : vector<16x18xf32>
    %c49 = arith.constant 49 : index
    %713 = memref.load %arg2[%c49] : memref<162xf32, #tpu.memory_space<smem>>
    %714 = vector.broadcast %713 : f32 to vector<16x18xf32>
    %715 = arith.mulf %714, %708 : vector<16x18xf32>
    %716 = arith.addf %676, %715 : vector<16x18xf32>
    %c50 = arith.constant 50 : index
    %717 = memref.load %arg2[%c50] : memref<162xf32, #tpu.memory_space<smem>>
    %718 = vector.broadcast %717 : f32 to vector<16x18xf32>
    %719 = arith.mulf %718, %708 : vector<16x18xf32>
    %720 = arith.addf %680, %719 : vector<16x18xf32>
    %c102 = arith.constant 102 : index
    %721 = memref.load %arg2[%c102] : memref<162xf32, #tpu.memory_space<smem>>
    %722 = vector.broadcast %721 : f32 to vector<16x18xf32>
    %723 = arith.mulf %722, %708 : vector<16x18xf32>
    %724 = arith.addf %684, %723 : vector<16x18xf32>
    %c103 = arith.constant 103 : index
    %725 = memref.load %arg2[%c103] : memref<162xf32, #tpu.memory_space<smem>>
    %726 = vector.broadcast %725 : f32 to vector<16x18xf32>
    %727 = arith.mulf %726, %708 : vector<16x18xf32>
    %728 = arith.addf %688, %727 : vector<16x18xf32>
    %c104 = arith.constant 104 : index
    %729 = memref.load %arg2[%c104] : memref<162xf32, #tpu.memory_space<smem>>
    %730 = vector.broadcast %729 : f32 to vector<16x18xf32>
    %731 = arith.mulf %730, %708 : vector<16x18xf32>
    %732 = arith.addf %692, %731 : vector<16x18xf32>
    %c156 = arith.constant 156 : index
    %733 = memref.load %arg2[%c156] : memref<162xf32, #tpu.memory_space<smem>>
    %734 = vector.broadcast %733 : f32 to vector<16x18xf32>
    %735 = arith.mulf %734, %708 : vector<16x18xf32>
    %736 = arith.addf %696, %735 : vector<16x18xf32>
    %c157 = arith.constant 157 : index
    %737 = memref.load %arg2[%c157] : memref<162xf32, #tpu.memory_space<smem>>
    %738 = vector.broadcast %737 : f32 to vector<16x18xf32>
    %739 = arith.mulf %738, %708 : vector<16x18xf32>
    %740 = arith.addf %700, %739 : vector<16x18xf32>
    %c158 = arith.constant 158 : index
    %741 = memref.load %arg2[%c158] : memref<162xf32, #tpu.memory_space<smem>>
    %742 = vector.broadcast %741 : f32 to vector<16x18xf32>
    %743 = arith.mulf %742, %708 : vector<16x18xf32>
    %744 = arith.addf %704, %743 : vector<16x18xf32>
    %c2_i32_128 = arith.constant 2 : i32
    %745 = arith.addi %73, %c2_i32_128 : i32
    %c5_129 = arith.constant 5 : index
    %746 = arith.index_cast %745 : i32 to index
    %c0_130 = arith.constant 0 : index
    %747 = vector.load %arg7[%c5_129, %746, %c0_130] : memref<6x18x18xf32, #tpu.memory_space<vmem>>, vector<1x16x18xf32>
    %748 = vector.shape_cast %747 : vector<1x16x18xf32> to vector<16x18xf32>
    %c51 = arith.constant 51 : index
    %749 = memref.load %arg2[%c51] : memref<162xf32, #tpu.memory_space<smem>>
    %750 = vector.broadcast %749 : f32 to vector<16x18xf32>
    %751 = arith.mulf %750, %748 : vector<16x18xf32>
    %752 = arith.addf %712, %751 : vector<16x18xf32>
    %c52 = arith.constant 52 : index
    %753 = memref.load %arg2[%c52] : memref<162xf32, #tpu.memory_space<smem>>
    %754 = vector.broadcast %753 : f32 to vector<16x18xf32>
    %755 = arith.mulf %754, %748 : vector<16x18xf32>
    %756 = arith.addf %716, %755 : vector<16x18xf32>
    %c53 = arith.constant 53 : index
    %757 = memref.load %arg2[%c53] : memref<162xf32, #tpu.memory_space<smem>>
    %758 = vector.broadcast %757 : f32 to vector<16x18xf32>
    %759 = arith.mulf %758, %748 : vector<16x18xf32>
    %760 = arith.addf %720, %759 : vector<16x18xf32>
    %c105 = arith.constant 105 : index
    %761 = memref.load %arg2[%c105] : memref<162xf32, #tpu.memory_space<smem>>
    %762 = vector.broadcast %761 : f32 to vector<16x18xf32>
    %763 = arith.mulf %762, %748 : vector<16x18xf32>
    %764 = arith.addf %724, %763 : vector<16x18xf32>
    %c106 = arith.constant 106 : index
    %765 = memref.load %arg2[%c106] : memref<162xf32, #tpu.memory_space<smem>>
    %766 = vector.broadcast %765 : f32 to vector<16x18xf32>
    %767 = arith.mulf %766, %748 : vector<16x18xf32>
    %768 = arith.addf %728, %767 : vector<16x18xf32>
    %c107 = arith.constant 107 : index
    %769 = memref.load %arg2[%c107] : memref<162xf32, #tpu.memory_space<smem>>
    %770 = vector.broadcast %769 : f32 to vector<16x18xf32>
    %771 = arith.mulf %770, %748 : vector<16x18xf32>
    %772 = arith.addf %732, %771 : vector<16x18xf32>
    %c159 = arith.constant 159 : index
    %773 = memref.load %arg2[%c159] : memref<162xf32, #tpu.memory_space<smem>>
    %774 = vector.broadcast %773 : f32 to vector<16x18xf32>
    %775 = arith.mulf %774, %748 : vector<16x18xf32>
    %776 = arith.addf %736, %775 : vector<16x18xf32>
    %c160 = arith.constant 160 : index
    %777 = memref.load %arg2[%c160] : memref<162xf32, #tpu.memory_space<smem>>
    %778 = vector.broadcast %777 : f32 to vector<16x18xf32>
    %779 = arith.mulf %778, %748 : vector<16x18xf32>
    %780 = arith.addf %740, %779 : vector<16x18xf32>
    %c161 = arith.constant 161 : index
    %781 = memref.load %arg2[%c161] : memref<162xf32, #tpu.memory_space<smem>>
    %782 = vector.broadcast %781 : f32 to vector<16x18xf32>
    %783 = arith.mulf %782, %748 : vector<16x18xf32>
    %784 = arith.addf %744, %783 : vector<16x18xf32>
    %785 = vector.extract_strided_slice %752 {offsets = [0, 0], sizes = [16, 16], strides = [1, 1]} : vector<16x18xf32> to vector<16x16xf32>
    %cst_131 = arith.constant 0.000000e+00 : f32
    %786 = vector.broadcast %cst_131 : f32 to vector<16x16xf32>
    %787 = arith.select %69, %785, %786 : vector<16x16xi1>, vector<16x16xf32>
    %788 = vector.extract_strided_slice %756 {offsets = [0, 1], sizes = [16, 16], strides = [1, 1]} : vector<16x18xf32> to vector<16x16xf32>
    %789 = vector.extract_strided_slice %760 {offsets = [0, 2], sizes = [16, 16], strides = [1, 1]} : vector<16x18xf32> to vector<16x16xf32>
    %cst_132 = arith.constant 0.000000e+00 : f32
    %790 = vector.broadcast %cst_132 : f32 to vector<16x16xf32>
    %791 = arith.select %71, %789, %790 : vector<16x16xi1>, vector<16x16xf32>
    %792 = arith.addf %787, %788 : vector<16x16xf32>
    %793 = arith.addf %792, %791 : vector<16x16xf32>
    %c0_133 = arith.constant 0 : index
    %794 = memref.load %arg3[%c0_133] : memref<3xf32, #tpu.memory_space<smem>>
    %795 = vector.broadcast %794 : f32 to vector<16x16xf32>
    %796 = arith.addf %793, %795 : vector<16x16xf32>
    %797 = vector.extract_strided_slice %764 {offsets = [0, 0], sizes = [16, 16], strides = [1, 1]} : vector<16x18xf32> to vector<16x16xf32>
    %cst_134 = arith.constant 0.000000e+00 : f32
    %798 = vector.broadcast %cst_134 : f32 to vector<16x16xf32>
    %799 = arith.select %69, %797, %798 : vector<16x16xi1>, vector<16x16xf32>
    %800 = vector.extract_strided_slice %768 {offsets = [0, 1], sizes = [16, 16], strides = [1, 1]} : vector<16x18xf32> to vector<16x16xf32>
    %801 = vector.extract_strided_slice %772 {offsets = [0, 2], sizes = [16, 16], strides = [1, 1]} : vector<16x18xf32> to vector<16x16xf32>
    %cst_135 = arith.constant 0.000000e+00 : f32
    %802 = vector.broadcast %cst_135 : f32 to vector<16x16xf32>
    %803 = arith.select %71, %801, %802 : vector<16x16xi1>, vector<16x16xf32>
    %804 = arith.addf %799, %800 : vector<16x16xf32>
    %805 = arith.addf %804, %803 : vector<16x16xf32>
    %c1_136 = arith.constant 1 : index
    %806 = memref.load %arg3[%c1_136] : memref<3xf32, #tpu.memory_space<smem>>
    %807 = vector.broadcast %806 : f32 to vector<16x16xf32>
    %808 = arith.addf %805, %807 : vector<16x16xf32>
    %809 = vector.extract_strided_slice %776 {offsets = [0, 0], sizes = [16, 16], strides = [1, 1]} : vector<16x18xf32> to vector<16x16xf32>
    %cst_137 = arith.constant 0.000000e+00 : f32
    %810 = vector.broadcast %cst_137 : f32 to vector<16x16xf32>
    %811 = arith.select %69, %809, %810 : vector<16x16xi1>, vector<16x16xf32>
    %812 = vector.extract_strided_slice %780 {offsets = [0, 1], sizes = [16, 16], strides = [1, 1]} : vector<16x18xf32> to vector<16x16xf32>
    %813 = vector.extract_strided_slice %784 {offsets = [0, 2], sizes = [16, 16], strides = [1, 1]} : vector<16x18xf32> to vector<16x16xf32>
    %cst_138 = arith.constant 0.000000e+00 : f32
    %814 = vector.broadcast %cst_138 : f32 to vector<16x16xf32>
    %815 = arith.select %71, %813, %814 : vector<16x16xi1>, vector<16x16xf32>
    %816 = arith.addf %811, %812 : vector<16x16xf32>
    %817 = arith.addf %816, %815 : vector<16x16xf32>
    %c2_139 = arith.constant 2 : index
    %818 = memref.load %arg3[%c2_139] : memref<3xf32, #tpu.memory_space<smem>>
    %819 = vector.broadcast %818 : f32 to vector<16x16xf32>
    %820 = arith.addf %817, %819 : vector<16x16xf32>
    %c0_140 = arith.constant 0 : index
    %c0_141 = arith.constant 0 : index
    %821 = arith.index_cast %73 : i32 to index
    %c0_142 = arith.constant 0 : index
    %822 = vector.load %arg6[%c0_140, %c0_141, %821, %c0_142] : memref<1x3x16x16xf32, #tpu.memory_space<vmem>>, vector<1x1x16x16xf32>
    %823 = vector.shape_cast %822 : vector<1x1x16x16xf32> to vector<16x16xf32>
    %824 = vector.shape_cast %796 : vector<16x16xf32> to vector<1x1x16x16xf32>
    tpu.vector_store %arg6[%c0_140, %c0_141, %821, %c0_142], %824 {strides = array<i32>} : memref<1x3x16x16xf32, #tpu.memory_space<vmem>>, vector<1x1x16x16xf32>,
    %c0_143 = arith.constant 0 : index
    %c1_144 = arith.constant 1 : index
    %825 = arith.index_cast %73 : i32 to index
    %c0_145 = arith.constant 0 : index
    %826 = vector.load %arg6[%c0_143, %c1_144, %825, %c0_145] : memref<1x3x16x16xf32, #tpu.memory_space<vmem>>, vector<1x1x16x16xf32>
    %827 = vector.shape_cast %826 : vector<1x1x16x16xf32> to vector<16x16xf32>
    %828 = vector.shape_cast %808 : vector<16x16xf32> to vector<1x1x16x16xf32>
    tpu.vector_store %arg6[%c0_143, %c1_144, %825, %c0_145], %828 {strides = array<i32>} : memref<1x3x16x16xf32, #tpu.memory_space<vmem>>, vector<1x1x16x16xf32>,
    %c0_146 = arith.constant 0 : index
    %c2_147 = arith.constant 2 : index
    %829 = arith.index_cast %73 : i32 to index
    %c0_148 = arith.constant 0 : index
    %830 = vector.load %arg6[%c0_146, %c2_147, %829, %c0_148] : memref<1x3x16x16xf32, #tpu.memory_space<vmem>>, vector<1x1x16x16xf32>
    %831 = vector.shape_cast %830 : vector<1x1x16x16xf32> to vector<16x16xf32>
    %832 = vector.shape_cast %820 : vector<16x16xf32> to vector<1x1x16x16xf32>
    tpu.vector_store %arg6[%c0_146, %c2_147, %829, %c0_148], %832 {strides = array<i32>} : memref<1x3x16x16xf32, #tpu.memory_space<vmem>>, vector<1x1x16x16xf32>,
    %c3_149 = arith.constant 3 : index
    %833 = arith.index_cast %73 : i32 to index
    %c0_150 = arith.constant 0 : index
    %834 = vector.load %arg7[%c3_149, %833, %c0_150] : memref<6x18x18xf32, #tpu.memory_space<vmem>>, vector<1x18x18xf32>
    %835 = vector.shape_cast %834 : vector<1x18x18xf32> to vector<18x18xf32>
    %c0_151 = arith.constant 0 : index
    %836 = arith.index_cast %73 : i32 to index
    %c0_152 = arith.constant 0 : index
    %837 = vector.load %arg7[%c0_151, %836, %c0_152] : memref<6x18x18xf32, #tpu.memory_space<vmem>>, vector<1x18x18xf32>
    %838 = vector.shape_cast %837 : vector<1x18x18xf32> to vector<18x18xf32>
    %839 = arith.subf %835, %838 : vector<18x18xf32>
    %c0_153 = arith.constant 0 : index
    %c0_154 = arith.constant 0 : index
    %c0_155 = arith.constant 0 : index
    %840 = vector.load %arg8[%c0_153, %c0_154, %c0_155] : memref<3x18x18xf32, #tpu.memory_space<vmem>>, vector<1x18x18xf32>
    %841 = vector.shape_cast %840 : vector<1x18x18xf32> to vector<18x18xf32>
    %842 = vector.shape_cast %839 : vector<18x18xf32> to vector<1x18x18xf32>
    tpu.vector_store %arg8[%c0_153, %c0_154, %c0_155], %842 {strides = array<i32>} : memref<3x18x18xf32, #tpu.memory_space<vmem>>, vector<1x18x18xf32>,
    %c4_156 = arith.constant 4 : index
    %843 = arith.index_cast %73 : i32 to index
    %c0_157 = arith.constant 0 : index
    %844 = vector.load %arg7[%c4_156, %843, %c0_157] : memref<6x18x18xf32, #tpu.memory_space<vmem>>, vector<1x18x18xf32>
    %845 = vector.shape_cast %844 : vector<1x18x18xf32> to vector<18x18xf32>
    %c1_158 = arith.constant 1 : index
    %846 = arith.index_cast %73 : i32 to index
    %c0_159 = arith.constant 0 : index
    %847 = vector.load %arg7[%c1_158, %846, %c0_159] : memref<6x18x18xf32, #tpu.memory_space<vmem>>, vector<1x18x18xf32>
    %848 = vector.shape_cast %847 : vector<1x18x18xf32> to vector<18x18xf32>
    %849 = arith.subf %845, %848 : vector<18x18xf32>
    %c1_160 = arith.constant 1 : index
    %c0_161 = arith.constant 0 : index
    %c0_162 = arith.constant 0 : index
    %850 = vector.load %arg8[%c1_160, %c0_161, %c0_162] : memref<3x18x18xf32, #tpu.memory_space<vmem>>, vector<1x18x18xf32>
    %851 = vector.shape_cast %850 : vector<1x18x18xf32> to vector<18x18xf32>
    %852 = vector.shape_cast %849 : vector<18x18xf32> to vector<1x18x18xf32>
    tpu.vector_store %arg8[%c1_160, %c0_161, %c0_162], %852 {strides = array<i32>} : memref<3x18x18xf32, #tpu.memory_space<vmem>>, vector<1x18x18xf32>,
    %c5_163 = arith.constant 5 : index
    %853 = arith.index_cast %73 : i32 to index
    %c0_164 = arith.constant 0 : index
    %854 = vector.load %arg7[%c5_163, %853, %c0_164] : memref<6x18x18xf32, #tpu.memory_space<vmem>>, vector<1x18x18xf32>
    %855 = vector.shape_cast %854 : vector<1x18x18xf32> to vector<18x18xf32>
    %c2_165 = arith.constant 2 : index
    %856 = arith.index_cast %73 : i32 to index
    %c0_166 = arith.constant 0 : index
    %857 = vector.load %arg7[%c2_165, %856, %c0_166] : memref<6x18x18xf32, #tpu.memory_space<vmem>>, vector<1x18x18xf32>
    %858 = vector.shape_cast %857 : vector<1x18x18xf32> to vector<18x18xf32>
    %859 = arith.subf %855, %858 : vector<18x18xf32>
    %c2_167 = arith.constant 2 : index
    %c0_168 = arith.constant 0 : index
    %c0_169 = arith.constant 0 : index
    %860 = vector.load %arg8[%c2_167, %c0_168, %c0_169] : memref<3x18x18xf32, #tpu.memory_space<vmem>>, vector<1x18x18xf32>
    %861 = vector.shape_cast %860 : vector<1x18x18xf32> to vector<18x18xf32>
    %862 = vector.shape_cast %859 : vector<18x18xf32> to vector<1x18x18xf32>
    tpu.vector_store %arg8[%c2_167, %c0_168, %c0_169], %862 {strides = array<i32>} : memref<3x18x18xf32, #tpu.memory_space<vmem>>, vector<1x18x18xf32>,
    %c0_170 = arith.constant 0 : index
    %c0_171 = arith.constant 0 : index
    %c0_172 = arith.constant 0 : index
    %863 = vector.load %arg8[%c0_170, %c0_171, %c0_172] : memref<3x18x18xf32, #tpu.memory_space<vmem>>, vector<1x16x18xf32>
    %864 = vector.shape_cast %863 : vector<1x16x18xf32> to vector<16x18xf32>
    %c0_173 = arith.constant 0 : index
    %865 = memref.load %arg4[%c0_173] : memref<81xf32, #tpu.memory_space<smem>>
    %866 = vector.broadcast %865 : f32 to vector<16x18xf32>
    %867 = arith.mulf %866, %864 : vector<16x18xf32>
    %c1_174 = arith.constant 1 : index
    %868 = memref.load %arg4[%c1_174] : memref<81xf32, #tpu.memory_space<smem>>
    %869 = vector.broadcast %868 : f32 to vector<16x18xf32>
    %870 = arith.mulf %869, %864 : vector<16x18xf32>
    %c2_175 = arith.constant 2 : index
    %871 = memref.load %arg4[%c2_175] : memref<81xf32, #tpu.memory_space<smem>>
    %872 = vector.broadcast %871 : f32 to vector<16x18xf32>
    %873 = arith.mulf %872, %864 : vector<16x18xf32>
    %c27_176 = arith.constant 27 : index
    %874 = memref.load %arg4[%c27_176] : memref<81xf32, #tpu.memory_space<smem>>
    %875 = vector.broadcast %874 : f32 to vector<16x18xf32>
    %876 = arith.mulf %875, %864 : vector<16x18xf32>
    %c28_177 = arith.constant 28 : index
    %877 = memref.load %arg4[%c28_177] : memref<81xf32, #tpu.memory_space<smem>>
    %878 = vector.broadcast %877 : f32 to vector<16x18xf32>
    %879 = arith.mulf %878, %864 : vector<16x18xf32>
    %c29_178 = arith.constant 29 : index
    %880 = memref.load %arg4[%c29_178] : memref<81xf32, #tpu.memory_space<smem>>
    %881 = vector.broadcast %880 : f32 to vector<16x18xf32>
    %882 = arith.mulf %881, %864 : vector<16x18xf32>
    %c54_179 = arith.constant 54 : index
    %883 = memref.load %arg4[%c54_179] : memref<81xf32, #tpu.memory_space<smem>>
    %884 = vector.broadcast %883 : f32 to vector<16x18xf32>
    %885 = arith.mulf %884, %864 : vector<16x18xf32>
    %c55_180 = arith.constant 55 : index
    %886 = memref.load %arg4[%c55_180] : memref<81xf32, #tpu.memory_space<smem>>
    %887 = vector.broadcast %886 : f32 to vector<16x18xf32>
    %888 = arith.mulf %887, %864 : vector<16x18xf32>
    %c56_181 = arith.constant 56 : index
    %889 = memref.load %arg4[%c56_181] : memref<81xf32, #tpu.memory_space<smem>>
    %890 = vector.broadcast %889 : f32 to vector<16x18xf32>
    %891 = arith.mulf %890, %864 : vector<16x18xf32>
    %c0_182 = arith.constant 0 : index
    %c1_183 = arith.constant 1 : index
    %c0_184 = arith.constant 0 : index
    %892 = vector.load %arg8[%c0_182, %c1_183, %c0_184] : memref<3x18x18xf32, #tpu.memory_space<vmem>>, vector<1x16x18xf32>
    %893 = vector.shape_cast %892 : vector<1x16x18xf32> to vector<16x18xf32>
    %c3_185 = arith.constant 3 : index
    %894 = memref.load %arg4[%c3_185] : memref<81xf32, #tpu.memory_space<smem>>
    %895 = vector.broadcast %894 : f32 to vector<16x18xf32>
    %896 = arith.mulf %895, %893 : vector<16x18xf32>
    %897 = arith.addf %867, %896 : vector<16x18xf32>
    %c4_186 = arith.constant 4 : index
    %898 = memref.load %arg4[%c4_186] : memref<81xf32, #tpu.memory_space<smem>>
    %899 = vector.broadcast %898 : f32 to vector<16x18xf32>
    %900 = arith.mulf %899, %893 : vector<16x18xf32>
    %901 = arith.addf %870, %900 : vector<16x18xf32>
    %c5_187 = arith.constant 5 : index
    %902 = memref.load %arg4[%c5_187] : memref<81xf32, #tpu.memory_space<smem>>
    %903 = vector.broadcast %902 : f32 to vector<16x18xf32>
    %904 = arith.mulf %903, %893 : vector<16x18xf32>
    %905 = arith.addf %873, %904 : vector<16x18xf32>
    %c30_188 = arith.constant 30 : index
    %906 = memref.load %arg4[%c30_188] : memref<81xf32, #tpu.memory_space<smem>>
    %907 = vector.broadcast %906 : f32 to vector<16x18xf32>
    %908 = arith.mulf %907, %893 : vector<16x18xf32>
    %909 = arith.addf %876, %908 : vector<16x18xf32>
    %c31_189 = arith.constant 31 : index
    %910 = memref.load %arg4[%c31_189] : memref<81xf32, #tpu.memory_space<smem>>
    %911 = vector.broadcast %910 : f32 to vector<16x18xf32>
    %912 = arith.mulf %911, %893 : vector<16x18xf32>
    %913 = arith.addf %879, %912 : vector<16x18xf32>
    %c32_190 = arith.constant 32 : index
    %914 = memref.load %arg4[%c32_190] : memref<81xf32, #tpu.memory_space<smem>>
    %915 = vector.broadcast %914 : f32 to vector<16x18xf32>
    %916 = arith.mulf %915, %893 : vector<16x18xf32>
    %917 = arith.addf %882, %916 : vector<16x18xf32>
    %c57_191 = arith.constant 57 : index
    %918 = memref.load %arg4[%c57_191] : memref<81xf32, #tpu.memory_space<smem>>
    %919 = vector.broadcast %918 : f32 to vector<16x18xf32>
    %920 = arith.mulf %919, %893 : vector<16x18xf32>
    %921 = arith.addf %885, %920 : vector<16x18xf32>
    %c58_192 = arith.constant 58 : index
    %922 = memref.load %arg4[%c58_192] : memref<81xf32, #tpu.memory_space<smem>>
    %923 = vector.broadcast %922 : f32 to vector<16x18xf32>
    %924 = arith.mulf %923, %893 : vector<16x18xf32>
    %925 = arith.addf %888, %924 : vector<16x18xf32>
    %c59_193 = arith.constant 59 : index
    %926 = memref.load %arg4[%c59_193] : memref<81xf32, #tpu.memory_space<smem>>
    %927 = vector.broadcast %926 : f32 to vector<16x18xf32>
    %928 = arith.mulf %927, %893 : vector<16x18xf32>
    %929 = arith.addf %891, %928 : vector<16x18xf32>
    %c0_194 = arith.constant 0 : index
    %c2_195 = arith.constant 2 : index
    %c0_196 = arith.constant 0 : index
    %930 = vector.load %arg8[%c0_194, %c2_195, %c0_196] : memref<3x18x18xf32, #tpu.memory_space<vmem>>, vector<1x16x18xf32>
    %931 = vector.shape_cast %930 : vector<1x16x18xf32> to vector<16x18xf32>
    %c6_197 = arith.constant 6 : index
    %932 = memref.load %arg4[%c6_197] : memref<81xf32, #tpu.memory_space<smem>>
    %933 = vector.broadcast %932 : f32 to vector<16x18xf32>
    %934 = arith.mulf %933, %931 : vector<16x18xf32>
    %935 = arith.addf %897, %934 : vector<16x18xf32>
    %c7_198 = arith.constant 7 : index
    %936 = memref.load %arg4[%c7_198] : memref<81xf32, #tpu.memory_space<smem>>
    %937 = vector.broadcast %936 : f32 to vector<16x18xf32>
    %938 = arith.mulf %937, %931 : vector<16x18xf32>
    %939 = arith.addf %901, %938 : vector<16x18xf32>
    %c8_199 = arith.constant 8 : index
    %940 = memref.load %arg4[%c8_199] : memref<81xf32, #tpu.memory_space<smem>>
    %941 = vector.broadcast %940 : f32 to vector<16x18xf32>
    %942 = arith.mulf %941, %931 : vector<16x18xf32>
    %943 = arith.addf %905, %942 : vector<16x18xf32>
    %c33_200 = arith.constant 33 : index
    %944 = memref.load %arg4[%c33_200] : memref<81xf32, #tpu.memory_space<smem>>
    %945 = vector.broadcast %944 : f32 to vector<16x18xf32>
    %946 = arith.mulf %945, %931 : vector<16x18xf32>
    %947 = arith.addf %909, %946 : vector<16x18xf32>
    %c34_201 = arith.constant 34 : index
    %948 = memref.load %arg4[%c34_201] : memref<81xf32, #tpu.memory_space<smem>>
    %949 = vector.broadcast %948 : f32 to vector<16x18xf32>
    %950 = arith.mulf %949, %931 : vector<16x18xf32>
    %951 = arith.addf %913, %950 : vector<16x18xf32>
    %c35_202 = arith.constant 35 : index
    %952 = memref.load %arg4[%c35_202] : memref<81xf32, #tpu.memory_space<smem>>
    %953 = vector.broadcast %952 : f32 to vector<16x18xf32>
    %954 = arith.mulf %953, %931 : vector<16x18xf32>
    %955 = arith.addf %917, %954 : vector<16x18xf32>
    %c60_203 = arith.constant 60 : index
    %956 = memref.load %arg4[%c60_203] : memref<81xf32, #tpu.memory_space<smem>>
    %957 = vector.broadcast %956 : f32 to vector<16x18xf32>
    %958 = arith.mulf %957, %931 : vector<16x18xf32>
    %959 = arith.addf %921, %958 : vector<16x18xf32>
    %c61_204 = arith.constant 61 : index
    %960 = memref.load %arg4[%c61_204] : memref<81xf32, #tpu.memory_space<smem>>
    %961 = vector.broadcast %960 : f32 to vector<16x18xf32>
    %962 = arith.mulf %961, %931 : vector<16x18xf32>
    %963 = arith.addf %925, %962 : vector<16x18xf32>
    %c62_205 = arith.constant 62 : index
    %964 = memref.load %arg4[%c62_205] : memref<81xf32, #tpu.memory_space<smem>>
    %965 = vector.broadcast %964 : f32 to vector<16x18xf32>
    %966 = arith.mulf %965, %931 : vector<16x18xf32>
    %967 = arith.addf %929, %966 : vector<16x18xf32>
    %c1_206 = arith.constant 1 : index
    %c0_207 = arith.constant 0 : index
    %c0_208 = arith.constant 0 : index
    %968 = vector.load %arg8[%c1_206, %c0_207, %c0_208] : memref<3x18x18xf32, #tpu.memory_space<vmem>>, vector<1x16x18xf32>
    %969 = vector.shape_cast %968 : vector<1x16x18xf32> to vector<16x18xf32>
    %c9_209 = arith.constant 9 : index
    %970 = memref.load %arg4[%c9_209] : memref<81xf32, #tpu.memory_space<smem>>
    %971 = vector.broadcast %970 : f32 to vector<16x18xf32>
    %972 = arith.mulf %971, %969 : vector<16x18xf32>
    %973 = arith.addf %935, %972 : vector<16x18xf32>
    %c10_210 = arith.constant 10 : index
    %974 = memref.load %arg4[%c10_210] : memref<81xf32, #tpu.memory_space<smem>>
    %975 = vector.broadcast %974 : f32 to vector<16x18xf32>
    %976 = arith.mulf %975, %969 : vector<16x18xf32>
    %977 = arith.addf %939, %976 : vector<16x18xf32>
    %c11_211 = arith.constant 11 : index
    %978 = memref.load %arg4[%c11_211] : memref<81xf32, #tpu.memory_space<smem>>
    %979 = vector.broadcast %978 : f32 to vector<16x18xf32>
    %980 = arith.mulf %979, %969 : vector<16x18xf32>
    %981 = arith.addf %943, %980 : vector<16x18xf32>
    %c36_212 = arith.constant 36 : index
    %982 = memref.load %arg4[%c36_212] : memref<81xf32, #tpu.memory_space<smem>>
    %983 = vector.broadcast %982 : f32 to vector<16x18xf32>
    %984 = arith.mulf %983, %969 : vector<16x18xf32>
    %985 = arith.addf %947, %984 : vector<16x18xf32>
    %c37_213 = arith.constant 37 : index
    %986 = memref.load %arg4[%c37_213] : memref<81xf32, #tpu.memory_space<smem>>
    %987 = vector.broadcast %986 : f32 to vector<16x18xf32>
    %988 = arith.mulf %987, %969 : vector<16x18xf32>
    %989 = arith.addf %951, %988 : vector<16x18xf32>
    %c38_214 = arith.constant 38 : index
    %990 = memref.load %arg4[%c38_214] : memref<81xf32, #tpu.memory_space<smem>>
    %991 = vector.broadcast %990 : f32 to vector<16x18xf32>
    %992 = arith.mulf %991, %969 : vector<16x18xf32>
    %993 = arith.addf %955, %992 : vector<16x18xf32>
    %c63_215 = arith.constant 63 : index
    %994 = memref.load %arg4[%c63_215] : memref<81xf32, #tpu.memory_space<smem>>
    %995 = vector.broadcast %994 : f32 to vector<16x18xf32>
    %996 = arith.mulf %995, %969 : vector<16x18xf32>
    %997 = arith.addf %959, %996 : vector<16x18xf32>
    %c64_216 = arith.constant 64 : index
    %998 = memref.load %arg4[%c64_216] : memref<81xf32, #tpu.memory_space<smem>>
    %999 = vector.broadcast %998 : f32 to vector<16x18xf32>
    %1000 = arith.mulf %999, %969 : vector<16x18xf32>
    %1001 = arith.addf %963, %1000 : vector<16x18xf32>
    %c65_217 = arith.constant 65 : index
    %1002 = memref.load %arg4[%c65_217] : memref<81xf32, #tpu.memory_space<smem>>
    %1003 = vector.broadcast %1002 : f32 to vector<16x18xf32>
    %1004 = arith.mulf %1003, %969 : vector<16x18xf32>
    %1005 = arith.addf %967, %1004 : vector<16x18xf32>
    %c1_218 = arith.constant 1 : index
    %c1_219 = arith.constant 1 : index
    %c0_220 = arith.constant 0 : index
    %1006 = vector.load %arg8[%c1_218, %c1_219, %c0_220] : memref<3x18x18xf32, #tpu.memory_space<vmem>>, vector<1x16x18xf32>
    %1007 = vector.shape_cast %1006 : vector<1x16x18xf32> to vector<16x18xf32>
    %c12_221 = arith.constant 12 : index
    %1008 = memref.load %arg4[%c12_221] : memref<81xf32, #tpu.memory_space<smem>>
    %1009 = vector.broadcast %1008 : f32 to vector<16x18xf32>
    %1010 = arith.mulf %1009, %1007 : vector<16x18xf32>
    %1011 = arith.addf %973, %1010 : vector<16x18xf32>
    %c13_222 = arith.constant 13 : index
    %1012 = memref.load %arg4[%c13_222] : memref<81xf32, #tpu.memory_space<smem>>
    %1013 = vector.broadcast %1012 : f32 to vector<16x18xf32>
    %1014 = arith.mulf %1013, %1007 : vector<16x18xf32>
    %1015 = arith.addf %977, %1014 : vector<16x18xf32>
    %c14_223 = arith.constant 14 : index
    %1016 = memref.load %arg4[%c14_223] : memref<81xf32, #tpu.memory_space<smem>>
    %1017 = vector.broadcast %1016 : f32 to vector<16x18xf32>
    %1018 = arith.mulf %1017, %1007 : vector<16x18xf32>
    %1019 = arith.addf %981, %1018 : vector<16x18xf32>
    %c39_224 = arith.constant 39 : index
    %1020 = memref.load %arg4[%c39_224] : memref<81xf32, #tpu.memory_space<smem>>
    %1021 = vector.broadcast %1020 : f32 to vector<16x18xf32>
    %1022 = arith.mulf %1021, %1007 : vector<16x18xf32>
    %1023 = arith.addf %985, %1022 : vector<16x18xf32>
    %c40_225 = arith.constant 40 : index
    %1024 = memref.load %arg4[%c40_225] : memref<81xf32, #tpu.memory_space<smem>>
    %1025 = vector.broadcast %1024 : f32 to vector<16x18xf32>
    %1026 = arith.mulf %1025, %1007 : vector<16x18xf32>
    %1027 = arith.addf %989, %1026 : vector<16x18xf32>
    %c41_226 = arith.constant 41 : index
    %1028 = memref.load %arg4[%c41_226] : memref<81xf32, #tpu.memory_space<smem>>
    %1029 = vector.broadcast %1028 : f32 to vector<16x18xf32>
    %1030 = arith.mulf %1029, %1007 : vector<16x18xf32>
    %1031 = arith.addf %993, %1030 : vector<16x18xf32>
    %c66_227 = arith.constant 66 : index
    %1032 = memref.load %arg4[%c66_227] : memref<81xf32, #tpu.memory_space<smem>>
    %1033 = vector.broadcast %1032 : f32 to vector<16x18xf32>
    %1034 = arith.mulf %1033, %1007 : vector<16x18xf32>
    %1035 = arith.addf %997, %1034 : vector<16x18xf32>
    %c67_228 = arith.constant 67 : index
    %1036 = memref.load %arg4[%c67_228] : memref<81xf32, #tpu.memory_space<smem>>
    %1037 = vector.broadcast %1036 : f32 to vector<16x18xf32>
    %1038 = arith.mulf %1037, %1007 : vector<16x18xf32>
    %1039 = arith.addf %1001, %1038 : vector<16x18xf32>
    %c68_229 = arith.constant 68 : index
    %1040 = memref.load %arg4[%c68_229] : memref<81xf32, #tpu.memory_space<smem>>
    %1041 = vector.broadcast %1040 : f32 to vector<16x18xf32>
    %1042 = arith.mulf %1041, %1007 : vector<16x18xf32>
    %1043 = arith.addf %1005, %1042 : vector<16x18xf32>
    %c1_230 = arith.constant 1 : index
    %c2_231 = arith.constant 2 : index
    %c0_232 = arith.constant 0 : index
    %1044 = vector.load %arg8[%c1_230, %c2_231, %c0_232] : memref<3x18x18xf32, #tpu.memory_space<vmem>>, vector<1x16x18xf32>
    %1045 = vector.shape_cast %1044 : vector<1x16x18xf32> to vector<16x18xf32>
    %c15_233 = arith.constant 15 : index
    %1046 = memref.load %arg4[%c15_233] : memref<81xf32, #tpu.memory_space<smem>>
    %1047 = vector.broadcast %1046 : f32 to vector<16x18xf32>
    %1048 = arith.mulf %1047, %1045 : vector<16x18xf32>
    %1049 = arith.addf %1011, %1048 : vector<16x18xf32>
    %c16_234 = arith.constant 16 : index
    %1050 = memref.load %arg4[%c16_234] : memref<81xf32, #tpu.memory_space<smem>>
    %1051 = vector.broadcast %1050 : f32 to vector<16x18xf32>
    %1052 = arith.mulf %1051, %1045 : vector<16x18xf32>
    %1053 = arith.addf %1015, %1052 : vector<16x18xf32>
    %c17_235 = arith.constant 17 : index
    %1054 = memref.load %arg4[%c17_235] : memref<81xf32, #tpu.memory_space<smem>>
    %1055 = vector.broadcast %1054 : f32 to vector<16x18xf32>
    %1056 = arith.mulf %1055, %1045 : vector<16x18xf32>
    %1057 = arith.addf %1019, %1056 : vector<16x18xf32>
    %c42_236 = arith.constant 42 : index
    %1058 = memref.load %arg4[%c42_236] : memref<81xf32, #tpu.memory_space<smem>>
    %1059 = vector.broadcast %1058 : f32 to vector<16x18xf32>
    %1060 = arith.mulf %1059, %1045 : vector<16x18xf32>
    %1061 = arith.addf %1023, %1060 : vector<16x18xf32>
    %c43_237 = arith.constant 43 : index
    %1062 = memref.load %arg4[%c43_237] : memref<81xf32, #tpu.memory_space<smem>>
    %1063 = vector.broadcast %1062 : f32 to vector<16x18xf32>
    %1064 = arith.mulf %1063, %1045 : vector<16x18xf32>
    %1065 = arith.addf %1027, %1064 : vector<16x18xf32>
    %c44_238 = arith.constant 44 : index
    %1066 = memref.load %arg4[%c44_238] : memref<81xf32, #tpu.memory_space<smem>>
    %1067 = vector.broadcast %1066 : f32 to vector<16x18xf32>
    %1068 = arith.mulf %1067, %1045 : vector<16x18xf32>
    %1069 = arith.addf %1031, %1068 : vector<16x18xf32>
    %c69_239 = arith.constant 69 : index
    %1070 = memref.load %arg4[%c69_239] : memref<81xf32, #tpu.memory_space<smem>>
    %1071 = vector.broadcast %1070 : f32 to vector<16x18xf32>
    %1072 = arith.mulf %1071, %1045 : vector<16x18xf32>
    %1073 = arith.addf %1035, %1072 : vector<16x18xf32>
    %c70_240 = arith.constant 70 : index
    %1074 = memref.load %arg4[%c70_240] : memref<81xf32, #tpu.memory_space<smem>>
    %1075 = vector.broadcast %1074 : f32 to vector<16x18xf32>
    %1076 = arith.mulf %1075, %1045 : vector<16x18xf32>
    %1077 = arith.addf %1039, %1076 : vector<16x18xf32>
    %c71_241 = arith.constant 71 : index
    %1078 = memref.load %arg4[%c71_241] : memref<81xf32, #tpu.memory_space<smem>>
    %1079 = vector.broadcast %1078 : f32 to vector<16x18xf32>
    %1080 = arith.mulf %1079, %1045 : vector<16x18xf32>
    %1081 = arith.addf %1043, %1080 : vector<16x18xf32>
    %c2_242 = arith.constant 2 : index
    %c0_243 = arith.constant 0 : index
    %c0_244 = arith.constant 0 : index
    %1082 = vector.load %arg8[%c2_242, %c0_243, %c0_244] : memref<3x18x18xf32, #tpu.memory_space<vmem>>, vector<1x16x18xf32>
    %1083 = vector.shape_cast %1082 : vector<1x16x18xf32> to vector<16x18xf32>
    %c18_245 = arith.constant 18 : index
    %1084 = memref.load %arg4[%c18_245] : memref<81xf32, #tpu.memory_space<smem>>
    %1085 = vector.broadcast %1084 : f32 to vector<16x18xf32>
    %1086 = arith.mulf %1085, %1083 : vector<16x18xf32>
    %1087 = arith.addf %1049, %1086 : vector<16x18xf32>
    %c19_246 = arith.constant 19 : index
    %1088 = memref.load %arg4[%c19_246] : memref<81xf32, #tpu.memory_space<smem>>
    %1089 = vector.broadcast %1088 : f32 to vector<16x18xf32>
    %1090 = arith.mulf %1089, %1083 : vector<16x18xf32>
    %1091 = arith.addf %1053, %1090 : vector<16x18xf32>
    %c20_247 = arith.constant 20 : index
    %1092 = memref.load %arg4[%c20_247] : memref<81xf32, #tpu.memory_space<smem>>
    %1093 = vector.broadcast %1092 : f32 to vector<16x18xf32>
    %1094 = arith.mulf %1093, %1083 : vector<16x18xf32>
    %1095 = arith.addf %1057, %1094 : vector<16x18xf32>
    %c45_248 = arith.constant 45 : index
    %1096 = memref.load %arg4[%c45_248] : memref<81xf32, #tpu.memory_space<smem>>
    %1097 = vector.broadcast %1096 : f32 to vector<16x18xf32>
    %1098 = arith.mulf %1097, %1083 : vector<16x18xf32>
    %1099 = arith.addf %1061, %1098 : vector<16x18xf32>
    %c46_249 = arith.constant 46 : index
    %1100 = memref.load %arg4[%c46_249] : memref<81xf32, #tpu.memory_space<smem>>
    %1101 = vector.broadcast %1100 : f32 to vector<16x18xf32>
    %1102 = arith.mulf %1101, %1083 : vector<16x18xf32>
    %1103 = arith.addf %1065, %1102 : vector<16x18xf32>
    %c47_250 = arith.constant 47 : index
    %1104 = memref.load %arg4[%c47_250] : memref<81xf32, #tpu.memory_space<smem>>
    %1105 = vector.broadcast %1104 : f32 to vector<16x18xf32>
    %1106 = arith.mulf %1105, %1083 : vector<16x18xf32>
    %1107 = arith.addf %1069, %1106 : vector<16x18xf32>
    %c72_251 = arith.constant 72 : index
    %1108 = memref.load %arg4[%c72_251] : memref<81xf32, #tpu.memory_space<smem>>
    %1109 = vector.broadcast %1108 : f32 to vector<16x18xf32>
    %1110 = arith.mulf %1109, %1083 : vector<16x18xf32>
    %1111 = arith.addf %1073, %1110 : vector<16x18xf32>
    %c73_252 = arith.constant 73 : index
    %1112 = memref.load %arg4[%c73_252] : memref<81xf32, #tpu.memory_space<smem>>
    %1113 = vector.broadcast %1112 : f32 to vector<16x18xf32>
    %1114 = arith.mulf %1113, %1083 : vector<16x18xf32>
    %1115 = arith.addf %1077, %1114 : vector<16x18xf32>
    %c74_253 = arith.constant 74 : index
    %1116 = memref.load %arg4[%c74_253] : memref<81xf32, #tpu.memory_space<smem>>
    %1117 = vector.broadcast %1116 : f32 to vector<16x18xf32>
    %1118 = arith.mulf %1117, %1083 : vector<16x18xf32>
    %1119 = arith.addf %1081, %1118 : vector<16x18xf32>
    %c2_254 = arith.constant 2 : index
    %c1_255 = arith.constant 1 : index
    %c0_256 = arith.constant 0 : index
    %1120 = vector.load %arg8[%c2_254, %c1_255, %c0_256] : memref<3x18x18xf32, #tpu.memory_space<vmem>>, vector<1x16x18xf32>
    %1121 = vector.shape_cast %1120 : vector<1x16x18xf32> to vector<16x18xf32>
    %c21_257 = arith.constant 21 : index
    %1122 = memref.load %arg4[%c21_257] : memref<81xf32, #tpu.memory_space<smem>>
    %1123 = vector.broadcast %1122 : f32 to vector<16x18xf32>
    %1124 = arith.mulf %1123, %1121 : vector<16x18xf32>
    %1125 = arith.addf %1087, %1124 : vector<16x18xf32>
    %c22_258 = arith.constant 22 : index
    %1126 = memref.load %arg4[%c22_258] : memref<81xf32, #tpu.memory_space<smem>>
    %1127 = vector.broadcast %1126 : f32 to vector<16x18xf32>
    %1128 = arith.mulf %1127, %1121 : vector<16x18xf32>
    %1129 = arith.addf %1091, %1128 : vector<16x18xf32>
    %c23_259 = arith.constant 23 : index
    %1130 = memref.load %arg4[%c23_259] : memref<81xf32, #tpu.memory_space<smem>>
    %1131 = vector.broadcast %1130 : f32 to vector<16x18xf32>
    %1132 = arith.mulf %1131, %1121 : vector<16x18xf32>
    %1133 = arith.addf %1095, %1132 : vector<16x18xf32>
    %c48_260 = arith.constant 48 : index
    %1134 = memref.load %arg4[%c48_260] : memref<81xf32, #tpu.memory_space<smem>>
    %1135 = vector.broadcast %1134 : f32 to vector<16x18xf32>
    %1136 = arith.mulf %1135, %1121 : vector<16x18xf32>
    %1137 = arith.addf %1099, %1136 : vector<16x18xf32>
    %c49_261 = arith.constant 49 : index
    %1138 = memref.load %arg4[%c49_261] : memref<81xf32, #tpu.memory_space<smem>>
    %1139 = vector.broadcast %1138 : f32 to vector<16x18xf32>
    %1140 = arith.mulf %1139, %1121 : vector<16x18xf32>
    %1141 = arith.addf %1103, %1140 : vector<16x18xf32>
    %c50_262 = arith.constant 50 : index
    %1142 = memref.load %arg4[%c50_262] : memref<81xf32, #tpu.memory_space<smem>>
    %1143 = vector.broadcast %1142 : f32 to vector<16x18xf32>
    %1144 = arith.mulf %1143, %1121 : vector<16x18xf32>
    %1145 = arith.addf %1107, %1144 : vector<16x18xf32>
    %c75_263 = arith.constant 75 : index
    %1146 = memref.load %arg4[%c75_263] : memref<81xf32, #tpu.memory_space<smem>>
    %1147 = vector.broadcast %1146 : f32 to vector<16x18xf32>
    %1148 = arith.mulf %1147, %1121 : vector<16x18xf32>
    %1149 = arith.addf %1111, %1148 : vector<16x18xf32>
    %c76_264 = arith.constant 76 : index
    %1150 = memref.load %arg4[%c76_264] : memref<81xf32, #tpu.memory_space<smem>>
    %1151 = vector.broadcast %1150 : f32 to vector<16x18xf32>
    %1152 = arith.mulf %1151, %1121 : vector<16x18xf32>
    %1153 = arith.addf %1115, %1152 : vector<16x18xf32>
    %c77_265 = arith.constant 77 : index
    %1154 = memref.load %arg4[%c77_265] : memref<81xf32, #tpu.memory_space<smem>>
    %1155 = vector.broadcast %1154 : f32 to vector<16x18xf32>
    %1156 = arith.mulf %1155, %1121 : vector<16x18xf32>
    %1157 = arith.addf %1119, %1156 : vector<16x18xf32>
    %c2_266 = arith.constant 2 : index
    %c2_267 = arith.constant 2 : index
    %c0_268 = arith.constant 0 : index
    %1158 = vector.load %arg8[%c2_266, %c2_267, %c0_268] : memref<3x18x18xf32, #tpu.memory_space<vmem>>, vector<1x16x18xf32>
    %1159 = vector.shape_cast %1158 : vector<1x16x18xf32> to vector<16x18xf32>
    %c24_269 = arith.constant 24 : index
    %1160 = memref.load %arg4[%c24_269] : memref<81xf32, #tpu.memory_space<smem>>
    %1161 = vector.broadcast %1160 : f32 to vector<16x18xf32>
    %1162 = arith.mulf %1161, %1159 : vector<16x18xf32>
    %1163 = arith.addf %1125, %1162 : vector<16x18xf32>
    %c25_270 = arith.constant 25 : index
    %1164 = memref.load %arg4[%c25_270] : memref<81xf32, #tpu.memory_space<smem>>
    %1165 = vector.broadcast %1164 : f32 to vector<16x18xf32>
    %1166 = arith.mulf %1165, %1159 : vector<16x18xf32>
    %1167 = arith.addf %1129, %1166 : vector<16x18xf32>
    %c26_271 = arith.constant 26 : index
    %1168 = memref.load %arg4[%c26_271] : memref<81xf32, #tpu.memory_space<smem>>
    %1169 = vector.broadcast %1168 : f32 to vector<16x18xf32>
    %1170 = arith.mulf %1169, %1159 : vector<16x18xf32>
    %1171 = arith.addf %1133, %1170 : vector<16x18xf32>
    %c51_272 = arith.constant 51 : index
    %1172 = memref.load %arg4[%c51_272] : memref<81xf32, #tpu.memory_space<smem>>
    %1173 = vector.broadcast %1172 : f32 to vector<16x18xf32>
    %1174 = arith.mulf %1173, %1159 : vector<16x18xf32>
    %1175 = arith.addf %1137, %1174 : vector<16x18xf32>
    %c52_273 = arith.constant 52 : index
    %1176 = memref.load %arg4[%c52_273] : memref<81xf32, #tpu.memory_space<smem>>
    %1177 = vector.broadcast %1176 : f32 to vector<16x18xf32>
    %1178 = arith.mulf %1177, %1159 : vector<16x18xf32>
    %1179 = arith.addf %1141, %1178 : vector<16x18xf32>
    %c53_274 = arith.constant 53 : index
    %1180 = memref.load %arg4[%c53_274] : memref<81xf32, #tpu.memory_space<smem>>
    %1181 = vector.broadcast %1180 : f32 to vector<16x18xf32>
    %1182 = arith.mulf %1181, %1159 : vector<16x18xf32>
    %1183 = arith.addf %1145, %1182 : vector<16x18xf32>
    %c78_275 = arith.constant 78 : index
    %1184 = memref.load %arg4[%c78_275] : memref<81xf32, #tpu.memory_space<smem>>
    %1185 = vector.broadcast %1184 : f32 to vector<16x18xf32>
    %1186 = arith.mulf %1185, %1159 : vector<16x18xf32>
    %1187 = arith.addf %1149, %1186 : vector<16x18xf32>
    %c79_276 = arith.constant 79 : index
    %1188 = memref.load %arg4[%c79_276] : memref<81xf32, #tpu.memory_space<smem>>
    %1189 = vector.broadcast %1188 : f32 to vector<16x18xf32>
    %1190 = arith.mulf %1189, %1159 : vector<16x18xf32>
    %1191 = arith.addf %1153, %1190 : vector<16x18xf32>
    %c80_277 = arith.constant 80 : index
    %1192 = memref.load %arg4[%c80_277] : memref<81xf32, #tpu.memory_space<smem>>
    %1193 = vector.broadcast %1192 : f32 to vector<16x18xf32>
    %1194 = arith.mulf %1193, %1159 : vector<16x18xf32>
    %1195 = arith.addf %1157, %1194 : vector<16x18xf32>
    %1196 = vector.extract_strided_slice %1163 {offsets = [0, 0], sizes = [16, 16], strides = [1, 1]} : vector<16x18xf32> to vector<16x16xf32>
    %cst_278 = arith.constant 0.000000e+00 : f32
    %1197 = vector.broadcast %cst_278 : f32 to vector<16x16xf32>
    %1198 = arith.select %69, %1196, %1197 : vector<16x16xi1>, vector<16x16xf32>
    %1199 = vector.extract_strided_slice %1167 {offsets = [0, 1], sizes = [16, 16], strides = [1, 1]} : vector<16x18xf32> to vector<16x16xf32>
    %1200 = vector.extract_strided_slice %1171 {offsets = [0, 2], sizes = [16, 16], strides = [1, 1]} : vector<16x18xf32> to vector<16x16xf32>
    %cst_279 = arith.constant 0.000000e+00 : f32
    %1201 = vector.broadcast %cst_279 : f32 to vector<16x16xf32>
    %1202 = arith.select %71, %1200, %1201 : vector<16x16xi1>, vector<16x16xf32>
    %1203 = arith.addf %1198, %1199 : vector<16x16xf32>
    %1204 = arith.addf %1203, %1202 : vector<16x16xf32>
    %c0_280 = arith.constant 0 : index
    %1205 = memref.load %arg5[%c0_280] : memref<3xf32, #tpu.memory_space<smem>>
    %1206 = vector.broadcast %1205 : f32 to vector<16x16xf32>
    %1207 = arith.addf %1204, %1206 : vector<16x16xf32>
    %1208 = vector.extract_strided_slice %1175 {offsets = [0, 0], sizes = [16, 16], strides = [1, 1]} : vector<16x18xf32> to vector<16x16xf32>
    %cst_281 = arith.constant 0.000000e+00 : f32
    %1209 = vector.broadcast %cst_281 : f32 to vector<16x16xf32>
    %1210 = arith.select %69, %1208, %1209 : vector<16x16xi1>, vector<16x16xf32>
    %1211 = vector.extract_strided_slice %1179 {offsets = [0, 1], sizes = [16, 16], strides = [1, 1]} : vector<16x18xf32> to vector<16x16xf32>
    %1212 = vector.extract_strided_slice %1183 {offsets = [0, 2], sizes = [16, 16], strides = [1, 1]} : vector<16x18xf32> to vector<16x16xf32>
    %cst_282 = arith.constant 0.000000e+00 : f32
    %1213 = vector.broadcast %cst_282 : f32 to vector<16x16xf32>
    %1214 = arith.select %71, %1212, %1213 : vector<16x16xi1>, vector<16x16xf32>
    %1215 = arith.addf %1210, %1211 : vector<16x16xf32>
    %1216 = arith.addf %1215, %1214 : vector<16x16xf32>
    %c1_283 = arith.constant 1 : index
    %1217 = memref.load %arg5[%c1_283] : memref<3xf32, #tpu.memory_space<smem>>
    %1218 = vector.broadcast %1217 : f32 to vector<16x16xf32>
    %1219 = arith.addf %1216, %1218 : vector<16x16xf32>
    %1220 = vector.extract_strided_slice %1187 {offsets = [0, 0], sizes = [16, 16], strides = [1, 1]} : vector<16x18xf32> to vector<16x16xf32>
    %cst_284 = arith.constant 0.000000e+00 : f32
    %1221 = vector.broadcast %cst_284 : f32 to vector<16x16xf32>
    %1222 = arith.select %69, %1220, %1221 : vector<16x16xi1>, vector<16x16xf32>
    %1223 = vector.extract_strided_slice %1191 {offsets = [0, 1], sizes = [16, 16], strides = [1, 1]} : vector<16x18xf32> to vector<16x16xf32>
    %1224 = vector.extract_strided_slice %1195 {offsets = [0, 2], sizes = [16, 16], strides = [1, 1]} : vector<16x18xf32> to vector<16x16xf32>
    %cst_285 = arith.constant 0.000000e+00 : f32
    %1225 = vector.broadcast %cst_285 : f32 to vector<16x16xf32>
    %1226 = arith.select %71, %1224, %1225 : vector<16x16xi1>, vector<16x16xf32>
    %1227 = arith.addf %1222, %1223 : vector<16x16xf32>
    %1228 = arith.addf %1227, %1226 : vector<16x16xf32>
    %c2_286 = arith.constant 2 : index
    %1229 = memref.load %arg5[%c2_286] : memref<3xf32, #tpu.memory_space<smem>>
    %1230 = vector.broadcast %1229 : f32 to vector<16x16xf32>
    %1231 = arith.addf %1228, %1230 : vector<16x16xf32>
    %c0_287 = arith.constant 0 : index
    %c0_288 = arith.constant 0 : index
    %1232 = arith.index_cast %73 : i32 to index
    %c0_289 = arith.constant 0 : index
    %1233 = vector.load %arg6[%c0_287, %c0_288, %1232, %c0_289] : memref<1x3x16x16xf32, #tpu.memory_space<vmem>>, vector<1x1x16x16xf32>
    %1234 = vector.shape_cast %1233 : vector<1x1x16x16xf32> to vector<16x16xf32>
    %1235 = arith.negf %1207 : vector<16x16xf32>
    %1236 = math.exp %1235 : vector<16x16xf32>
    %cst_290 = arith.constant 1.000000e+00 : f32
    %1237 = vector.broadcast %cst_290 : f32 to vector<16x16xf32>
    %1238 = arith.addf %1237, %1236 : vector<16x16xf32>
    %1239 = arith.divf %1237, %1238 : vector<16x16xf32>
    %1240 = arith.mulf %1234, %1239 : vector<16x16xf32>
    %c0_291 = arith.constant 0 : index
    %c0_292 = arith.constant 0 : index
    %1241 = arith.index_cast %73 : i32 to index
    %c0_293 = arith.constant 0 : index
    %1242 = vector.load %arg6[%c0_291, %c0_292, %1241, %c0_293] : memref<1x3x16x16xf32, #tpu.memory_space<vmem>>, vector<1x1x16x16xf32>
    %1243 = vector.shape_cast %1242 : vector<1x1x16x16xf32> to vector<16x16xf32>
    %1244 = vector.shape_cast %1240 : vector<16x16xf32> to vector<1x1x16x16xf32>
    tpu.vector_store %arg6[%c0_291, %c0_292, %1241, %c0_293], %1244 {strides = array<i32>} : memref<1x3x16x16xf32, #tpu.memory_space<vmem>>, vector<1x1x16x16xf32>,
    %c0_294 = arith.constant 0 : index
    %c1_295 = arith.constant 1 : index
    %1245 = arith.index_cast %73 : i32 to index
    %c0_296 = arith.constant 0 : index
    %1246 = vector.load %arg6[%c0_294, %c1_295, %1245, %c0_296] : memref<1x3x16x16xf32, #tpu.memory_space<vmem>>, vector<1x1x16x16xf32>
    %1247 = vector.shape_cast %1246 : vector<1x1x16x16xf32> to vector<16x16xf32>
    %1248 = arith.negf %1219 : vector<16x16xf32>
    %1249 = math.exp %1248 : vector<16x16xf32>
    %cst_297 = arith.constant 1.000000e+00 : f32
    %1250 = vector.broadcast %cst_297 : f32 to vector<16x16xf32>
    %1251 = arith.addf %1250, %1249 : vector<16x16xf32>
    %1252 = arith.divf %1250, %1251 : vector<16x16xf32>
    %1253 = arith.mulf %1247, %1252 : vector<16x16xf32>
    %c0_298 = arith.constant 0 : index
    %c1_299 = arith.constant 1 : index
    %1254 = arith.index_cast %73 : i32 to index
    %c0_300 = arith.constant 0 : index
    %1255 = vector.load %arg6[%c0_298, %c1_299, %1254, %c0_300] : memref<1x3x16x16xf32, #tpu.memory_space<vmem>>, vector<1x1x16x16xf32>
    %1256 = vector.shape_cast %1255 : vector<1x1x16x16xf32> to vector<16x16xf32>
    %1257 = vector.shape_cast %1253 : vector<16x16xf32> to vector<1x1x16x16xf32>
    tpu.vector_store %arg6[%c0_298, %c1_299, %1254, %c0_300], %1257 {strides = array<i32>} : memref<1x3x16x16xf32, #tpu.memory_space<vmem>>, vector<1x1x16x16xf32>,
    %c0_301 = arith.constant 0 : index
    %c2_302 = arith.constant 2 : index
    %1258 = arith.index_cast %73 : i32 to index
    %c0_303 = arith.constant 0 : index
    %1259 = vector.load %arg6[%c0_301, %c2_302, %1258, %c0_303] : memref<1x3x16x16xf32, #tpu.memory_space<vmem>>, vector<1x1x16x16xf32>
    %1260 = vector.shape_cast %1259 : vector<1x1x16x16xf32> to vector<16x16xf32>
    %1261 = arith.negf %1231 : vector<16x16xf32>
    %1262 = math.exp %1261 : vector<16x16xf32>
    %cst_304 = arith.constant 1.000000e+00 : f32
    %1263 = vector.broadcast %cst_304 : f32 to vector<16x16xf32>
    %1264 = arith.addf %1263, %1262 : vector<16x16xf32>
    %1265 = arith.divf %1263, %1264 : vector<16x16xf32>
    %1266 = arith.mulf %1260, %1265 : vector<16x16xf32>
    %c0_305 = arith.constant 0 : index
    %c2_306 = arith.constant 2 : index
    %1267 = arith.index_cast %73 : i32 to index
    %c0_307 = arith.constant 0 : index
    %1268 = vector.load %arg6[%c0_305, %c2_306, %1267, %c0_307] : memref<1x3x16x16xf32, #tpu.memory_space<vmem>>, vector<1x1x16x16xf32>
    %1269 = vector.shape_cast %1268 : vector<1x1x16x16xf32> to vector<16x16xf32>
    %1270 = vector.shape_cast %1266 : vector<16x16xf32> to vector<1x1x16x16xf32>
    tpu.vector_store %arg6[%c0_305, %c2_306, %1267, %c0_307], %1270 {strides = array<i32>} : memref<1x3x16x16xf32, #tpu.memory_space<vmem>>, vector<1x1x16x16xf32>,
    %c1_i32_308 = arith.constant 1 : i32
    return
  }
  func.func @transform_0(%arg0: i32) -> (i32, i32, i32, i32) {
    %c0_i32 = arith.constant 0 : i32
    %c0_i32_0 = arith.constant 0 : i32
    %c0_i32_1 = arith.constant 0 : i32
    %c0_i32_2 = arith.constant 0 : i32
    return %arg0, %c0_i32, %c0_i32_0, %c0_i32_1 : i32, i32, i32, i32
  }
  func.func @transform_1(%arg0: i32) -> i32 {
    %c0_i32 = arith.constant 0 : i32
    %c0_i32_0 = arith.constant 0 : i32
    return %c0_i32 : i32
  }
  func.func @transform_2(%arg0: i32) -> i32 {
    %c0_i32 = arith.constant 0 : i32
    %c0_i32_0 = arith.constant 0 : i32
    return %c0_i32 : i32
  }
  func.func @transform_3(%arg0: i32) -> i32 {
    %c0_i32 = arith.constant 0 : i32
    %c0_i32_0 = arith.constant 0 : i32
    return %c0_i32 : i32
  }
  func.func @transform_4(%arg0: i32) -> i32 {
    %c0_i32 = arith.constant 0 : i32
    %c0_i32_0 = arith.constant 0 : i32
    return %c0_i32 : i32
  }
  func.func @transform_5(%arg0: i32) -> (i32, i32, i32, i32) {
    %c0_i32 = arith.constant 0 : i32
    %c0_i32_0 = arith.constant 0 : i32
    %c0_i32_1 = arith.constant 0 : i32
    %c0_i32_2 = arith.constant 0 : i32
    return %arg0, %c0_i32, %c0_i32_0, %c0_i32_1 : i32, i32, i32, i32
  }
}

</mosaic_0001>

<bundles_post_ra>
// kernel: tpu_custom_call.1
= control target key start
LH: loop header
LB: loop body
LE: loop exit
PB: predicated region body
PF: predicated region fallthrough
CT: control target
= control target key end

     0   :  { %s6198_s0 = inlined_call_operand.hbm [shape: f32[4,6,16,16], index: 0, kind: input, shape index: {}]   ;;  %s6199_s1 = inlined_call_operand.vmem [shape: f32[162], index: 1, kind: input, shape index: {}]   ;;  %s6200_s2 = inlined_call_operand.vmem [shape: f32[3], index: 2, kind: input, shape index: {}]   ;;  %s6201_s3 = inlined_call_operand.vmem [shape: f32[81], index: 3, kind: input, shape index: {}]   ;;  %s6202_s4 = inlined_call_operand.vmem [shape: f32[3], index: 4, kind: input, shape index: {}]   ;;  %s6203_s5 = inlined_call_operand.hbm [shape: f32[4,3,16,16], index: 5, kind: output, shape index: {}]  }
   0x1   :  { %6498 = sst [smem:[#allocation196_spill]] %s6198_s0 }
   0x2   :  { %6499 = sst [smem:[#allocation197_spill]] %s6199_s1 }
   0x3   :  { %6500 = sst [smem:[#allocation198_spill]] %s6200_s2 }
   0x4   :  { %6501 = sst [smem:[#allocation199_spill]] %s6201_s3 }
   0x5   :  { %6502 = sst [smem:[#allocation200_spill]] %s6202_s4 }
   0x6   :  { %6503 = sst [smem:[#allocation201_spill]] %s6203_s5 }
   0x7   :  { %10 = vsyncpa [#allocation5], 0 }
   0x8   :  { %12 = vsyncpa [#allocation5 + $0x1], 0 }
   0x9   :  { %13 = vsyncpa [#allocation7], 0 }
   0xa   :  { %14 = vsyncpa [#allocation10], 0 }
   0xb   :  { %15 = vsyncpa [#allocation13], 0 }
   0xc   :  { %16 = vsyncpa [#allocation6], 0 }
   0xd   :  { %18 = vsyncpa [#allocation6 + $0x1], 0  ;;  %s3034_s18 = smov 0   ;;  %s3036_s19 = smov 0  }
   0xe   :  { %s3038_s20 = smov 0   ;;  %s3040_s21 = smov 0  }
   0xf LB: > { %6504 = sst [smem:[#allocation20_spill]] %s2976_s18  ;;  %s3055_s22 = sadd.s32 4294967295, %s2988_s21   ;;  %s2988_s21 = sphi %s3040_s21, %s7280_s21   ;;  %s2984_s20 = sphi %s3038_s20, %s7283_s20   ;;  %s2980_s19 = sphi %s3036_s19, %s7282_s19   ;;  %s2976_s18 = sphi %s3034_s18, %s7281_s18  }
  0x10   : > { %6505 = sst [smem:[#allocation21_spill]] %s2980_s19  ;;  %s2325_s23 = sadd.s32 4294967294, %s2988_s21  }
  0x11   : > { %6506 = sst [smem:[#allocation22_spill]] %s2984_s20  ;;  %p44_p0 = scmp.ne.s32.totalorder %s2980_s19, %s2976_s18 }
  0x12   : > { %6507 = sst [smem:[#allocation23_spill]] %s2988_s21  ;;  %p6204_p1 = scmp.eq.s32.totalorder %s3055_s22, 0 }
  0x13   : > { %6508 = sst [smem:[#allocation24_spill]] %s3055_s22  ;;  %p158_p3 = scmp.eq.s32.totalorder %s2325_s23, 3 }
  0x14   : > { %p3064_p4 = por %p6204_p1, %p44_p0  ;;  %p2326_p5 = scmp.ge.s32.totalorder %s2988_s21, 1 }
  0x15   : > { %p3069_p6 = por %p158_p3, %p44_p0  ;;  %p165_p7 = scmp.lt.s32.totalorder %s2988_s21, 5 }
  0x16   : > { %s6509_s24 = scalar_select %p3064_p4, 1, 0 }
  0x17   : > { %s6510_s25 = scalar_select %p3069_p6, 1, 0 }
  0x18   : > { %s6512_s2 = sld [smem:[#allocation198_spill]]  ;;  %p3077_p8 = pnand %p2326_p5, %p165_p7 }
  0x19   : > { %6511 = sst [smem:[#allocation25_spill]] %s6510_s25  ;;  %s6514_s1 = sld [smem:[#allocation197_spill]] }
  0x1a   : > { %s6513_s29 = scalar_select %p3077_p8, 1, 0 }
  0x1b   : > { %p2639_p9 = pneg %p3077_p8  ;;  %s6516_s3 = sld [smem:[#allocation199_spill]] }
  0x1c   : > { %s6517_s4 = sld [smem:[#allocation200_spill]] }
  0x1d   : > { %p3088_p10 = pnand %p2639_p9, %p6204_p1 }
  0x1e   : > { %s189_s28 = sshll.u32 %s6512_s2, 4  ;;  %s190_s28 = int_to_ptr.vmem [resolvable:$true] %s189_s28 }
  0x1f   : > { %s178_s7 = sshll.u32 %s6514_s1, 4  ;;  %s2820_s15 = scalar_lea.vmem %s190_s28, 16  ;;  %s179_s7 = int_to_ptr.vmem [resolvable:$true] %s178_s7 }
  0x20   : > { %p2821_p11 = scmp.ne.s32.totalorder %s190_s28, %s2820_s15  ;;  %p2822_p12 = pneg %p3088_p10 }
  0x21   : > { %s200_s11 = sshll.u32 %s6516_s3, 4  ;;  %p2828_p3 = scmp.lt.s32.totalorder %s190_s28, %s190_s28  ;;  %s3095_s11 = int_to_ptr.vmem [resolvable:$true] %s200_s11 }
  0x22   : > { %s211_s14 = sshll.u32 %s6517_s4, 4  ;;  %p2823_p13 = pnand %p2822_p12, %p2821_p11  ;;  %s212_s14 = int_to_ptr.vmem [resolvable:$true] %s211_s14 }
  0x23   : > { %p2829_p5 = scmp.lt.s32.totalorder %s2820_s15, %s2820_s15 }
  0x24   : > { %p2824_p0 = pneg %p2823_p13 }
  0x25   : > { %p2830_p7 = por %p2829_p5, %p2828_p3 }
  0x27   : > { %p2831_p9 = pnand %p2830_p7, %p2824_p0 }
  0x29   : > { %2834 = shalt.err (!%p2831_p9)
}
  0x2a   : > { %s2990_s16 = smov [#allocation9]   ;;  %s2835_s17 = scalar_lea.vmem %s179_s7, 32 }
  0x2b   : > { %2645 = dma.vmem_to_smem (!%p3088_p10), %s190_s28, 16, %s2990_s16, [#allocation10]  }
  0x2c   : > { %p2836_p1 = scmp.ne.s32.totalorder %s179_s7, %s2835_s17  ;;  %p2843_p4 = scmp.lt.s32.totalorder %s179_s7, %s179_s7 }
  0x2d   : > { %p2844_p8 = scmp.lt.s32.totalorder %s2835_s17, %s2835_s17 }
  0x2e   : > { %p2838_p2 = pnand %p2836_p1, %p2822_p12 }
  0x2f   : > { %p2845_p11 = por %p2844_p8, %p2843_p4 }
  0x30   : > { %p2839_p6 = pneg %p2838_p2 }
  0x32   : > { %p2846_p13 = pnand %p2845_p11, %p2839_p6 }
  0x34   : > { %2849 = shalt.err (!%p2846_p13)
}
  0x35   : > { %s2991_s23 = smov [#allocation8]   ;;  %s2850_s26 = scalar_lea.vmem %s3095_s11, 16 }
  0x36   : > { %2642 = dma.vmem_to_smem (!%p3088_p10), %s179_s7, 32, %s2991_s23, [#allocation7]  }
  0x37   : > { %p2851_p0 = scmp.ne.s32.totalorder %s3095_s11, %s2850_s26  ;;  %p2858_p2 = scmp.lt.s32.totalorder %s3095_s11, %s3095_s11 }
  0x38   : > { %p2859_p5 = scmp.lt.s32.totalorder %s2850_s26, %s2850_s26 }
  0x39   : > { %p2853_p3 = pnand %p2851_p0, %p2822_p12 }
  0x3a   : > { %p2860_p4 = por %p2859_p5, %p2858_p2 }
  0x3b   : > { %p2854_p1 = pneg %p2853_p3 }
  0x3d   : > { %p2861_p6 = pnand %p2860_p4, %p2854_p1 }
  0x3f   : > { %2864 = shalt.err (!%p2861_p6)
}
  0x40   : > { %s2992_s27 = smov [#allocation11]   ;;  %s2865_s6 = scalar_lea.vmem %s212_s14, 16 }
  0x41   : > { %2648 = dma.vmem_to_smem (!%p3088_p10), %s3095_s11, 16, %s2992_s27, [#allocation10]  }
  0x42   : > { %p2866_p8 = scmp.ne.s32.totalorder %s212_s14, %s2865_s6  ;;  %p2873_p11 = scmp.lt.s32.totalorder %s212_s14, %s212_s14 }
  0x43   : > { %p2874_p13 = scmp.lt.s32.totalorder %s2865_s6, %s2865_s6 }
  0x44   : > { %p2868_p7 = pnand %p2866_p8, %p2822_p12 }
  0x45   : > { %p2875_p0 = por %p2874_p13, %p2873_p11 }
  0x46   : > { %p2869_p9 = pneg %p2868_p7 }
  0x48   : > { %p2876_p3 = pnand %p2875_p0, %p2869_p9 }
  0x4a   : > { %2879 = shalt.err (!%p2876_p3)
}
  0x4b   : > { %s2993_s7 = smov [#allocation12]   ;;  %s3132_s9 = sadd.s32 1, %s2988_s21  }
  0x4c   : > { %2651 = dma.vmem_to_smem (!%p3088_p10), %s212_s14, 16, %s2993_s7, [#allocation13]  }
  0x4d   : > { %6518 = sst [smem:[#allocation26_spill]] %s3132_s9  ;;  %s28_s10 = ssub.s32 %s2988_s21, %s3132_s9 }
  0x4e   : > { %p29_p12 = scmp.eq.s32.totalorder %s28_s10, 0  ;;  %s31_s11 = sadd.s32 1, %s2984_s20 }
  0x4f   : > { %p38_p1 = scmp.ne.s32.totalorder %s2984_s20, %s2980_s19  ;;  %p39_p2 = scmp.eq.s32.totalorder %s2988_s21, 0 }
  0x50   : > { %s3141_s8 = scalar_select %p29_p12, %s2984_s20, %s31_s11  }
  0x51   : > { %p40_p5 = por %p39_p2, %p38_p1  ;;  %p6520_p4 = scmp.eq.s32.totalorder %s3055_s22, 3 }
  0x52   : > { %6519 = sst [smem:[#allocation27_spill]] %s3141_s8  ;;  %p2664_p8 = scmp.lt.s32.totalorder %s2988_s21, 4 }
  0x53   : > { %p3145_p6 = por %p6520_p4, %p38_p1  ;;  %s222_s13 = sand.u32 1, %s2984_s20  }
  0x54   : > { %s2614_s15 = smul.u32 96, %s222_s13  ;;  %p3152_p10 = pnand %p2664_p8, %p40_p5 }
  0x55   : > { %s6521_s12 = scalar_select %p3145_p6, 1, 0 }
  0x56   : > { %s2615_s14 = smul.u32 1536, %s2988_s21  ;;  %s6524_s0 = sld [smem:[#allocation196_spill]] }
  0x57   : > { %6522 = sst [smem:[#allocation28_spill]] %s6521_s12  ;;  %s226_s27 = scalar_lea.vmem [#allocation4], %s2614_s15 }
  0x58   : > { %s233_s28 = sshll.u32 %s226_s27, 4  ;;  %s3163_s30 = scalar_lea.sflag [#allocation5], %s222_s13  ;;  %s3161_s28 = int_to_ptr.vmem [resolvable:$true] %s233_s28 }
  0x59   : > { %p2882_p9 = pneg %p3152_p10 }
  0x5c   : > { %s3159_s26 = scalar_lea.hbm %s6524_s0, %s2615_s14  ;;  %s2885_s11 = scalar_lea.hbm %s6524_s0, 6144 }
  0x5d   : > { %s2880_s6 = scalar_lea.hbm %s3159_s26, 1536  ;;  %p2886_p0 = scmp.lt.u32.totalorder %s3159_s26, %s6524_s0 }
  0x5e   : > { %p2881_p7 = scmp.ne.s32.totalorder %s3159_s26, %s2880_s6  ;;  %p2887_p3 = scmp.lt.u32.totalorder %s2885_s11, %s2880_s6 }
  0x5f   : > { %p2889_p1 = scmp.lt.u32.totalorder %s2880_s6, %s3159_s26 }
  0x60   : > { %p2883_p11 = pnand %p2882_p9, %p2881_p7  ;;  %p2888_p12 = por %p2887_p3, %p2886_p0 }
  0x62   : > { %p2884_p13 = pneg %p2883_p11  ;;  %p2890_p2 = por %p2889_p1, %p2888_p12 }
  0x64   : > { %p2891_p5 = pnand %p2890_p2, %p2884_p13 }
  0x66   : > { %2894 = shalt.err (!%p2891_p5)
}
  0x67   : > { %s2895_s13 = scalar_lea.vmem %s3161_s28, 1536  ;;  %s2994_s15 = smov [#allocation4]  }
  0x68   : > { %p2896_p4 = scmp.ne.s32.totalorder %s3161_s28, %s2895_s13  ;;  %s2900_s23 = sshll.u32 %s2994_s15, 4  ;;  %s2901_s23 = int_to_ptr.vmem [resolvable:$false] %s2900_s23 }
  0x69   : > { %s2902_s27 = scalar_lea.vmem %s2901_s23, 3072  ;;  %p2903_p11 = scmp.lt.s32.totalorder %s3161_s28, %s2901_s23 }
  0x6a   : > { %p2898_p8 = pnand %p2896_p4, %p2882_p9  ;;  %p2904_p0 = scmp.lt.s32.totalorder %s2902_s27, %s2895_s13 }
  0x6c   : > { %p2899_p7 = pneg %p2898_p8  ;;  %p2905_p3 = por %p2904_p0, %p2903_p11 }
  0x6e   : > { %p2906_p12 = pnand %p2905_p3, %p2899_p7 }
  0x70   : > { %2909 = shalt.err (!%p2906_p12)
}
  0x71   : > { %s2995_s6 = smov 128   ;;  %s2996_s7 = smov 8  }
  0x72   : > { %2655 = dma.hbm_to_vmem [thread:$0]  (!%p3152_p10), %s3159_s26, 1536, %s3161_s28, %s3163_s30, %s2995_s6, %s2995_s6, %s2996_s7  }
  0x73   : > { %p6525_p9 = scmp.ne.s32.totalorder %s6513_s29, 0 }
  0x75   : > { %245 = sbr.rel (%p6525_p9) target bundleno = 683 (0x2ab), region = 40 }
  0x7c   : > { %s3194_s10 = sand.u32 1, %s2980_s19   ;;  %p6527_p13 = scmp.ne.s32.totalorder %s6509_s24, 0 }
  0x7d   : > { %6526 = sst [smem:[#allocation29_spill]] %s3194_s10  ;;  %s2616_s11 = smul.u32 96, %s3194_s10 }
  0x7e   : > { %s248_s14 = scalar_lea.sflag [#allocation5], %s3194_s10 }
  0x7f   : > { %s3198_s17 = scalar_lea.vmem [#allocation4], %s2616_s11 }
  0x80   : > { %2955 = dma.done.wait (%p6527_p13), %s248_s14, 1536  }
  0x81   : > { %2957 = vsyncadd (%p6527_p13), %s248_s14, 4294965760  ;;  %p6528_p10 = scmp.eq.s32.totalorder %s3055_s22, 0 }
  0x83   : > { %2959 = dma.done.wait (%p6528_p10), [#allocation7], 32   ;;  %p6529_p1 = pmov %p6528_p10 }
  0x85   : > { %2961 = vsyncadd (%p6529_p1), [#allocation7], 4294967264  ;;  %p6530_p2 = pmov %p6529_p1 }
  0x86   : > { %p6531_p5 = pmov %p6529_p1 }
  0x87   : > { %2963 = dma.done.wait (%p6530_p2), [#allocation10], 32  }
  0x88   : > { %2965 = vsyncadd (%p6531_p5), [#allocation10], 4294967264  ;;  %p6532_p4 = pmov %p6529_p1 }
  0x89   : > { %p6533_p8 = pmov %p6529_p1 }
  0x8a   : > { %2967 = dma.done.wait (%p6532_p4), [#allocation13], 16  }
  0x8b   : > { %2969 = vsyncadd (%p6533_p8), [#allocation13], 4294967280 }
  0x8c   : > { %272 = sfence }
  0x8d   : > { %v2342_v0 = vld [vmem:[%s3198_s17 + $0x30] sm:$0xff]  ;;  %v298_v1 = vld [vmem:[%s3198_s17] sm:$0xff]  ;;  %vm295_vm0 = vcmask 139264   ;;  %s2997_s24 = smov 1   ;;  %v2343_v2 = vld [vmem:[%s3198_s17 + $0x38] sm:$0xff]  ;;  %v2998_v4 = vmov 0.0  }
  0x8e   : > { %351 = vrot.lane.b32.xlu1 %v2342_v0, %s2997_s24  ;;  %302 = vrot.lane.b32.xlu0 %v298_v1, %s2997_s24  ;;  %v299_v3 = vld [vmem:[%s3198_s17 + $0x8] sm:$0xff]  ;;  %344 = vst.msk [vmem:[#allocation2 + $0x48] sm:$0x1] %vm295_vm0, %v2998_v4  ;;  %296 = vst.msk [vmem:[#allocation2] sm:$0x1] %vm295_vm0, %v2998_v4  ;;  %v2339_v5 = vld [vmem:[%s3198_s17 + $0x18] sm:$0xff] }
  0x8f   : > { %297 = vst.msk [vmem:[#allocation2 + $0x11] sm:$0x1] %vm295_vm0, %v2998_v4  ;;  %312 = vst.msk [vmem:[#allocation2 + $0x18] sm:$0x1] %vm295_vm0, %v2998_v4  ;;  %v2338_v6 = vld [vmem:[%s3198_s17 + $0x10] sm:$0xff]  ;;  %v2345_v7 = vld [vmem:[%s3198_s17 + $0x48] sm:$0xff] }
  0x90   : > { %313 = vst.msk [vmem:[#allocation2 + $0x29] sm:$0x1] %vm295_vm0, %v2998_v4  ;;  %328 = vst.msk [vmem:[#allocation2 + $0x30] sm:$0x1] %vm295_vm0, %v2998_v4  ;;  %v2344_v8 = vld [vmem:[%s3198_s17 + $0x40] sm:$0xff]  ;;  %v2341_v9 = vld [vmem:[%s3198_s17 + $0x28] sm:$0xff] }
  0x91   : > { %329 = vst.msk [vmem:[#allocation2 + $0x41] sm:$0x1] %vm295_vm0, %v2998_v4  ;;  %345 = vst.msk [vmem:[#allocation2 + $0x59] sm:$0x1] %vm295_vm0, %v2998_v4  ;;  %v2340_v10 = vld [vmem:[%s3198_s17 + $0x20] sm:$0xff]  ;;  %v2347_v11 = vld [vmem:[%s3198_s17 + $0x58] sm:$0xff] }
  0x92   : > { %360 = vst.msk [vmem:[#allocation2 + $0x60] sm:$0x1] %vm295_vm0, %v2998_v4  ;;  %361 = vst.msk [vmem:[#allocation2 + $0x71] sm:$0x1] %vm295_vm0, %v2998_v4  ;;  %353 = vrot.lane.b32.xlu1 %v2343_v2, %s2997_s24  ;;  %304 = vrot.lane.b32.xlu0 %v299_v3, %s2997_s24  ;;  %v2346_v12 = vld [vmem:[%s3198_s17 + $0x50] sm:$0xff]  ;;  %s3252_s29 = sld [smem:[#allocation11 + $0x1]] }
  0x93   : > { %376 = vst.msk [vmem:[#allocation2 + $0x78] sm:$0x1] %vm295_vm0, %v2998_v4  ;;  %377 = vst.msk [vmem:[#allocation2 + $0x89] sm:$0x1] %vm295_vm0, %v2998_v4  ;;  %s3254_s16 = sld [smem:[#allocation11 + $0x1c]]  ;;  %s3258_s28 = sld [smem:[#allocation11 + $0x37]] }
  0x94   : > { %s3256_s26 = sld [smem:[#allocation11 + $0x4]]  ;;  %s3260_s30 = sld [smem:[#allocation11 + $0x7]]  ;;  %vm308_vm1 = vcmask 138248   ;;  %vm1523_vm2 = vcmask 146432   ;;  %vm1526_vm3 = vcmask 140288   ;;  %vm1503_vm6 = vcmask 130048  }
  0x95   : > { %s3262_s13 = sld [smem:[#allocation11 + $0x1f]]  ;;  %s3264_s15 = sld [smem:[#allocation11 + $0x22]] }
  0x96   : > { %321 = vrot.lane.b32.xlu1 %v2339_v5, %s2997_s24  ;;  %319 = vrot.lane.b32.xlu0 %v2338_v6, %s2997_s24  ;;  %s3266_s23 = sld [smem:[#allocation11 + $0x3a]]  ;;  %s3268_s27 = sld [smem:[#allocation11 + $0x3d]] }
  0x97   : > { %s3270_s6 = sld [smem:[#allocation11 + $0x2]]  ;;  %s3274_s11 = sld [smem:[#allocation11 + $0xd]] }
  0x98   : > { %6534 = sst [smem:[#allocation30_spill]] %s3252_s29  ;;  %s3276_s14 = sld [smem:[#allocation11 + $0x10]]  ;;  %v6408_v13 = vstv %s3252_s29 }
  0x99   : > { %6535 = sst [smem:[#allocation31_spill]] %s3254_s16  ;;  %s3272_s7 = sld [smem:[#allocation11 + $0xa]]  ;;  %v6407_v14 = vstv %s3254_s16  ;;  %v6406_v18 = vstv %s3258_s28 }
  0x9a   : > { %369 = vrot.lane.b32.xlu1 %v2345_v7, %s2997_s24  ;;  %367 = vrot.lane.b32.xlu0 %v2344_v8, %s2997_s24  ;;  %6536 = sst [smem:[#allocation32_spill]] %s3256_s26  ;;  %s3278_s17 = sld [smem:[#allocation11 + $0x25]] }
  0x9b   : > { %6537 = sst [smem:[#allocation33_spill]] %s3258_s28  ;;  %s3282_s0 = sld [smem:[#allocation11 + $0x2b]] }
  0x9c   : > { %6538 = sst [smem:[#allocation34_spill]] %s3260_s30  ;;  %s3284_s1 = sld [smem:[#allocation11 + $0x40]] }
  0x9d   : > { %6539 = sst [smem:[#allocation35_spill]] %s3262_s13  ;;  %s3286_s2 = sld [smem:[#allocation11 + $0x5]]  ;;  %v6401_v22 = vstv %s3270_s6 }
  0x9e   : > { %337 = vrot.lane.b32.xlu1 %v2341_v9, %s2997_s24  ;;  %335 = vrot.lane.b32.xlu0 %v2340_v10, %s2997_s24  ;;  %6540 = sst [smem:[#allocation36_spill]] %s3264_s15  ;;  %s3288_s3 = sld [smem:[#allocation11 + $0x43]] }
  0x9f   : > { %6541 = sst [smem:[#allocation37_spill]] %s3266_s23  ;;  %s3290_s4 = sld [smem:[#allocation11 + $0x46]] }
  0xa0   : > { %6542 = sst [smem:[#allocation38_spill]] %s3268_s27  ;;  %s3292_s8 = sld [smem:[#allocation11 + $0x13]] }
  0xa1   : > { %6543 = sst [smem:[#allocation39_spill]] %s3270_s6  ;;  %s3294_s20 = sld [smem:[#allocation11 + $0x16]] }
  0xa2   : > { %385 = vrot.lane.b32.xlu1 %v2347_v11, %s2997_s24  ;;  %383 = vrot.lane.b32.xlu0 %v2346_v12, %s2997_s24  ;;  %6544 = sst [smem:[#allocation40_spill]] %s3272_s7  ;;  %s3280_s24 = sld [smem:[#allocation11 + $0x28]] }
  0xa3   : > { %6545 = sst [smem:[#allocation41_spill]] %s3274_s11  ;;  %s3296_s19 = sld [smem:[#allocation11 + $0x19]] }
  0xa4   : > { %6546 = sst [smem:[#allocation42_spill]] %s3276_s14  ;;  %s3300_s25 = sld [smem:[#allocation11 + $0x31]] }
  0xa5   : > { %6547 = sst [smem:[#allocation43_spill]] %s3278_s17  ;;  %s3298_s9 = sld [smem:[#allocation11 + $0x2e]] }
  0xa6   : > { %6549 = sst [smem:[#allocation45_spill]] %s3282_s0  ;;  %s3302_s18 = sld [smem:[#allocation11 + $0x34]] }
  0xa7   : > { %6550 = sst [smem:[#allocation46_spill]] %s3284_s1  ;;  %s3304_s21 = sld [smem:[#allocation11 + $0x49]] }
  0xa8   : > { %6548 = sst [smem:[#allocation44_spill]] %s3280_s24  ;;  %s3306_s5 = sld [smem:[#allocation11 + $0x4c]] }
  0xa9   : > { %6551 = sst [smem:[#allocation47_spill]] %s3286_s2  ;;  %s3308_s12 = sld [smem:[#allocation11 + $0x4f]] }
  0xaa   : > { %6552 = sst [smem:[#allocation48_spill]] %s3288_s3  ;;  %s3310_s22 = sld [smem:[#allocation11 + $0x8]] }
  0xab   : > { %6553 = sst [smem:[#allocation49_spill]] %s3290_s4  ;;  %s3314_s4 = sld [smem:[#allocation8 + $0x1]] }
  0xac   : > { %6554 = sst [smem:[#allocation50_spill]] %s3292_s8  ;;  %s3312_s10 = sld [smem:[#allocation11 + $0x1d]] }
  0xad   : > { %6555 = sst [smem:[#allocation51_spill]] %s3294_s20  ;;  %s3316_s3 = sld [smem:[#allocation11 + $0x20]] }
  0xae   : > { %6556 = sst [smem:[#allocation52_spill]] %s3296_s19  ;;  %s3318_s19 = sld [smem:[#allocation8 + $0x4]] }
  0xaf   : > { %6557 = sst [smem:[#allocation53_spill]] %s3298_s9  ;;  %s3320_s9 = sld [smem:[#allocation11 + $0x23]] }
  0xb0   : > { %6558 = sst [smem:[#allocation54_spill]] %s3300_s25  ;;  %s3322_s25 = sld [smem:[#allocation11 + $0x38]] }
  0xb1   : > { %6559 = sst [smem:[#allocation55_spill]] %s3302_s18  ;;  %s3430_s16 = sld [smem:[#allocation8 + $0x49]] }
  0xb2   : > { %6560 = sst [smem:[#allocation56_spill]] %s3304_s21  ;;  %s3324_s18 = sld [smem:[#allocation11 + $0xb]] }
  0xb3   : > { %6561 = sst [smem:[#allocation57_spill]] %s3306_s5  ;;  %s3326_s21 = sld [smem:[#allocation11 + $0xe]] }
  0xb4   : > { %6562 = sst [smem:[#allocation58_spill]] %s3308_s12  ;;  %s3328_s5 = sld [smem:[#allocation11 + $0x11]] }
  0xb5   : > { %6563 = sst [smem:[#allocation59_spill]] %s3310_s22  ;;  %s3332_s22 = sld [smem:[#allocation8 + $0x1c]] }
  0xb6   : > { %6564 = sst [smem:[#allocation60_spill]] %s3312_s10  ;;  %s3330_s12 = sld [smem:[#allocation8 + $0x7]] }
  0xb7   : > { %6565 = sst [smem:[#allocation61_spill]] %s3314_s4  ;;  %s3334_s10 = sld [smem:[#allocation8 + $0x1f]] }
  0xb8   : > { %6566 = sst [smem:[#allocation62_spill]] %s3316_s3  ;;  %s3336_s4 = sld [smem:[#allocation8 + $0x37]] }
  0xb9   : > { %6567 = sst [smem:[#allocation63_spill]] %s3318_s19  ;;  %s3338_s3 = sld [smem:[#allocation8 + $0x3a]] }
  0xba   : > { %6568 = sst [smem:[#allocation64_spill]] %s3320_s9  ;;  %s3340_s19 = sld [smem:[#allocation11 + $0x3b]] }
  0xbb   : > { %6569 = sst [smem:[#allocation65_spill]] %s3322_s25  ;;  %s3342_s9 = sld [smem:[#allocation8 + $0xa]] }
  0xbc   : > { %6570 = sst [smem:[#allocation66_spill]] %s3324_s18  ;;  %s3346_s18 = sld [smem:[#allocation8 + $0xd]] }
  0xbd   : > { %6571 = sst [smem:[#allocation67_spill]] %s3326_s21  ;;  %s3344_s25 = sld [smem:[#allocation11 + $0x3e]] }
  0xbe   : > { %6572 = sst [smem:[#allocation68_spill]] %s3328_s5  ;;  %s3348_s21 = sld [smem:[#allocation11 + $0x26]] }
  0xbf   : > { %6573 = sst [smem:[#allocation69_spill]] %s3330_s12  ;;  %s3352_s12 = sld [smem:[#allocation11 + $0x14]] }
  0xc0   : > { %6574 = sst [smem:[#allocation70_spill]] %s3332_s22  ;;  %s3350_s5 = sld [smem:[#allocation11 + $0x29]] }
  0xc1   : > { %6575 = sst [smem:[#allocation71_spill]] %s3334_s10  ;;  %s3354_s22 = sld [smem:[#allocation11 + $0x17]] }
  0xc2   : > { %6576 = sst [smem:[#allocation72_spill]] %s3336_s4  ;;  %s3356_s10 = sld [smem:[#allocation11 + $0x1a]] }
  0xc3   : > { %6577 = sst [smem:[#allocation73_spill]] %s3338_s3  ;;  %s3358_s4 = sld [smem:[#allocation11 + $0x2c]] }
  0xc4   : > { %6578 = sst [smem:[#allocation74_spill]] %s3340_s19  ;;  %s3360_s3 = sld [smem:[#allocation8 + $0x10]] }
  0xc5   : > { %6579 = sst [smem:[#allocation75_spill]] %s3342_s9  ;;  %s3362_s19 = sld [smem:[#allocation8 + $0x22]] }
  0xc6   : > { %6580 = sst [smem:[#allocation76_spill]] %s3344_s25  ;;  %s3364_s9 = sld [smem:[#allocation8 + $0x25]] }
  0xc7   : > { %6581 = sst [smem:[#allocation77_spill]] %s3346_s18  ;;  %s3366_s25 = sld [smem:[#allocation8 + $0x3d]] }
  0xc8   : > { %6582 = sst [smem:[#allocation78_spill]] %s3348_s21  ;;  %s3368_s18 = sld [smem:[#allocation11 + $0x2f]] }
  0xc9   : > { %6583 = sst [smem:[#allocation79_spill]] %s3350_s5  ;;  %s3370_s21 = sld [smem:[#allocation8 + $0x28]] }
  0xca   : > { %6584 = sst [smem:[#allocation80_spill]] %s3352_s12  ;;  %s3372_s5 = sld [smem:[#allocation11 + $0x32]]  ;;  %v6392_v3 = vstv %s3360_s3 }
  0xcb   : > { %6585 = sst [smem:[#allocation81_spill]] %s3354_s22  ;;  %s3376_s22 = sld [smem:[#allocation11 + $0x41]] }
  0xcc   : > { %6586 = sst [smem:[#allocation82_spill]] %s3356_s10  ;;  %s3374_s12 = sld [smem:[#allocation11 + $0x35]] }
  0xcd   : > { %6587 = sst [smem:[#allocation83_spill]] %s3358_s4  ;;  %s3378_s10 = sld [smem:[#allocation11 + $0x44]] }
  0xce   : > { %6588 = sst [smem:[#allocation84_spill]] %s3360_s3  ;;  %s3380_s4 = sld [smem:[#allocation11 + $0x47]] }
  0xcf   : > { %6589 = sst [smem:[#allocation85_spill]] %s3362_s19  ;;  %s3382_s19 = sld [smem:[#allocation8 + $0x13]] }
  0xd0   : > { %6590 = sst [smem:[#allocation86_spill]] %s3364_s9  ;;  %s3384_s9 = sld [smem:[#allocation8 + $0x16]] }
  0xd1   : > { %6591 = sst [smem:[#allocation87_spill]] %s3366_s25  ;;  %s3386_s25 = sld [smem:[#allocation8 + $0x19]] }
  0xd2   : > { %6592 = sst [smem:[#allocation88_spill]] %s3368_s18  ;;  %s3388_s18 = sld [smem:[#allocation8 + $0x2b]] }
  0xd3   : > { %6593 = sst [smem:[#allocation89_spill]] %s3370_s21  ;;  %s3390_s21 = sld [smem:[#allocation8 + $0x52]] }
  0xd4   : > { %6594 = sst [smem:[#allocation90_spill]] %s3372_s5  ;;  %s3432_s30 = sld [smem:[#allocation8 + $0x6d]] }
  0xd5   : > { %6595 = sst [smem:[#allocation91_spill]] %s3374_s12  ;;  %s3392_s12 = sld [smem:[#allocation8 + $0x40]] }
  0xd6   : > { %6596 = sst [smem:[#allocation92_spill]] %s3376_s22  ;;  %s3400_s22 = sld [smem:[#allocation11 + $0x4a]] }
  0xd7   : > { %6597 = sst [smem:[#allocation93_spill]] %s3378_s10  ;;  %s3394_s10 = sld [smem:[#allocation8 + $0x55]] }
  0xd8   : > { %6598 = sst [smem:[#allocation94_spill]] %s3380_s4  ;;  %s3396_s4 = sld [smem:[#allocation8 + $0x2e]] }
  0xd9   : > { %6599 = sst [smem:[#allocation95_spill]] %s3382_s19  ;;  %s3398_s19 = sld [smem:[#allocation8 + $0x58]] }
  0xda   : > { %6600 = sst [smem:[#allocation96_spill]] %s3384_s9  ;;  %s3440_s23 = sld [smem:[#allocation8 + $0x4f]] }
  0xdb   : > { %6601 = sst [smem:[#allocation97_spill]] %s3386_s25  ;;  %s3402_s25 = sld [smem:[#allocation8 + $0x31]] }
  0xdc   : > { %6602 = sst [smem:[#allocation98_spill]] %s3388_s18  ;;  %s3404_s18 = sld [smem:[#allocation11 + $0x4d]] }
  0xdd   : > { %6603 = sst [smem:[#allocation99_spill]] %s3390_s21  ;;  %s3406_s21 = sld [smem:[#allocation11 + $0x50]] }
  0xde   : > { %6604 = sst [smem:[#allocation100_spill]] %s3392_s12  ;;  %s3408_s12 = sld [smem:[#allocation8 + $0x34]] }
  0xdf   : > { %6605 = sst [smem:[#allocation101_spill]] %s3394_s10  ;;  %s3410_s10 = sld [smem:[#allocation8 + $0x43]] }
  0xe0   : > { %6606 = sst [smem:[#allocation102_spill]] %s3396_s4  ;;  %s3448_s11 = sld [smem:[#allocation8 + $0x88]] }
  0xe1   : > { %6607 = sst [smem:[#allocation103_spill]] %s3398_s19  ;;  %s3414_s19 = sld [smem:[#allocation8 + $0x46]] }
  0xe2   : > { %6608 = sst [smem:[#allocation104_spill]] %s3400_s22  ;;  %s3416_s22 = sld [smem:[#allocation8 + $0x5b]] }
  0xe3   : > { %6609 = sst [smem:[#allocation105_spill]] %s3402_s25  ;;  %s3422_s25 = sld [smem:[#allocation8 + $0x5e]] }
  0xe4   : > { %6610 = sst [smem:[#allocation106_spill]] %s3404_s18  ;;  %s6634_s17 = sld [smem:[#allocation60_spill]] }
  0xe5   : > { %6611 = sst [smem:[#allocation107_spill]] %s3406_s21  ;;  %s6637_s24 = sld [smem:[#allocation61_spill]] }
  0xe6   : > { %6612 = sst [smem:[#allocation108_spill]] %s3408_s12  ;;  %s3456_s0 = sld [smem:[#allocation8 + $0x67]] }
  0xe7   : > { %6613 = sst [smem:[#allocation109_spill]] %s3410_s10  ;;  %s6639_s1 = sld [smem:[#allocation63_spill]] }
  0xe8   : > { %6614 = sst [smem:[#allocation110_spill]] %s3414_s19  ;;  %s3424_s10 = sld [smem:[#allocation8 + $0x61]] }
  0xe9   : > { %6615 = sst [smem:[#allocation111_spill]] %s3416_s22  ;;  %s6645_s26 = sld [smem:[#allocation65_spill]] }
  0xea   : > { %6616 = sst [smem:[#allocation112_spill]] %s3422_s25  ;;  %s3464_s20 = sld [smem:[#allocation8 + $0x73]]  ;;  %v6405_v43 = vstv %s6634_s17 }
  0xeb   : > { %6618 = sst [smem:[#allocation114_spill]] %s3430_s16  ;;  %s6649_s28 = sld [smem:[#allocation70_spill]]  ;;  %v402_v45 = vstv %s6637_s24 }
  0xec   : > { %6620 = sst [smem:[#allocation115_spill]] %s3432_s30  ;;  %s3446_s30 = sld [smem:[#allocation8 + $0x70]] }
  0xed   : > { %6626 = sst [smem:[#allocation117_spill]] %s3440_s23  ;;  %s3454_s23 = sld [smem:[#allocation8 + $0x64]]  ;;  %v444_v46 = vstv %s6639_s1 }
  0xee   : > { %6617 = sst [smem:[#allocation113_spill]] %s3424_s10  ;;  %s3438_s10 = sld [smem:[#allocation8 + $0x4c]] }
  0xef   : > { %6632 = sst [smem:[#allocation119_spill]] %s3448_s11  ;;  %s3462_s11 = sld [smem:[#allocation8 + $0x6a]]  ;;  %v6402_v50 = vstv %s6645_s26 }
  0xf0   : > { %6638 = sst [smem:[#allocation121_spill]] %s3456_s0  ;;  %s3470_s0 = sld [smem:[#allocation8 + $0x76]] }
  0xf1   : > { %6644 = sst [smem:[#allocation123_spill]] %s3464_s20  ;;  %s3472_s29 = sld [smem:[#allocation8 + $0x8b]]  ;;  %v908_v53 = vstv %s6649_s28 }
  0xf2   : > { %6630 = sst [smem:[#allocation118_spill]] %s3446_s30  ;;  %s6651_s15 = sld [smem:[#allocation71_spill]] }
  0xf3   : > { %6636 = sst [smem:[#allocation120_spill]] %s3454_s23  ;;  %s6647_s23 = sld [smem:[#allocation69_spill]] }
  0xf4   : > { %6624 = sst [smem:[#allocation116_spill]] %s3438_s10  ;;  %s3478_s20 = sld [smem:[#allocation8 + $0x79]] }
  0xf5   : > { %6642 = sst [smem:[#allocation122_spill]] %s3462_s11  ;;  %s6653_s11 = sld [smem:[#allocation75_spill]] }
  0xf6   : > { %6648 = sst [smem:[#allocation124_spill]] %s3470_s0  ;;  %s6655_s6 = sld [smem:[#allocation72_spill]] }
  0xf7   : > { %6650 = sst [smem:[#allocation125_spill]] %s3472_s29  ;;  %s3480_s25 = sld [smem:[#allocation8 + $0x7c]] }
  0xf8   : > { %s6657_s7 = sld [smem:[#allocation73_spill]]  ;;  %s3486_s29 = sld [smem:[#allocation8 + $0x8e]]  ;;  %v966_v54 = vstv %s6651_s15 }
  0xf9   : > { %s3488_s10 = sld [smem:[#allocation8 + $0x2]]  ;;  %s6663_s24 = sld [smem:[#allocation77_spill]]  ;;  %v502_v52 = vstv %s6647_s23 }
  0xfa   : > { %6654 = sst [smem:[#allocation126_spill]] %s3478_s20  ;;  %s3502_s26 = sld [smem:[#allocation8 + $0x85]] }
  0xfb   : > { %s3496_s30 = sld [smem:[#allocation8 + $0x82]]  ;;  %v560_v56 = vstv %s6653_s11  ;;  %s3504_s13 = sld [smem:[#allocation8 + $0x5]] }
  0xfc   : > { %v414_v57 = vstv %s6655_s6  ;;  %s6673_s23 = sld [smem:[#allocation86_spill]]  ;;  %s6674_s15 = sld [smem:[#allocation87_spill]] }
  0xfd   : > { %6656 = sst [smem:[#allocation127_spill]] %s3480_s25  ;;  %s3494_s25 = sld [smem:[#allocation8 + $0x7f]] }
  0xfe   : > { %6660 = sst [smem:[#allocation128_spill]] %s3486_s29  ;;  %v462_v58 = vstv %s6657_s7  ;;  %s3510_s29 = sld [smem:[#allocation8 + $0x91]] }
  0xff   : > { %6662 = sst [smem:[#allocation129_spill]] %s3488_s10  ;;  %s6671_s10 = sld [smem:[#allocation85_spill]]  ;;  %v618_v62 = vstv %s6663_s24 }
 0x100   : > { %6670 = sst [smem:[#allocation132_spill]] %s3502_s26  ;;  %s3512_s27 = sld [smem:[#allocation8 + $0x94]]  ;;  %v352_v49 = vpop.permute.xlu1 %351  ;;  %v303_v55 = vpop.permute.xlu0 %302 }
 0x101   : > { %6668 = sst [smem:[#allocation131_spill]] %s3496_s30  ;;  %s3520_s26 = sld [smem:[#allocation8 + $0x1d]]  ;;  %357 = vst.msk [vmem:[#allocation2 + $0x49] sm:$0xff] %vm308_vm1, %v352_v49  ;;  %309 = vst.msk [vmem:[#allocation2 + $0x1] sm:$0xff] %vm308_vm1, %v303_v55 }
 0x102   : > { %6672 = sst [smem:[#allocation133_spill]] %s3504_s13  ;;  %s3518_s13 = sld [smem:[#allocation8 + $0x97]]  ;;  %v1082_v5 = vstv %s6673_s23  ;;  %v6391_v6 = vstv %s6674_s15 }
 0x103   : > { %6666 = sst [smem:[#allocation130_spill]] %s3494_s25  ;;  %s3526_s1 = sld [smem:[#allocation8 + $0x8]] }
 0x104   : > { %6676 = sst [smem:[#allocation134_spill]] %s3510_s29  ;;  %s3528_s2 = sld [smem:[#allocation8 + $0x20]]  ;;  %v354_v48 = vpop.permute.xlu1 %353  ;;  %v305_v47 = vpop.permute.xlu0 %304 }
 0x105   : > { %v1024_v4 = vstv %s6671_s10  ;;  %s6688_s8 = sld [smem:[#allocation99_spill]]  ;;  %s6690_s3 = sld [smem:[#allocation101_spill]]  ;;  %358 = vst.msk [vmem:[#allocation2 + $0x51] sm:$0xff] %vm308_vm1, %v354_v48  ;;  %310 = vst.msk [vmem:[#allocation2 + $0x9] sm:$0xff] %vm308_vm1, %v305_v47 }
 0x106   : > { %s3536_s10 = sld [smem:[#allocation8 + $0x9d]]  ;;  %s6691_s23 = sld [smem:[#allocation103_spill]] }
 0x107   : > { %6682 = sst [smem:[#allocation136_spill]] %s3520_s26  ;;  %s3544_s5 = sld [smem:[#allocation8 + $0xb]] }
 0x108   : > { %6680 = sst [smem:[#allocation135_spill]] %s3518_s13  ;;  %s3534_s13 = sld [smem:[#allocation8 + $0x9a]]  ;;  %v899_v47 = vld [vmem:[#allocation2 + $0x48] sm:$0xff]  ;;  %v395_v42 = vld [vmem:[#allocation2] sm:$0xff]  ;;  %v322_v41 = vpop.permute.xlu1 %321  ;;  %v320_v40 = vpop.permute.xlu0 %319 }
 0x109   : > { %s3550_s7 = sld [smem:[#allocation8 + $0xe]]  ;;  %s3552_s14 = sld [smem:[#allocation8 + $0x11]]  ;;  %v957_v1 = vld [vmem:[#allocation2 + $0x49] sm:$0xff]  ;;  %v435_v55 = vld [vmem:[#allocation2 + $0x1] sm:$0xff]  ;;  %v1520_v48 = vsub.f32 %v899_v47, %v395_v42  ;;  %326 = vst.msk [vmem:[#allocation2 + $0x21] sm:$0xff] %vm308_vm1, %v322_v41  ;;  %325 = vst.msk [vmem:[#allocation2 + $0x19] sm:$0xff] %vm308_vm1, %v320_v40  ;;  %v403_v63 = vmul.f32 %v402_v45, %v395_v42  ;;  %v415_v49 = vmul.f32 %v414_v57, %v395_v42 }
 0x10a   : > { %6687 = sst [smem:[#allocation137_spill]] %s3528_s2  ;;  %s3542_s2 = sld [smem:[#allocation8 + $0xa0]]  ;;  %v445_v0 = vmul.f32 %v444_v46, %v435_v55  ;;  %v463_v38 = vmul.f32 %v462_v58, %v435_v55  ;;  %v3672_v41 = vmul.f32 %v908_v53, %v899_v47  ;;  %v3676_v40 = vmul.f32 %v966_v54, %v957_v1 }
 0x10b   : > { %v926_v2 = vstv %s6688_s8  ;;  %v984_v12 = vstv %s6690_s3  ;;  %s3558_s17 = sld [smem:[#allocation8 + $0x14]]  ;;  %s3560_s24 = sld [smem:[#allocation8 + $0x23]]  ;;  %1524 = vst.msk [vmem:[#allocation3] sm:$0xff] %vm1523_vm2, %v1520_v48 }
 0x10c   : > { %v6390_v11 = vstv %s6691_s23  ;;  %s6700_s6 = sld [smem:[#allocation115_spill]]  ;;  %s6704_s4 = sld [smem:[#allocation118_spill]]  ;;  %6753 = vst [vmem:[#allocation156_spill] sm:$0xff] %v3672_v41  ;;  %6754 = vst [vmem:[#allocation157_spill] sm:$0xff] %v3676_v40  ;;  %v3680_v37 = vld [vmem:[#allocation2 + $0x50] sm:$0xff]  ;;  %v370_v36 = vpop.permute.xlu1 %369  ;;  %v368_v60 = vpop.permute.xlu0 %367  ;;  %v3688_v48 = vmul.f32 %v926_v2, %v899_v47  ;;  %v3692_v31 = vmul.f32 %v984_v12, %v957_v1  ;;  %v3704_v28 = vld [vmem:[#allocation2 + $0x8] sm:$0xff]  ;;  %v3708_v27 = vadd.f32 %v463_v38, %v415_v49 }
 0x10d   : > { %s3568_s26 = sld [smem:[#allocation8 + $0x1a]]  ;;  %s6706_s3 = sld [smem:[#allocation119_spill]]  ;;  %6755 = vst [vmem:[#allocation158_spill] sm:$0xff] %v3680_v37  ;;  %v3682_v35 = vld [vmem:[#allocation2 + $0x51] sm:$0xff]  ;;  %6766 = vst [vmem:[#allocation166_spill] sm:$0xff] %v3704_v28  ;;  %v3718_v25 = vld [vmem:[#allocation2 + $0x9] sm:$0xff]  ;;  %v404_v38 = vmul.f32 %v402_v45, %v3704_v28 }
 0x10e   : > { %s3576_s18 = sld [smem:[#allocation8 + $0x29]]  ;;  %s3582_s11 = sld [smem:[#allocation8 + $0x2c]]  ;;  %6757 = vst [vmem:[#allocation159_spill] sm:$0xff] %v3682_v35  ;;  %v3684_v32 = vld [vmem:[#allocation2 + $0x4a] sm:$0xff]  ;;  %6760 = vst [vmem:[#allocation161_spill] sm:$0xff] %v3688_v48  ;;  %v3702_v34 = vld [vmem:[#allocation2 + $0x52] sm:$0xff]  ;;  %v3744_v49 = vmul.f32 %v966_v54, %v3682_v35 }
 0x10f   : > { %6695 = sst [smem:[#allocation138_spill]] %s3552_s14  ;;  %s3566_s14 = sld [smem:[#allocation8 + $0x17]]  ;;  %6759 = vst [vmem:[#allocation160_spill] sm:$0xff] %v3684_v32  ;;  %6761 = vst [vmem:[#allocation162_spill] sm:$0xff] %v3692_v31  ;;  %v1516_v33 = vld [vmem:[#allocation2 + $0x58] sm:$0x3]  ;;  %v3752_v45 = vmul.f32 %v1024_v4, %v3684_v32 }
 0x110   : > { %s6718_s28 = sld [smem:[#allocation125_spill]]  ;;  %s3598_s0 = sld [smem:[#allocation8 + $0x3e]]  ;;  %6765 = vst [vmem:[#allocation165_spill] sm:$0xff] %v3702_v34  ;;  %374 = vst.msk [vmem:[#allocation2 + $0x69] sm:$0xff] %vm308_vm1, %v370_v36  ;;  %v3720_v29 = vld [vmem:[#allocation2 + $0x2] sm:$0xff]  ;;  %v3722_v24 = vld [vmem:[#allocation2 + $0xa] sm:$0xff]  ;;  %v1521_v36 = vsub.f32 %v3680_v37, %v3704_v28  ;;  %v336_v54 = vpop.permute.xlu0 %335 }
 0x111   : > { %6697 = sst [smem:[#allocation139_spill]] %s3558_s17  ;;  %s6723_s20 = sld [smem:[#allocation129_spill]]  ;;  %373 = vst.msk [vmem:[#allocation2 + $0x61] sm:$0xff] %vm308_vm1, %v368_v60  ;;  %6769 = vst [vmem:[#allocation167_spill] sm:$0xff] %v3708_v27  ;;  %v3732_v60 = vmul.f32 %v908_v53, %v3680_v37  ;;  %v3774_v26 = vld [vmem:[#allocation2 + $0x19] sm:$0xff]  ;;  %v3789_v23 = vmul.f32 %v6391_v6, %v3722_v24 }
 0x112   : > { %6699 = sst [smem:[#allocation140_spill]] %s3560_s24  ;;  %s3574_s24 = sld [smem:[#allocation8 + $0x26]]  ;;  %v6385_v8 = vstv %s6700_s6  ;;  %v6386_v44 = vstv %s6704_s4  ;;  %6772 = vst [vmem:[#allocation170_spill] sm:$0xff] %v3718_v25  ;;  %6773 = vst [vmem:[#allocation171_spill] sm:$0xff] %v3720_v29  ;;  %v1554_v30 = vld [vmem:[#allocation3] sm:$0xff] }
 0x113   : > { %6705 = sst [smem:[#allocation142_spill]] %s3568_s26  ;;  %s3584_s26 = sld [smem:[#allocation8 + $0x38]]  ;;  %v6389_v61 = vstv %s6706_s3  ;;  %v3696_v9 = vmul.f32 %v6385_v8, %v395_v42  ;;  %v3700_v39 = vmul.f32 %v6386_v44, %v435_v55  ;;  %v447_v8 = vadd.f32 %v445_v0, %v403_v63  ;;  %6774 = vst [vmem:[#allocation172_spill] sm:$0xff] %v3722_v24  ;;  %6775 = vst [vmem:[#allocation173_spill] sm:$0xff] %v3732_v60  ;;  %v1519_v0 = vld [vmem:[#allocation2 + $0x10] sm:$0x3] }
 0x114   : > { %6711 = sst [smem:[#allocation144_spill]] %s3576_s18  ;;  %s3592_s18 = sld [smem:[#allocation8 + $0x53]]  ;;  %v3712_v55 = vmul.f32 %v6389_v61, %v899_v47  ;;  %6777 = vst [vmem:[#allocation175_spill] sm:$0xff] %v3744_v49  ;;  %v503_v47 = vmul.f32 %v502_v52, %v3720_v29  ;;  %6778 = vst [vmem:[#allocation176_spill] sm:$0xff] %v3752_v45  ;;  %v1522_v53 = vsub.f32 %v1516_v33, %v1519_v0  ;;  %v3772_v0 = vld [vmem:[#allocation2 + $0x20] sm:$0xff] }
 0x115   : > { %6703 = sst [smem:[#allocation141_spill]] %s3566_s14  ;;  %s3600_s16 = sld [smem:[#allocation8 + $0x56]]  ;;  %6762 = vst [vmem:[#allocation163_spill] sm:$0xff] %v3696_v9  ;;  %6763 = vst [vmem:[#allocation164_spill] sm:$0xff] %v3700_v39  ;;  %v464_v61 = vmul.f32 %v462_v58, %v3718_v25  ;;  %v3768_v33 = vmul.f32 %v926_v2, %v3680_v37  ;;  %v504_v58 = vmul.f32 %v502_v52, %v3722_v24 }
 0x116   : > { %6713 = sst [smem:[#allocation145_spill]] %s3582_s11  ;;  %s6726_s23 = sld [smem:[#allocation133_spill]]  ;;  %v6388_v59 = vstv %s6718_s28  ;;  %6770 = vst [vmem:[#allocation168_spill] sm:$0xff] %v3712_v55  ;;  %1525 = vst.msk [vmem:[#allocation3 + $0x8] sm:$0xff] %vm1523_vm2, %v1521_v36  ;;  %v3770_v36 = vld [vmem:[#allocation2 + $0x18] sm:$0xff]  ;;  %v3784_v2 = vmul.f32 %v1024_v4, %v3702_v34  ;;  %v3803_v52 = vmul.f32 %v6390_v11, %v3702_v34  ;;  %v1562_v19 = vmul.f32 %v6408_v13, %v1554_v30 }
 0x117   : > { %6722 = sst [smem:[#allocation149_spill]] %s3598_s0  ;;  %s6727_s15 = sld [smem:[#allocation135_spill]]  ;;  %v6387_v51 = vstv %s6723_s20  ;;  %v3716_v44 = vmul.f32 %v6388_v59, %v957_v1  ;;  %v446_v1 = vmul.f32 %v444_v46, %v3718_v25  ;;  %v3757_v46 = vld [vmem:[#allocation2 + $0x22] sm:$0xff]  ;;  %v416_v59 = vmul.f32 %v414_v57, %v3704_v28  ;;  %6784 = vst [vmem:[#allocation179_spill] sm:$0xff] %v3768_v33  ;;  %6785 = vst [vmem:[#allocation180_spill] sm:$0xff] %v3770_v36 }
 0x118   : > { %6709 = sst [smem:[#allocation143_spill]] %s3574_s24  ;;  %s3606_s17 = sld [smem:[#allocation8 + $0x2f]]  ;;  %v3736_v63 = vmul.f32 %v6387_v51, %v395_v42  ;;  %v3755_v42 = vld [vmem:[#allocation2 + $0x21] sm:$0xff]  ;;  %6781 = vst [vmem:[#allocation178_spill] sm:$0xff] %v3757_v46  ;;  %v338_v51 = vpop.permute.xlu1 %337  ;;  %6786 = vst [vmem:[#allocation181_spill] sm:$0xff] %v3774_v26  ;;  %v3823_v11 = vld [vmem:[#allocation2 + $0x69] sm:$0xff]  ;;  %v1574_v10 = vmul.f32 %v6407_v14, %v1554_v30 }
 0x119   : > { %6714 = sst [smem:[#allocation146_spill]] %s3584_s26  ;;  %s3590_s24 = sld [smem:[#allocation8 + $0x3b]]  ;;  %6771 = vst [vmem:[#allocation169_spill] sm:$0xff] %v3716_v44  ;;  %6780 = vst [vmem:[#allocation177_spill] sm:$0xff] %v3755_v42  ;;  %v448_v57 = vadd.f32 %v446_v1, %v404_v38  ;;  %v3798_v38 = vmul.f32 %v984_v12, %v3682_v35  ;;  %v1533_v4 = vld [vmem:[#allocation2 + $0x28] sm:$0x3]  ;;  %v619_v12 = vmul.f32 %v618_v62, %v3774_v26 }
 0x11a   : > { %6720 = sst [smem:[#allocation148_spill]] %s3592_s18  ;;  %s3608_s21 = sld [smem:[#allocation8 + $0x32]]  ;;  %6776 = vst [vmem:[#allocation174_spill] sm:$0xff] %v3736_v63  ;;  %342 = vst.msk [vmem:[#allocation2 + $0x39] sm:$0xff] %vm308_vm1, %v338_v51  ;;  %v505_v51 = vadd.f32 %v503_v47, %v447_v8  ;;  %v3805_v1 = vld [vmem:[#allocation2 + $0x1a] sm:$0xff]  ;;  %v3813_v8 = vmul.f32 %v618_v62, %v3755_v42  ;;  %v3818_v47 = vmul.f32 %v6392_v3, %v3757_v46  ;;  %v3831_v3 = vld [vmem:[#allocation2 + $0x68] sm:$0xff] }
 0x11b   : > { %6724 = sst [smem:[#allocation150_spill]] %s3600_s16  ;;  %s3616_s19 = sld [smem:[#allocation8 + $0x35]]  ;;  %341 = vst.msk [vmem:[#allocation2 + $0x31] sm:$0xff] %vm308_vm1, %v336_v54  ;;  %6789 = vst [vmem:[#allocation182_spill] sm:$0xff] %v3784_v2  ;;  %v561_v54 = vmul.f32 %v560_v56, %v3770_v36  ;;  %v1530_v6 = vld [vmem:[#allocation2 + $0x70] sm:$0x3]  ;;  %v506_v17 = vadd.f32 %v504_v58, %v448_v57  ;;  %v3829_v7 = vadd.f32 %v464_v61, %v416_v59 }
 0x11c   : > { %s3618_s22 = sld [smem:[#allocation8 + $0x41]]  ;;  %s3624_s12 = sld [smem:[#allocation8 + $0x44]]  ;;  %1527 = vst.msk [vmem:[#allocation3 + $0x10] sm:$0x3] %vm1526_vm3, %v1522_v53  ;;  %6791 = vst [vmem:[#allocation183_spill] sm:$0xff] %v3798_v38  ;;  %v562_v53 = vmul.f32 %v560_v56, %v3772_v0  ;;  %v3825_v21 = vld [vmem:[#allocation2 + $0x60] sm:$0xff]  ;;  %v386_v20 = vpop.permute.xlu1 %385  ;;  %v384_v56 = vpop.permute.xlu0 %383  ;;  %v1536_v15 = vsub.f32 %v1530_v6, %v1533_v4  ;;  %v3841_v57 = vmul.f32 %v6406_v18, %v1554_v30 }
 0x11d   : > { %s3630_s20 = sld [smem:[#allocation8 + $0x47]]  ;;  %s3632_s8 = sld [smem:[#allocation8 + $0x59]]  ;;  %6792 = vst [vmem:[#allocation184_spill] sm:$0xff] %v3803_v52  ;;  %6793 = vst [vmem:[#allocation185_spill] sm:$0xff] %v3805_v1  ;;  %v563_v16 = vadd.f32 %v561_v54, %v505_v51  ;;  %v1534_v62 = vsub.f32 %v3825_v21, %v3770_v36  ;;  %v3843_v59 = vld [vmem:[#allocation2 + $0x6a] sm:$0xff]  ;;  %v3845_v61 = vld [vmem:[#allocation2 + $0x61] sm:$0xff]  ;;  %v1535_v6 = vsub.f32 %v3831_v3, %v3772_v0 }
 0x11e   : > { %6728 = sst [smem:[#allocation133_spill]] %s3606_s17  ;;  %s6751_s26 = sld [smem:[#allocation115_spill]]  ;;  %6796 = vst [vmem:[#allocation186_spill] sm:$0xff] %v3823_v11  ;;  %6797 = vst [vmem:[#allocation187_spill] sm:$0xff] %v3825_v21  ;;  %v3855_v58 = vmul.f32 %v6405_v43, %v1554_v30  ;;  %v3859_v51 = vmul.f32 %v6402_v50, %v1554_v30  ;;  %v3863_v54 = vld [vmem:[#allocation3 + $0x8] sm:$0xff] }
 0x11f   : > { %6719 = sst [smem:[#allocation147_spill]] %s3590_s24  ;;  %s6752_s16 = sld [smem:[#allocation118_spill]]  ;;  %6801 = vst [vmem:[#allocation188_spill] sm:$0xff] %v3831_v3  ;;  %390 = vst.msk [vmem:[#allocation2 + $0x81] sm:$0xff] %vm308_vm1, %v386_v20  ;;  %v3851_v20 = vmul.f32 %v6401_v22, %v1554_v30  ;;  %v3865_v4 = vld [vmem:[#allocation3 + $0x1] sm:$0xff]  ;;  %v3869_v22 = vadd.f32 %v562_v53, %v506_v17  ;;  %v3874_v30 = vmul.f32 %v1082_v5, %v3831_v3 }
 0x120   : > { %6729 = sst [smem:[#allocation135_spill]] %s3608_s21  ;;  %s6758_s0 = sld [smem:[#allocation125_spill]]  ;;  %389 = vst.msk [vmem:[#allocation2 + $0x79] sm:$0xff] %vm308_vm1, %v384_v56  ;;  %6804 = vst [vmem:[#allocation189_spill] sm:$0xff] %v3843_v59  ;;  %v3867_v56 = vld [vmem:[#allocation3 + $0x2] sm:$0xff]  ;;  %v3895_v13 = vadd.f32 %v619_v12, %v563_v16 }
 0x121   : > { %6732 = sst [smem:[#allocation151_spill]] %s3616_s19  ;;  %s6788_s6 = sld [smem:[#allocation84_spill]]  ;;  %6806 = vst [vmem:[#allocation190_spill] sm:$0xff] %v3845_v61  ;;  %1540 = vst.msk [vmem:[#allocation3 + $0x28] sm:$0x3] %vm1526_vm3, %v1536_v15 }
 0x122   : > { %6733 = sst [smem:[#allocation152_spill]] %s3618_s22  ;;  %s6756_s22 = sld [smem:[#allocation119_spill]]  ;;  %1538 = vst.msk [vmem:[#allocation3 + $0x18] sm:$0xff] %vm1523_vm2, %v1534_v62  ;;  %6810 = vst [vmem:[#allocation191_spill] sm:$0xff] %v3874_v30  ;;  %v1546_v12 = vld [vmem:[#allocation2 + $0x40] sm:$0x3] }
 0x123   : > { %6734 = sst [smem:[#allocation153_spill]] %s3624_s12  ;;  %s6779_s4 = sld [smem:[#allocation87_spill]]  ;;  %1539 = vst.msk [vmem:[#allocation3 + $0x20] sm:$0xff] %vm1523_vm2, %v1535_v6  ;;  %v3916_v31 = vld [vmem:[#allocation3 + $0x9] sm:$0xff]  ;;  %v3927_v48 = vld [vmem:[#allocation2 + $0x30] sm:$0xff] }
 0x124   : > { %6739 = sst [smem:[#allocation154_spill]] %s3630_s20  ;;  %s6783_s29 = sld [smem:[#allocation103_spill]] }
 0x125   : > { %6741 = sst [smem:[#allocation155_spill]] %s3632_s8  ;;  %s6764_s8 = sld [smem:[#allocation129_spill]] }
 0x126   : > { %s6790_s18 = sld [smem:[#allocation30_spill]]  ;;  %s6794_s20 = sld [smem:[#allocation31_spill]] }
 0x127   : > { %s6795_s9 = sld [smem:[#allocation33_spill]]  ;;  %s6798_s12 = sld [smem:[#allocation39_spill]]  ;;  %v6814_v62 = vstv %s6788_s6  ;;  %v3947_v33 = vld [vmem:[#allocation2 + $0x78] sm:$0xff]  ;;  %v3949_v25 = vld [vmem:[#allocation2 + $0x80] sm:$0xff] }
 0x128   : > { %s6799_s24 = sld [smem:[#allocation60_spill]]  ;;  %s6800_s3 = sld [smem:[#allocation65_spill]]  ;;  %v3884_v43 = vmul.f32 %v6814_v62, %v3805_v1 }
 0x129   : > { %s6803_s19 = sld [smem:[#allocation89_spill]]  ;;  %s6805_s21 = sld [smem:[#allocation32_spill]] }
 0x12a   : > { %s6807_s17 = sld [smem:[#allocation98_spill]]  ;;  %s6809_s25 = sld [smem:[#allocation35_spill]]  ;;  %v3995_v1 = vld [vmem:[#allocation3 + $0x22] sm:$0xff]  ;;  %v3997_v26 = vld [vmem:[#allocation3 + $0x19] sm:$0xff] }
 0x12b   : > { %s6808_s11 = sld [smem:[#allocation34_spill]]  ;;  %s6812_s14 = sld [smem:[#allocation36_spill]]  ;;  %v4003_v45 = vld [vmem:[#allocation3 + $0x1a] sm:$0xff] }
 0x12c   : > { %v6819_v62 = vstv %s6790_s18  ;;  %s6820_s6 = sld [smem:[#allocation37_spill]]  ;;  %s6822_s28 = sld [smem:[#allocation38_spill]]  ;;  %v6826_v39 = vstv %s6794_s20 }
 0x12d   : > { %v1563_v63 = vmul.f32 %v6819_v62, %v3863_v54  ;;  %v1575_v62 = vmul.f32 %v6826_v39, %v3863_v54  ;;  %s6828_s18 = sld [smem:[#allocation47_spill]]  ;;  %v6829_v34 = vstv %s6795_s9  ;;  %s6848_s20 = sld [smem:[#allocation44_spill]] }
 0x12e   : > { %s6855_s9 = sld [smem:[#allocation48_spill]]  ;;  %s6859_s30 = sld [smem:[#allocation50_spill]] }
 0x12f   : > { %v6811_v50 = vstv %s6803_s19  ;;  %v6815_v17 = vstv %s6805_s21  ;;  %v6830_v35 = vstv %s6805_s21  ;;  %s6838_s21 = sld [smem:[#allocation43_spill]] }
 0x130   : > { %v3879_v15 = vmul.f32 %v6811_v50, %v3823_v11  ;;  %v1602_v53 = vmul.f32 %v6815_v17, %v3865_v4  ;;  %v6816_v18 = vstv %s6807_s17  ;;  %v3900_v50 = vmul.f32 %v1082_v5, %v3825_v21 }
 0x131   : > { %v3893_v14 = vmul.f32 %v6816_v18, %v3843_v59  ;;  %v6821_v6 = vstv %s6808_s11  ;;  %v6823_v44 = vstv %s6809_s25  ;;  %v6824_v18 = vstv %s6803_s19  ;;  %s6837_s19 = sld [smem:[#allocation40_spill]] }
 0x132   : > { %6813 = vst [vmem:[#allocation192_spill] sm:$0xff] %v3879_v15  ;;  %6818 = vst [vmem:[#allocation194_spill] sm:$0xff] %v3900_v50  ;;  %v1658_v17 = vmul.f32 %v6821_v6, %v3867_v56  ;;  %v1620_v55 = vmul.f32 %v6823_v44, %v3865_v4  ;;  %v3914_v16 = vmul.f32 %v6824_v18, %v3845_v61  ;;  %v6827_v9 = vstv %s6812_s14  ;;  %v3929_v18 = vld [vmem:[#allocation2 + $0x38] sm:$0xff]  ;;  %v3971_v50 = vld [vmem:[#allocation3 + $0x18] sm:$0xff] }
 0x133   : > { %6817 = vst [vmem:[#allocation193_spill] sm:$0xff] %v3893_v14  ;;  %v1604_v5 = vadd.f32 %v1602_v53, %v1562_v19  ;;  %v1676_v6 = vmul.f32 %v6827_v9, %v3867_v56  ;;  %v1587_v44 = vmul.f32 %v6829_v34, %v3863_v54  ;;  %v1603_v37 = vmul.f32 %v6830_v35, %v3916_v31  ;;  %v3934_v19 = vld [vmem:[#allocation3 + $0xa] sm:$0xff]  ;;  %v1543_v34 = vld [vmem:[#allocation2 + $0x88] sm:$0x3] }
 0x134   : > { %6825 = vst [vmem:[#allocation195_spill] sm:$0xff] %v3914_v16  ;;  %v6831_v53 = vstv %s6809_s25  ;;  %v6832_v52 = vstv %s6820_s6  ;;  %v6833_v9 = vstv %s6822_s28  ;;  %v1622_v35 = vadd.f32 %v1620_v55, %v1574_v10  ;;  %s6841_s25 = sld [smem:[#allocation41_spill]]  ;;  %s6864_s6 = sld [smem:[#allocation53_spill]] }
 0x135   : > { %v1621_v39 = vmul.f32 %v6831_v53, %v3916_v31  ;;  %v1638_v38 = vmul.f32 %v6832_v52, %v3865_v4  ;;  %v3945_v24 = vmul.f32 %v6833_v9, %v3867_v56  ;;  %v6834_v28 = vmov %v6832_v52 }
 0x136   : > { %v1639_v61 = vmul.f32 %v6834_v28, %v3916_v31  ;;  %v6835_v16 = vstv %s6798_s12  ;;  %v6836_v52 = vstv %s6828_s18  ;;  %v1549_v9 = vsub.f32 %v1543_v34, %v1546_v12  ;;  %v3979_v34 = vld [vmem:[#allocation3 + $0x20] sm:$0xff]  ;;  %s6857_s12 = sld [smem:[#allocation49_spill]] }
 0x137   : > { %v3957_v53 = vmul.f32 %v6835_v16, %v3863_v54  ;;  %v3962_v21 = vmul.f32 %v6836_v52, %v3865_v4  ;;  %v1547_v14 = vsub.f32 %v3947_v33, %v3927_v48  ;;  %v1548_v10 = vsub.f32 %v3949_v25, %v3929_v18 }
 0x138   : > { %v1605_v55 = vadd.f32 %v1603_v37, %v1563_v63  ;;  %v6839_v28 = vstv %s6808_s11  ;;  %v1660_v32 = vadd.f32 %v1658_v17, %v1604_v5  ;;  %v1623_v15 = vadd.f32 %v1621_v39, %v1575_v62  ;;  %1553 = vst.msk [vmem:[#allocation3 + $0x40] sm:$0x3] %vm1526_vm3, %v1549_v9  ;;  %v3981_v37 = vld [vmem:[#allocation3 + $0x21] sm:$0xff]  ;;  %s6845_s11 = sld [smem:[#allocation46_spill]] }
 0x139   : > { %v1659_v16 = vmul.f32 %v6839_v28, %v3934_v19  ;;  %v6840_v52 = vstv %s6812_s14  ;;  %1551 = vst.msk [vmem:[#allocation3 + $0x30] sm:$0xff] %vm1523_vm2, %v1547_v14  ;;  %1552 = vst.msk [vmem:[#allocation3 + $0x38] sm:$0xff] %vm1523_vm2, %v1548_v10  ;;  %v6842_v63 = vstv %s6837_s19  ;;  %v1678_v5 = vadd.f32 %v1676_v6, %v1622_v35  ;;  %s6846_s14 = sld [smem:[#allocation42_spill]]  ;;  %s6865_s19 = sld [smem:[#allocation51_spill]] }
 0x13a   : > { %v1677_v12 = vmul.f32 %v6840_v52, %v3934_v19  ;;  %v1714_v17 = vmul.f32 %v6842_v63, %v3971_v50  ;;  %v6843_v62 = vstv %s6838_s21  ;;  %v6844_v9 = vstv %s6822_s28  ;;  %s6850_s28 = sld [smem:[#allocation45_spill]] }
 0x13b   : > { %v1732_v39 = vmul.f32 %v6843_v62, %v3971_v50  ;;  %v1695_v28 = vmul.f32 %v6844_v9, %v3934_v19  ;;  %v1661_v14 = vadd.f32 %v1659_v16, %v1605_v55  ;;  %v6847_v10 = vmov %v6842_v63 }
 0x13c   : > { %v1715_v52 = vmul.f32 %v6847_v10, %v3979_v34  ;;  %v1641_v63 = vadd.f32 %v1639_v61, %v1587_v44  ;;  %v1640_v6 = vadd.f32 %v1638_v38, %v3841_v57  ;;  %v1716_v35 = vadd.f32 %v1714_v17, %v1660_v32 }
 0x13d   : > { %v6849_v62 = vstv %s6841_s25  ;;  %v1679_v55 = vadd.f32 %v1677_v12, %v1623_v15  ;;  %v6851_v16 = vstv %s6838_s21  ;;  %v1734_v30 = vadd.f32 %v1732_v39, %v1678_v5  ;;  %s6866_s21 = sld [smem:[#allocation52_spill]]  ;;  %s6870_s25 = sld [smem:[#allocation54_spill]] }
 0x13e   : > { %v1770_v9 = vmul.f32 %v6849_v62, %v3997_v26  ;;  %v1733_v10 = vmul.f32 %v6851_v16, %v3979_v34  ;;  %v1717_v27 = vadd.f32 %v1715_v52, %v1661_v14  ;;  %v6852_v61 = vmov %v6849_v62 }
 0x13f   : > { %v1771_v44 = vmul.f32 %v6852_v61, %v3981_v37  ;;  %v6853_v38 = vstv %s6845_s11  ;;  %v6854_v57 = vstv %s6846_s14  ;;  %v6856_v15 = vstv %s6848_s20  ;;  %s6872_s11 = sld [smem:[#allocation56_spill]]  ;;  %s6879_s14 = sld [smem:[#allocation55_spill]] }
 0x140   : > { %v1750_v32 = vmul.f32 %v6853_v38, %v3971_v50  ;;  %v1827_v17 = vmul.f32 %v6854_v57, %v3995_v1  ;;  %v1772_v62 = vadd.f32 %v1770_v9, %v1716_v35  ;;  %v1735_v59 = vadd.f32 %v1733_v10, %v1679_v55  ;;  %v4050_v40 = vld [vmem:[#allocation3 + $0x30] sm:$0xff]  ;;  %s6881_s20 = sld [smem:[#allocation57_spill]] }
 0x141   : > { %v1789_v12 = vmul.f32 %v6856_v15, %v3981_v37  ;;  %v1773_v11 = vadd.f32 %v1771_v44, %v1717_v27  ;;  %v6858_v14 = vmov %v6854_v57  ;;  %v6860_v5 = vmov %v6856_v15  ;;  %v4035_v27 = vld [vmem:[#allocation3 + $0x38] sm:$0xff] }
 0x142   : > { %v1826_v52 = vmul.f32 %v6858_v14, %v4003_v45  ;;  %v1788_v39 = vmul.f32 %v6860_v5, %v3997_v26  ;;  %v6861_v16 = vmov %v6853_v38  ;;  %v6862_v35 = vstv %s6850_s28  ;;  %v4037_v44 = vld [vmem:[#allocation3 + $0x39] sm:$0xff]  ;;  %v4052_v36 = vld [vmem:[#allocation3 + $0x31] sm:$0xff]  ;;  %s6885_s28 = sld [smem:[#allocation58_spill]] }
 0x143   : > { %v1751_v61 = vmul.f32 %v6861_v16, %v3979_v34  ;;  %v1791_v38 = vadd.f32 %v1789_v12, %v1735_v59  ;;  %v1845_v9 = vmul.f32 %v6862_v35, %v3995_v1  ;;  %v6863_v55 = vmov %v6862_v35  ;;  %v4039_v15 = vld [vmem:[#allocation3 + $0x3a] sm:$0xff]  ;;  %v4073_v3 = vld [vmem:[#allocation3 + $0x32] sm:$0xff] }
 0x144   : > { %v1844_v10 = vmul.f32 %v6863_v55, %v4003_v45  ;;  %v1697_v57 = vadd.f32 %v1695_v28, %v1641_v63  ;;  %v1828_v14 = vadd.f32 %v1826_v52, %v1772_v62  ;;  %v1790_v59 = vadd.f32 %v1788_v39, %v1734_v30 }
 0x145   : > { %v6867_v12 = vstv %s6855_s9  ;;  %v6868_v16 = vstv %s6857_s12  ;;  %v1829_v28 = vadd.f32 %v1827_v17, %v1773_v11  ;;  %v6869_v63 = vstv %s6859_s30  ;;  %s6888_s30 = sld [smem:[#allocation59_spill]] }
 0x146   : > { %v1807_v5 = vmul.f32 %v6867_v12, %v3981_v37  ;;  %v1863_v35 = vmul.f32 %v6868_v16, %v3995_v1  ;;  %v1883_v55 = vmul.f32 %v6869_v63, %v4035_v27  ;;  %v1753_v29 = vadd.f32 %v1751_v61, %v1697_v57 }
 0x147   : > { %v1696_v30 = vadd.f32 %v3945_v24, %v1640_v6  ;;  %v6871_v62 = vmov %v6869_v63  ;;  %v1847_v39 = vadd.f32 %v1845_v9, %v1791_v38  ;;  %v6873_v12 = vstv %s6864_s6 }
 0x148   : > { %v1882_v52 = vmul.f32 %v6871_v62, %v4050_v40  ;;  %v1901_v11 = vmul.f32 %v6873_v12, %v4035_v27  ;;  %v6874_v17 = vstv %s6855_s9  ;;  %v1885_v63 = vadd.f32 %v1883_v55, %v1829_v28  ;;  %s2999_s9 = smov 127  }
 0x149   : > { %v1806_v16 = vmul.f32 %v6874_v17, %v3997_v26  ;;  %v6875_v2 = vstv %s6865_s19  ;;  %v6876_v57 = vstv %s6866_s21  ;;  %v1846_v12 = vadd.f32 %v1844_v10, %v1790_v59  ;;  %s6893_s19 = sld [smem:[#allocation67_spill]] }
 0x14a   : > { %v1939_v61 = vmul.f32 %v6875_v2, %v4037_v44  ;;  %v1995_v24 = vmul.f32 %v6876_v57, %v4039_v15  ;;  %v6877_v6 = vmov %v6875_v2  ;;  %v1884_v38 = vadd.f32 %v1882_v52, %v1828_v14 }
 0x14b   : > { %v1938_v62 = vmul.f32 %v6877_v6, %v4052_v36  ;;  %v1903_v9 = vadd.f32 %v1901_v11, %v1847_v39  ;;  %v6878_v41 = vstv %s6864_s6  ;;  %v6880_v55 = vstv %s6870_s25  ;;  %s6889_s6 = sld [smem:[#allocation66_spill]]  ;;  %s6907_s25 = sld [smem:[#allocation62_spill]] }
 0x14c   : > { %v1900_v17 = vmul.f32 %v6878_v41, %v4050_v40  ;;  %v1941_v28 = vadd.f32 %v1939_v61, %v1885_v63  ;;  %v1957_v2 = vmul.f32 %v6880_v55, %v4037_v44  ;;  %v1809_v49 = vadd.f32 %v1807_v5, %v1753_v29  ;;  %v4090_v5 = vld [vmem:[#allocation2 + $0x62] sm:$0xff] }
 0x14d   : > { %v6882_v57 = vstv %s6872_s11  ;;  %v1940_v42 = vadd.f32 %v1938_v62, %v1884_v38  ;;  %v6883_v6 = vstv %s6866_s21  ;;  %v6884_v10 = vmov %v6880_v55  ;;  %s6899_s21 = sld [smem:[#allocation80_spill]] }
 0x14e   : > { %v1919_v46 = vmul.f32 %v6882_v57, %v4035_v27  ;;  %v1994_v60 = vmul.f32 %v6883_v6, %v4073_v3  ;;  %v1902_v14 = vadd.f32 %v1900_v17, %v1846_v12  ;;  %v1956_v59 = vmul.f32 %v6884_v10, %v4052_v36  ;;  %s6913_s11 = sld [smem:[#allocation64_spill]] }
 0x14f   : > { %v1997_v41 = vadd.f32 %v1995_v24, %v1941_v28  ;;  %v1959_v52 = vadd.f32 %v1957_v2, %v1903_v9  ;;  %v1865_v39 = vadd.f32 %v1863_v35, %v1809_v49  ;;  %v1752_v29 = vadd.f32 %v1750_v32, %v1696_v30 }
 0x150   : > { %v1996_v11 = vadd.f32 %v1994_v60, %v1940_v42  ;;  %v6886_v63 = vstv %s6879_s14  ;;  %v1958_v62 = vadd.f32 %v1956_v59, %v1902_v14  ;;  %v6887_v38 = vstv %s6881_s20  ;;  %s6914_s14 = sld [smem:[#allocation78_spill]]  ;;  %s6916_s20 = sld [smem:[#allocation79_spill]] }
 0x151   : > { %v2013_v61 = vmul.f32 %v6886_v63, %v4039_v15  ;;  %v1975_v12 = vmul.f32 %v6887_v38, %v4037_v44  ;;  %2056 = vrot.lane.b32.xlu1 %v1997_v41, %s2999_s9  ;;  %v1921_v24 = vadd.f32 %v1919_v46, %v1865_v39  ;;  %v1808_v49 = vadd.f32 %v1806_v16, %v1752_v29 }
 0x152   : > { %v6890_v32 = vstv %s6857_s12  ;;  %v6891_v60 = vmov %v6882_v57  ;;  %2054 = vrot.lane.b32.xlu0 %v1996_v11, %s2999_s9  ;;  %v6892_v30 = vmov %v6886_v63  ;;  %v6894_v17 = vstv %s6885_s28  ;;  %s6897_s12 = sld [smem:[#allocation68_spill]]  ;;  %s6920_s28 = sld [smem:[#allocation83_spill]] }
 0x153   : > { %v1862_v35 = vmul.f32 %v6890_v32, %v4003_v45  ;;  %v1918_v42 = vmul.f32 %v6891_v60, %v4050_v40  ;;  %v2012_v9 = vmul.f32 %v6892_v30, %v4073_v3  ;;  %v2031_v28 = vmul.f32 %v6894_v17, %v4039_v15 }
 0x154   : > { %v6895_v46 = vstv %s6828_s18  ;;  %v6896_v16 = vstv %s6807_s17  ;;  %v2015_v57 = vadd.f32 %v2013_v61, %v1959_v52  ;;  %v1977_v6 = vadd.f32 %v1975_v12, %v1921_v24  ;;  %s6901_s18 = sld [smem:[#allocation81_spill]]  ;;  %s6903_s17 = sld [smem:[#allocation82_spill]] }
 0x155   : > { %v1609_v55 = vmul.f32 %v6895_v46, %v3916_v31  ;;  %v4118_v2 = vmul.f32 %v6896_v16, %v4090_v5  ;;  %v1864_v14 = vadd.f32 %v1862_v35, %v1808_v49  ;;  %v6898_v10 = vmov %v6887_v38 }
 0x156   : > { %v1974_v59 = vmul.f32 %v6898_v10, %v4052_v36  ;;  %v2014_v41 = vadd.f32 %v2012_v9, %v1958_v62  ;;  %v6900_v29 = vstv %s6888_s30  ;;  %v6902_v63 = vstv %s6889_s6  ;;  %2084 = vrot.lane.b32.xlu1 %v2015_v57, %s2999_s9  ;;  %s6921_s30 = sld [smem:[#allocation88_spill]]  ;;  %s6928_s6 = sld [smem:[#allocation91_spill]] }
 0x157   : > { %v1611_v39 = vadd.f32 %v1609_v55, %v3957_v53  ;;  %v1665_v11 = vmul.f32 %v6900_v29, %v3934_v19  ;;  %v1721_v38 = vmul.f32 %v6902_v63, %v3979_v34  ;;  %v1920_v52 = vadd.f32 %v1918_v42, %v1864_v14 }
 0x158   : > { %v6904_v61 = vmov %v6894_v17  ;;  %v6905_v62 = vstv %s6893_s19  ;;  %v1610_v53 = vadd.f32 %v3962_v21, %v3851_v20  ;;  %2082 = vrot.lane.b32.xlu0 %v2014_v41, %s2999_s9  ;;  %v6906_v32 = vstv %s6897_s12  ;;  %s6931_s19 = sld [smem:[#allocation74_spill]]  ;;  %s6935_s12 = sld [smem:[#allocation76_spill]] }
 0x159   : > { %v2030_v12 = vmul.f32 %v6904_v61, %v4073_v3  ;;  %v1777_v24 = vmul.f32 %v6905_v62, %v3981_v37  ;;  %v1667_v49 = vadd.f32 %v1665_v11, %v1611_v39  ;;  %v1833_v35 = vmul.f32 %v6906_v32, %v3995_v1 }
 0x15a   : > { %v6908_v60 = vmov %v6900_v29  ;;  %v6909_v30 = vmov %v6902_v63  ;;  %v2033_v17 = vadd.f32 %v2031_v28, %v1977_v6  ;;  %v1976_v46 = vadd.f32 %v1974_v59, %v1920_v52 }
 0x15b   : > { %v1664_v42 = vmul.f32 %v6908_v60, %v3867_v56  ;;  %v1720_v9 = vmul.f32 %v6909_v30, %v3971_v50  ;;  %v6910_v21 = vstv %s6899_s21  ;;  %v6911_v55 = vstv %s6901_s18  ;;  %s6936_s21 = sld [smem:[#allocation92_spill]]  ;;  %s6946_s18 = sld [smem:[#allocation94_spill]] }
 0x15c   : > { %v1889_v20 = vmul.f32 %v6910_v21, %v4035_v27  ;;  %v1945_v16 = vmul.f32 %v6911_v55, %v4037_v44  ;;  %v1723_v57 = vadd.f32 %v1721_v38, %v1667_v49  ;;  %v6912_v14 = vstv %s6903_s17  ;;  %2112 = vrot.lane.b32.xlu1 %v2033_v17, %s2999_s9  ;;  %s6949_s17 = sld [smem:[#allocation104_spill]] }
 0x15d   : > { %v2001_v10 = vmul.f32 %v6912_v14, %v4039_v15  ;;  %v1666_v41 = vadd.f32 %v1664_v42, %v1610_v53  ;;  %v6915_v39 = vstv %s6799_s24  ;;  %v2032_v28 = vadd.f32 %v2030_v12, %v1976_v46  ;;  %s6926_s24 = sld [smem:[#allocation90_spill]] }
 0x15e   : > { %v1579_v29 = vmul.f32 %v6915_v39, %v3863_v54  ;;  %v6917_v6 = vmov %v6905_v62  ;;  %v6918_v11 = vmov %v6906_v32  ;;  %v6919_v38 = vstv %s6907_s25  ;;  %s6951_s25 = sld [smem:[#allocation106_spill]] }
 0x15f   : > { %v1776_v59 = vmul.f32 %v6917_v6, %v3997_v26  ;;  %v1832_v63 = vmul.f32 %v6918_v11, %v4003_v45  ;;  %v1627_v52 = vmul.f32 %v6919_v38, %v3916_v31  ;;  %v1779_v61 = vadd.f32 %v1777_v24, %v1723_v57  ;;  %2110 = vrot.lane.b32.xlu0 %v2032_v28, %s2999_s9 }
 0x160   : > { %v1722_v62 = vadd.f32 %v1720_v9, %v1666_v41  ;;  %v6922_v53 = vmov %v6910_v21  ;;  %v6923_v12 = vmov %v6911_v55  ;;  %v6924_v60 = vmov %v6912_v14 }
 0x161   : > { %v1888_v49 = vmul.f32 %v6922_v53, %v4050_v40  ;;  %v1944_v32 = vmul.f32 %v6923_v12, %v4052_v36  ;;  %v2000_v42 = vmul.f32 %v6924_v60, %v4073_v3  ;;  %v1629_v30 = vadd.f32 %v1627_v52, %v1579_v29 }
 0x162   : > { %v6925_v17 = vstv %s6913_s11  ;;  %v6927_v24 = vstv %s6914_s14  ;;  %v1835_v21 = vadd.f32 %v1833_v35, %v1779_v61  ;;  %v1778_v55 = vadd.f32 %v1776_v59, %v1722_v62  ;;  %s3000_s11 = smov 126   ;;  %s6953_s14 = sld [smem:[#allocation107_spill]] }
 0x163   : > { %v1683_v46 = vmul.f32 %v6925_v17, %v3934_v19  ;;  %v1739_v9 = vmul.f32 %v6927_v24, %v3979_v34  ;;  %v6929_v57 = vstv %s6916_s20  ;;  %v6930_v41 = vmov %v6919_v38 }
 0x164   : > { %v1795_v14 = vmul.f32 %v6929_v57, %v3981_v37  ;;  %v1626_v39 = vmul.f32 %v6930_v41, %v3865_v4  ;;  %v6932_v29 = vstv %s6920_s28  ;;  %v6933_v11 = vstv %s6921_s30 }
 0x165   : > { %v1685_v28 = vadd.f32 %v1683_v46, %v1629_v30  ;;  %v1851_v6 = vmul.f32 %v6932_v29, %v3995_v1  ;;  %v1907_v38 = vmul.f32 %v6933_v11, %v4035_v27  ;;  %v6934_v52 = vmov %v6925_v17 }
 0x166   : > { %v1682_v35 = vmul.f32 %v6934_v52, %v3867_v56  ;;  %v1891_v59 = vadd.f32 %v1889_v20, %v1835_v21  ;;  %v1834_v61 = vadd.f32 %v1832_v63, %v1778_v55  ;;  %v1628_v62 = vadd.f32 %v1626_v39, %v3855_v58 }
 0x167   : > { %v6937_v53 = vmov %v6927_v24  ;;  %v1741_v60 = vadd.f32 %v1739_v9, %v1685_v28  ;;  %v6938_v30 = vstv %s6926_s24  ;;  %v6939_v46 = vstv %s6928_s6  ;;  %s6971_s24 = sld [smem:[#allocation102_spill]]  ;;  %s6972_s6 = sld [smem:[#allocation105_spill]] }
 0x168   : > { %v1738_v12 = vmul.f32 %v6937_v53, %v3971_v50  ;;  %v1963_v17 = vmul.f32 %v6938_v30, %v4037_v44  ;;  %v2019_v24 = vmul.f32 %v6939_v46, %v4039_v15  ;;  %v6940_v57 = vstv %s6800_s3  ;;  %s6945_s3 = sld [smem:[#allocation93_spill]] }
 0x169   : > { %v1591_v41 = vmul.f32 %v6940_v57, %v3863_v54  ;;  %v1947_v20 = vadd.f32 %v1945_v16, %v1891_v59  ;;  %v1890_v63 = vadd.f32 %v1888_v49, %v1834_v61  ;;  %v1684_v21 = vadd.f32 %v1682_v35, %v1628_v62 }
 0x16a   : > { %v6941_v58 = vstv %s6931_s19  ;;  %v1797_v39 = vadd.f32 %v1795_v14, %v1741_v60  ;;  %v6942_v9 = vstv %s6916_s20  ;;  %v6943_v29 = vstv %s6935_s12  ;;  %s6957_s20 = sld [smem:[#allocation95_spill]]  ;;  %s6975_s19 = sld [smem:[#allocation108_spill]] }
 0x16b   : > { %v1645_v55 = vmul.f32 %v6941_v58, %v3916_v31  ;;  %v1794_v28 = vmul.f32 %v6942_v9, %v3997_v26  ;;  %v1701_v11 = vmul.f32 %v6943_v29, %v3934_v19  ;;  %v6944_v52 = vstv %s6936_s21  ;;  %s6977_s12 = sld [smem:[#allocation100_spill]]  ;;  %s6981_s21 = sld [smem:[#allocation109_spill]] }
 0x16c   : > { %v1757_v53 = vmul.f32 %v6944_v52, %v3979_v34  ;;  %v2003_v54 = vadd.f32 %v2001_v10, %v1947_v20  ;;  %v1946_v16 = vadd.f32 %v1944_v32, %v1890_v63  ;;  %v1740_v49 = vadd.f32 %v1738_v12, %v1684_v21 }
 0x16d   : > { %v1647_v35 = vadd.f32 %v1645_v55, %v1591_v41  ;;  %v1853_v59 = vadd.f32 %v1851_v6, %v1797_v39  ;;  %v6947_v31 = vstv %s6920_s28  ;;  %v6948_v61 = vstv %s6921_s30  ;;  %s6965_s28 = sld [smem:[#allocation96_spill]]  ;;  %s6966_s30 = sld [smem:[#allocation97_spill]] }
 0x16e   : > { %v1850_v14 = vmul.f32 %v6947_v31, %v4003_v45  ;;  %v1906_v62 = vmul.f32 %v6948_v61, %v4050_v40  ;;  %v6950_v19 = vmov %v6938_v30  ;;  %2046 = vrot.lane.b32.xlu1 %v2003_v54, %s3000_s11  ;;  %v2002_v34 = vadd.f32 %v2000_v42, %v1946_v16 }
 0x16f   : > { %v1962_v60 = vmul.f32 %v6950_v19, %v4052_v36  ;;  %v1796_v10 = vadd.f32 %v1794_v28, %v1740_v49  ;;  %v6952_v32 = vmov %v6939_v46  ;;  %v1703_v12 = vadd.f32 %v1701_v11, %v1647_v35 }
 0x170   : > { %v2018_v6 = vmul.f32 %v6952_v32, %v4073_v3  ;;  %v1909_v30 = vadd.f32 %v1907_v38, %v1853_v59  ;;  %v6954_v46 = vstv %s6945_s3  ;;  %v6955_v41 = vstv %s6946_s18  ;;  %2044 = vrot.lane.b32.xlu0 %v2002_v34, %s3000_s11  ;;  %v4276_v59 = vld [vmem:[#allocation2 + $0x3a] sm:$0xff]  ;;  %s6983_s3 = sld [smem:[#allocation110_spill]]  ;;  %s6985_s18 = sld [smem:[#allocation114_spill]] }
 0x171   : > { %v1813_v57 = vmul.f32 %v6954_v46, %v3981_v37  ;;  %v1869_v20 = vmul.f32 %v6955_v41, %v3995_v1  ;;  %v6956_v63 = vmov %v6941_v58  ;;  %v1852_v42 = vadd.f32 %v1850_v14, %v1796_v10  ;;  %v4292_v10 = vld [vmem:[#allocation2 + $0x81] sm:$0xff] }
 0x172   : > { %v1644_v21 = vmul.f32 %v6956_v63, %v3865_v4  ;;  %v1759_v58 = vadd.f32 %v1757_v53, %v1703_v12  ;;  %v6958_v55 = vstv %s6949_s17  ;;  %v6959_v38 = vstv %s6951_s25  ;;  %s6986_s17 = sld [smem:[#allocation116_spill]]  ;;  %s6989_s25 = sld [smem:[#allocation117_spill]] }
 0x173   : > { %v1925_v39 = vmul.f32 %v6958_v55, %v4035_v27  ;;  %v1981_v9 = vmul.f32 %v6959_v38, %v4037_v44  ;;  %v1965_v28 = vadd.f32 %v1963_v17, %v1909_v30  ;;  %v6960_v1 = vmov %v6943_v29  ;;  %v4268_v17 = vld [vmem:[#allocation2 + $0x39] sm:$0xff] }
 0x174   : > { %v1646_v37 = vadd.f32 %v1644_v21, %v3859_v51  ;;  %v1700_v29 = vmul.f32 %v6960_v1, %v3867_v56  ;;  %v6961_v4 = vmov %v6944_v52  ;;  %v1908_v52 = vadd.f32 %v1906_v62, %v1852_v42  ;;  %v4325_v1 = vld [vmem:[#allocation2 + $0x79] sm:$0xff] }
 0x175   : > { %v1756_v11 = vmul.f32 %v6961_v4, %v3971_v50  ;;  %v1815_v54 = vadd.f32 %v1813_v57, %v1759_v58  ;;  %v6962_v53 = vstv %s6953_s14  ;;  %v622_v44 = vadd.f32 %v3813_v8, %v3869_v22  ;;  %s6991_s14 = sld [smem:[#allocation111_spill]] }
 0x176   : > { %v2037_v27 = vmul.f32 %v6962_v53, %v4039_v15  ;;  %v2021_v51 = vadd.f32 %v2019_v24, %v1965_v28  ;;  %v1702_v16 = vadd.f32 %v1700_v29, %v1646_v37  ;;  %v6963_v56 = vmov %v6954_v46 }
 0x177   : > { %v1812_v49 = vmul.f32 %v6963_v56, %v3997_v26  ;;  %v6964_v50 = vstv %s6957_s20  ;;  %v1964_v31 = vadd.f32 %v1962_v60, %v1908_v52  ;;  %v1871_v15 = vadd.f32 %v1869_v20, %v1815_v54  ;;  %v4334_v54 = vld [vmem:[#allocation2 + $0x7a] sm:$0xff]  ;;  %s6998_s20 = sld [smem:[#allocation112_spill]] }
 0x178   : > { %v736_v35 = vmul.f32 %v6964_v50, %v3929_v18  ;;  %v6967_v14 = vmov %v6955_v41  ;;  %v680_v22 = vadd.f32 %v3818_v47, %v622_v44  ;;  %2074 = vrot.lane.b32.xlu1 %v2021_v51, %s3000_s11  ;;  %v1758_v8 = vadd.f32 %v1756_v11, %v1702_v16  ;;  %v4302_v41 = vld [vmem:[#allocation2 + $0x82] sm:$0xff] }
 0x179   : > { %v1868_v61 = vmul.f32 %v6967_v14, %v4003_v45  ;;  %v6968_v26 = vmov %v6958_v55  ;;  %v6969_v62 = vmov %v6959_v38  ;;  %v6970_v34 = vmov %v6962_v53  ;;  %v4294_v45 = vld [vmem:[#allocation2 + $0x31] sm:$0xff]  ;;  %v6993_v14 = vld [vmem:[#allocation177_spill] sm:$0xff] }
 0x17a   : > { %v1924_v24 = vmul.f32 %v6968_v26, %v4050_v40  ;;  %v1980_v19 = vmul.f32 %v6969_v62, %v4052_v36  ;;  %v2036_v60 = vmul.f32 %v6970_v34, %v4073_v3  ;;  %v2020_v47 = vadd.f32 %v2018_v6, %v1964_v31  ;;  %v4309_v6 = vld [vmem:[#allocation2 + $0x32] sm:$0xff]  ;;  %v6996_v34 = vld [vmem:[#allocation178_spill] sm:$0xff] }
 0x17b   : > { %v1927_v32 = vadd.f32 %v1925_v39, %v1871_v15  ;;  %v738_v12 = vadd.f32 %v736_v35, %v680_v22  ;;  %v6973_v30 = vstv %s6965_s28  ;;  %v1814_v40 = vadd.f32 %v1812_v49, %v1758_v8  ;;  %v6990_v49 = vld [vmem:[#allocation173_spill] sm:$0xff]  ;;  %s7000_s28 = sld [smem:[#allocation113_spill]] }
 0x17c   : > { %v794_v46 = vmul.f32 %v6973_v30, %v4268_v17  ;;  %v6974_v57 = vstv %s6966_s30  ;;  %v679_v3 = vadd.f32 %v3884_v43, %v3895_v13  ;;  %v6976_v20 = vmov %v6964_v50  ;;  %2072 = vrot.lane.b32.xlu0 %v2020_v47, %s3000_s11  ;;  %s7001_s30 = sld [smem:[#allocation120_spill]] }
 0x17d   : > { %v852_v36 = vmul.f32 %v6974_v57, %v4276_v59  ;;  %v735_v63 = vmul.f32 %v6976_v20, %v3927_v48  ;;  %v1983_v21 = vadd.f32 %v1981_v9, %v1927_v32  ;;  %v6978_v58 = vstv %s6971_s24  ;;  %s7004_s24 = sld [smem:[#allocation121_spill]]  ;;  %v7005_v20 = vld [vmem:[#allocation156_spill] sm:$0xff] }
 0x17e   : > { %v796_v42 = vadd.f32 %v794_v46, %v738_v12  ;;  %v4315_v55 = vmul.f32 %v3949_v25, %v6978_v58  ;;  %v6979_v39 = vstv %s6972_s6  ;;  %v1870_v13 = vadd.f32 %v1868_v61, %v1814_v40  ;;  %v6999_v12 = vld [vmem:[#allocation175_spill] sm:$0xff]  ;;  %s7009_s6 = sld [smem:[#allocation122_spill]] }
 0x17f   : > { %v4320_v38 = vmul.f32 %v6979_v39, %v4292_v10  ;;  %v737_v43 = vadd.f32 %v735_v63, %v679_v3  ;;  %v6980_v28 = vmov %v6973_v30  ;;  %v524_v9 = vadd.f32 %v3789_v23, %v3829_v7 }
 0x180   : > { %v793_v37 = vmul.f32 %v6980_v28, %v4294_v45  ;;  %v2039_v29 = vadd.f32 %v2037_v27, %v1983_v21  ;;  %v854_v4 = vadd.f32 %v852_v36, %v796_v42  ;;  %v6982_v11 = vstv %s6975_s19  ;;  %s7039_s19 = sld [smem:[#allocation124_spill]] }
 0x181   : > { %v4332_v52 = vmul.f32 %v6982_v11, %v4302_v41  ;;  %v6984_v53 = vstv %s6977_s12  ;;  %v1926_v51 = vadd.f32 %v1924_v24, %v1870_v13  ;;  %v6987_v56 = vmov %v6974_v57  ;;  %s7059_s12 = sld [smem:[#allocation131_spill]] }
 0x182   : > { %v580_v44 = vmul.f32 %v6984_v53, %v3772_v0  ;;  %v795_v16 = vadd.f32 %v793_v37, %v737_v43  ;;  %v851_v23 = vmul.f32 %v6987_v56, %v4309_v6  ;;  %v6988_v7 = vmov %v6978_v58  ;;  %2102 = vrot.lane.b32.xlu1 %v2039_v29, %s3000_s11  ;;  %v7007_v58 = vld [vmem:[#allocation188_spill] sm:$0xff]  ;;  %v7010_v43 = vld [vmem:[#allocation182_spill] sm:$0xff] }
 0x183   : > { %v4345_v27 = vmul.f32 %v3947_v33, %v6988_v7  ;;  %v912_v50 = vadd.f32 %v6990_v49, %v854_v4  ;;  %v6992_v35 = vmov %v6979_v39  ;;  %v6994_v61 = vstv %s6981_s21  ;;  %v7017_v7 = vld [vmem:[#allocation189_spill] sm:$0xff] }
 0x184   : > { %v4352_v31 = vmul.f32 %v6992_v35, %v4325_v1  ;;  %v582_v15 = vadd.f32 %v580_v44, %v524_v9  ;;  %v638_v22 = vmul.f32 %v6994_v61, %v6993_v14  ;;  %v1982_v8 = vadd.f32 %v1980_v19, %v1926_v51  ;;  %v7011_v9 = vld [vmem:[#allocation171_spill] sm:$0xff]  ;;  %v7014_v44 = vld [vmem:[#allocation157_spill] sm:$0xff] }
 0x185   : > { %v853_v26 = vadd.f32 %v851_v23, %v795_v16  ;;  %v6995_v24 = vmov %v6982_v11  ;;  %v6997_v47 = vstv %s6983_s3  ;;  %v970_v30 = vadd.f32 %v6999_v12, %v912_v50  ;;  %v7013_v11 = vld [vmem:[#allocation180_spill] sm:$0xff]  ;;  %v7015_v16 = vld [vmem:[#allocation186_spill] sm:$0xff]  ;;  %v7020_v61 = vld [vmem:[#allocation191_spill] sm:$0xff] }
 0x186   : > { %v4360_v62 = vmul.f32 %v6995_v24, %v4334_v54  ;;  %v696_v32 = vmul.f32 %v6997_v47, %v6996_v34  ;;  %v640_v46 = vadd.f32 %v638_v22, %v582_v15  ;;  %v7002_v40 = vstv %s6985_s18  ;;  %v7022_v47 = vld [vmem:[#allocation167_spill] sm:$0xff]  ;;  %v7023_v12 = vld [vmem:[#allocation176_spill] sm:$0xff] }
 0x187   : > { %v754_v57 = vmul.f32 %v7002_v40, %v3929_v18  ;;  %v7003_v36 = vstv %s6986_s17  ;;  %v2038_v3 = vadd.f32 %v2036_v60, %v1982_v8  ;;  %v911_v63 = vadd.f32 %v7005_v20, %v853_v26 }
 0x188   : > { %v812_v19 = vmul.f32 %v7003_v36, %v4268_v17  ;;  %v7006_v21 = vstv %s6989_s25  ;;  %v7008_v39 = vstv %s6991_s14  ;;  %v1028_v28 = vadd.f32 %v7010_v43, %v970_v30  ;;  %v7026_v36 = vld [vmem:[#allocation181_spill] sm:$0xff] }
 0x189   : > { %v870_v42 = vmul.f32 %v7006_v21, %v4276_v59  ;;  %v1102_v13 = vmul.f32 %v7008_v39, %v7007_v58  ;;  %v698_v37 = vadd.f32 %v696_v32, %v640_v46  ;;  %v7012_v29 = vstv %s6779_s4  ;;  %2100 = vrot.lane.b32.xlu0 %v2038_v3, %s3000_s11  ;;  %v7030_v39 = vld [vmem:[#allocation192_spill] sm:$0xff]  ;;  %s7037_s4 = sld [smem:[#allocation123_spill]] }
 0x18a   : > { %v521_v4 = vmul.f32 %v7012_v29, %v7011_v9  ;;  %v579_v60 = vmul.f32 %v6984_v53, %v7013_v11  ;;  %v969_v51 = vadd.f32 %v7014_v44, %v911_v63  ;;  %v7016_v56 = vstv %s6998_s20  ;;  %v7028_v63 = vld [vmem:[#allocation185_spill] sm:$0xff]  ;;  %v7032_v53 = vld [vmem:[#allocation194_spill] sm:$0xff] }
 0x18b   : > { %v1160_v23 = vmul.f32 %v7016_v56, %v7015_v16  ;;  %v7018_v49 = vstv %s7000_s28  ;;  %v7019_v35 = vstv %s7001_s30  ;;  %v1086_v22 = vadd.f32 %v7020_v61, %v1028_v28  ;;  %v7035_v61 = vld [vmem:[#allocation160_spill] sm:$0xff] }
 0x18c   : > { %v4394_v50 = vmul.f32 %v7018_v49, %v7017_v7  ;;  %v4399_v15 = vmul.f32 %v3949_v25, %v7019_v35  ;;  %v756_v8 = vadd.f32 %v754_v57, %v698_v37  ;;  %v7021_v26 = vstv %s7004_s24 }
 0x18d   : > { %v4405_v24 = vmul.f32 %v7021_v26, %v4292_v10  ;;  %v523_v32 = vadd.f32 %v521_v4, %v7022_v47  ;;  %v1027_v30 = vadd.f32 %v7023_v12, %v969_v51  ;;  %v7024_v46 = vstv %s7009_s6  ;;  %v7038_v12 = vld [vmem:[#allocation193_spill] sm:$0xff] }
 0x18e   : > { %v4412_v40 = vmul.f32 %v7024_v46, %v4302_v41  ;;  %v7027_v3 = vstv %s6981_s21  ;;  %v7029_v21 = vstv %s6983_s3  ;;  %v1144_v43 = vadd.f32 %v7030_v39, %v1086_v22  ;;  %s7061_s21 = sld [smem:[#allocation132_spill]]  ;;  %s7065_s3 = sld [smem:[#allocation128_spill]] }
 0x18f   : > { %v637_v20 = vmul.f32 %v7027_v3, %v7026_v36  ;;  %v695_v57 = vmul.f32 %v7029_v21, %v7028_v63  ;;  %v814_v28 = vadd.f32 %v812_v19, %v756_v8  ;;  %v581_v37 = vadd.f32 %v579_v60, %v523_v32  ;;  %v7040_v8 = vld [vmem:[#allocation187_spill] sm:$0xff]  ;;  %v7043_v21 = vld [vmem:[#allocation190_spill] sm:$0xff] }
 0x190   : > { %7025 = vst [vmem:[#allocation173_spill] sm:$0xff] %v4412_v40  ;;  %v7031_v29 = vstv %s6985_s18  ;;  %v1085_v44 = vadd.f32 %v7032_v53, %v1027_v30  ;;  %v7033_v51 = vstv %s6986_s17  ;;  %v7034_v49 = vstv %s6989_s25  ;;  %v7042_v30 = vld [vmem:[#allocation195_spill] sm:$0xff]  ;;  %v7045_v53 = vld [vmem:[#allocation166_spill] sm:$0xff]  ;;  %s7066_s18 = sld [smem:[#allocation134_spill]]  ;;  %s7114_s17 = sld [smem:[#allocation137_spill]] }
 0x191   : > { %v753_v4 = vmul.f32 %v7031_v29, %v3927_v48  ;;  %v811_v56 = vmul.f32 %v7033_v51, %v4294_v45  ;;  %v869_v35 = vmul.f32 %v7034_v49, %v4309_v6  ;;  %v7036_v26 = vstv %s6783_s29  ;;  %s7051_s29 = sld [smem:[#allocation126_spill]]  ;;  %s7117_s25 = sld [smem:[#allocation140_spill]] }
 0x192   : > { %v1043_v47 = vmul.f32 %v7036_v26, %v7035_v61  ;;  %v1202_v19 = vadd.f32 %v7038_v12, %v1144_v43  ;;  %v872_v60 = vadd.f32 %v870_v42, %v814_v28  ;;  %v639_v22 = vadd.f32 %v637_v20, %v581_v37  ;;  %v7047_v26 = vld [vmem:[#allocation170_spill] sm:$0xff]  ;;  %v7049_v43 = vld [vmem:[#allocation179_spill] sm:$0xff] }
 0x193   : > { %v7041_v32 = vstv %s6991_s14  ;;  %v1143_v3 = vadd.f32 %v7042_v30, %v1085_v44  ;;  %v7044_v39 = vstv %s6998_s20  ;;  %v7046_v51 = vstv %s6751_s26  ;;  %s7056_s26 = sld [smem:[#allocation130_spill]]  ;;  %s7126_s14 = sld [smem:[#allocation133_spill]] }
 0x194   : > { %v4438_v46 = vmul.f32 %v7041_v32, %v7040_v8  ;;  %v4444_v29 = vmul.f32 %v7044_v39, %v7043_v21  ;;  %v428_v49 = vmul.f32 %v7046_v51, %v7045_v53  ;;  %v7048_v40 = vstv %s6752_s16  ;;  %v7052_v39 = vld [vmem:[#allocation172_spill] sm:$0xff]  ;;  %s7055_s16 = sld [smem:[#allocation127_spill]] }
 0x195   : > { %v482_v42 = vmul.f32 %v7048_v40, %v7047_v26  ;;  %v1260_v20 = vadd.f32 %v4315_v55, %v1202_v19  ;;  %v930_v28 = vadd.f32 %v7049_v43, %v872_v60  ;;  %v697_v37 = vadd.f32 %v695_v57, %v639_v22  ;;  %v7057_v19 = vld [vmem:[#allocation183_spill] sm:$0xff]  ;;  %s7130_s20 = sld [smem:[#allocation135_spill]] }
 0x196   : > { %v7050_v12 = vstv %s7000_s28  ;;  %v1201_v32 = vadd.f32 %v4118_v2, %v1143_v3  ;;  %v7053_v21 = vstv %s7037_s4  ;;  %v7054_v53 = vstv %s7039_s19  ;;  %s7132_s28 = sld [smem:[#allocation151_spill]] }
 0x197   : > { %v4457_v44 = vmul.f32 %v7050_v12, %v4090_v5  ;;  %v484_v30 = vadd.f32 %v482_v42, %v428_v49  ;;  %v540_v51 = vmul.f32 %v7053_v21, %v7052_v39  ;;  %v598_v40 = vmul.f32 %v7054_v53, %v3772_v0  ;;  %v7063_v42 = vld [vmem:[#allocation184_spill] sm:$0xff] }
 0x198   : > { %v1318_v55 = vadd.f32 %v4320_v38, %v1260_v20  ;;  %v988_v57 = vadd.f32 %v7057_v19, %v930_v28  ;;  %v755_v60 = vadd.f32 %v753_v4, %v697_v37  ;;  %v7058_v22 = vstv %s7001_s30  ;;  %s7152_s30 = sld [smem:[#allocation147_spill]] }
 0x199   : > { %v4471_v43 = vmul.f32 %v3947_v33, %v7058_v22  ;;  %v1259_v2 = vadd.f32 %v4345_v27, %v1201_v32  ;;  %v7060_v3 = vstv %s7004_s24  ;;  %v7062_v53 = vstv %s7009_s6  ;;  %s4743_s24 = sld [smem:[#allocation8 + $0x5c]]  ;;  %s7158_s6 = sld [smem:[#allocation149_spill]] }
 0x19a   : > { %v4477_v21 = vmul.f32 %v7060_v3, %v4325_v1  ;;  %v4482_v49 = vmul.f32 %v7062_v53, %v4334_v54  ;;  %v542_v38 = vadd.f32 %v540_v51, %v484_v30  ;;  %v1376_v4 = vadd.f32 %v4332_v52, %v1318_v55  ;;  %v7071_v3 = vld [vmem:[#allocation158_spill] sm:$0xff] }
 0x19b   : > { %v1046_v20 = vadd.f32 %v7063_v42, %v988_v57  ;;  %v813_v28 = vadd.f32 %v811_v56, %v755_v60  ;;  %v7064_v37 = vstv %s7051_s29  ;;  %v1317_v12 = vadd.f32 %v4352_v31, %v1259_v2  ;;  %v7073_v42 = vld [vmem:[#allocation159_spill] sm:$0xff] }
 0x19c   : > { %v656_v27 = vmul.f32 %v7064_v37, %v6993_v14  ;;  %v600_v32 = vadd.f32 %v598_v40, %v542_v38  ;;  %v7067_v19 = vstv %s7055_s16  ;;  %v7068_v30 = vstv %s7056_s26  ;;  %1435 = vrot.lane.b32.xlu1 %v1376_v4, %s2999_s9  ;;  %v7076_v37 = vld [vmem:[#allocation165_spill] sm:$0xff] }
 0x19d   : > { %v714_v22 = vmul.f32 %v7067_v19, %v6996_v34  ;;  %v772_v51 = vmul.f32 %v7068_v30, %v3929_v18  ;;  %v1104_v52 = vadd.f32 %v1102_v13, %v1046_v20  ;;  %v871_v56 = vadd.f32 %v869_v35, %v813_v28  ;;  %v7075_v20 = vld [vmem:[#allocation161_spill] sm:$0xff] }
 0x19e   : > { %v7069_v55 = vstv %s7059_s12  ;;  %v7070_v60 = vstv %s7061_s21  ;;  %v1375_v40 = vadd.f32 %v4360_v62, %v1317_v12  ;;  %v658_v2 = vadd.f32 %v656_v27, %v600_v32  ;;  %v7079_v27 = vld [vmem:[#allocation163_spill] sm:$0xff]  ;;  %v7080_v12 = vld [vmem:[#allocation164_spill] sm:$0xff] }
 0x19f   : > { %v830_v57 = vmul.f32 %v7069_v55, %v4268_v17  ;;  %v888_v31 = vmul.f32 %v7070_v60, %v4276_v59  ;;  %v7072_v53 = vstv %s6756_s22  ;;  %v7074_v4 = vstv %s6758_s0  ;;  %s7105_s0 = sld [smem:[#allocation138_spill]]  ;;  %s7106_s22 = sld [smem:[#allocation139_spill]] }
 0x1a0   : > { %v946_v38 = vmul.f32 %v7072_v53, %v7071_v3  ;;  %v1004_v13 = vmul.f32 %v7074_v4, %v7073_v42  ;;  %v1162_v35 = vadd.f32 %v1160_v23, %v1104_v52  ;;  %v929_v28 = vadd.f32 %v7075_v20, %v871_v56  ;;  %1433 = vrot.lane.b32.xlu0 %v1375_v40, %s2999_s9  ;;  %v7083_v20 = vld [vmem:[#allocation162_spill] sm:$0xff] }
 0x1a1   : > { %v7077_v19 = vstv %s7065_s3  ;;  %v7078_v55 = vstv %s7066_s18  ;;  %v716_v62 = vadd.f32 %v714_v22, %v658_v2  ;;  %v483_v32 = vadd.f32 %v7080_v12, %v7079_v27 }
 0x1a2   : > { %v1062_v30 = vmul.f32 %v7077_v19, %v7076_v37  ;;  %v1120_v60 = vmul.f32 %v7078_v55, %v7007_v58  ;;  %v7081_v53 = vstv %s7037_s4  ;;  %v7082_v23 = vstv %s7039_s19  ;;  %s7160_s4 = sld [smem:[#allocation152_spill]]  ;;  %s4779_s19 = sld [smem:[#allocation8 + $0x5f]] }
 0x1a3   : > { %v539_v4 = vmul.f32 %v7081_v53, %v7011_v9  ;;  %v597_v52 = vmul.f32 %v7082_v23, %v7013_v11  ;;  %v1220_v56 = vadd.f32 %v4394_v50, %v1162_v35  ;;  %v987_v19 = vadd.f32 %v7083_v20, %v929_v28 }
 0x1a4   : > { %v7084_v55 = vstv %s3512_s27  ;;  %v7085_v22 = vstv %s6727_s15  ;;  %v774_v27 = vadd.f32 %v772_v51, %v716_v62  ;;  %v7086_v12 = vstv %s3534_s13 }
 0x1a5   : > { %v1178_v40 = vmul.f32 %v7084_v55, %v7015_v16  ;;  %v4534_v2 = vmul.f32 %v7085_v22, %v7017_v7  ;;  %v4539_v53 = vmul.f32 %v3949_v25, %v7086_v12  ;;  %v7087_v23 = vstv %s3536_s10 }
 0x1a6   : > { %v4544_v11 = vmul.f32 %v7087_v23, %v4292_v10  ;;  %v541_v50 = vadd.f32 %v539_v4, %v483_v32  ;;  %v1278_v35 = vadd.f32 %v4399_v15, %v1220_v56  ;;  %v1045_v28 = vadd.f32 %v1043_v47, %v987_v19 }
 0x1a7   : > { %v7089_v20 = vstv %s3542_s2  ;;  %v7091_v51 = vstv %s7051_s29  ;;  %v832_v22 = vadd.f32 %v830_v57, %v774_v27  ;;  %v7092_v23 = vstv %s7055_s16  ;;  %s7165_s29 = sld [smem:[#allocation153_spill]]  ;;  %s4791_s16 = sld [smem:[#allocation8 + $0x62]] }
 0x1a8   : > { %7088 = vst [vmem:[#allocation177_spill] sm:$0xff] %v4544_v11  ;;  %v4550_v55 = vmul.f32 %v7089_v20, %v4302_v41  ;;  %v655_v62 = vmul.f32 %v7091_v51, %v7026_v36  ;;  %v599_v12 = vadd.f32 %v597_v52, %v541_v50  ;;  %v713_v11 = vmul.f32 %v7092_v23, %v7028_v63 }
 0x1a9   : > { %v7093_v32 = vstv %s7056_s26  ;;  %v1336_v15 = vadd.f32 %v4405_v24, %v1278_v35  ;;  %v1103_v47 = vadd.f32 %v4438_v46, %v1045_v28  ;;  %v7094_v56 = vstv %s7059_s12  ;;  %v7098_v24 = vld [vmem:[#allocation173_spill] sm:$0xff]  ;;  %v7099_v28 = vld [vmem:[#allocation166_spill] sm:$0xff]  ;;  %s7169_s26 = sld [smem:[#allocation154_spill]]  ;;  %s4793_s12 = sld [smem:[#allocation8 + $0x65]] }
 0x1aa   : > { %7090 = vst [vmem:[#allocation178_spill] sm:$0xff] %v4550_v55  ;;  %v771_v4 = vmul.f32 %v7093_v32, %v3927_v48  ;;  %v829_v19 = vmul.f32 %v7094_v56, %v4294_v45  ;;  %v7095_v20 = vstv %s7061_s21  ;;  %v890_v57 = vadd.f32 %v888_v31, %v832_v22  ;;  %s4802_s21 = sld [smem:[#allocation8 + $0x68]] }
 0x1ab   : > { %v887_v51 = vmul.f32 %v7095_v20, %v4309_v6  ;;  %v657_v52 = vadd.f32 %v655_v62, %v599_v12  ;;  %v7096_v27 = vstv %s7065_s3  ;;  %v7097_v23 = vstv %s7066_s18  ;;  %v7102_v12 = vld [vmem:[#allocation190_spill] sm:$0xff]  ;;  %s7172_s3 = sld [smem:[#allocation148_spill]]  ;;  %s4811_s18 = sld [smem:[#allocation8 + $0x6b]] }
 0x1ac   : > { %v1061_v50 = vmul.f32 %v7096_v27, %v7035_v61  ;;  %v4575_v32 = vmul.f32 %v7097_v23, %v7040_v8  ;;  %v1394_v46 = vadd.f32 %v7098_v24, %v1336_v15  ;;  %v1161_v35 = vadd.f32 %v4444_v29, %v1103_v47 }
 0x1ad   : > { %v7100_v56 = vstv %s6764_s8  ;;  %v7101_v31 = vstv %s6726_s23  ;;  %v948_v22 = vadd.f32 %v946_v38, %v890_v57  ;;  %v715_v61 = vadd.f32 %v713_v11, %v657_v52  ;;  %s7109_s8 = sld [smem:[#allocation141_spill]] }
 0x1ae   : > { %v408_v20 = vmul.f32 %v7100_v56, %v7099_v28  ;;  %v452_v62 = vmul.f32 %v7101_v31, %v7047_v26  ;;  %v7103_v27 = vstv %s3512_s27  ;;  %v7104_v55 = vstv %s6727_s15  ;;  %1463 = vrot.lane.b32.xlu1 %v1394_v46, %s2999_s9  ;;  %s7110_s27 = sld [smem:[#allocation142_spill]]  ;;  %s7113_s15 = sld [smem:[#allocation136_spill]] }
 0x1af   : > { %v4588_v23 = vmul.f32 %v7103_v27, %v7102_v12  ;;  %v4593_v15 = vmul.f32 %v7104_v55, %v4090_v5  ;;  %v1219_v29 = vadd.f32 %v4457_v44, %v1161_v35  ;;  %v7107_v26 = vstv %s3526_s1 }
 0x1b0   : > { %v454_v47 = vadd.f32 %v452_v62, %v408_v20  ;;  %v510_v38 = vmul.f32 %v7107_v26, %v7052_v39  ;;  %v7108_v11 = vstv %s3544_s5  ;;  %v1006_v52 = vadd.f32 %v1004_v13, %v948_v22 }
 0x1b1   : > { %v568_v57 = vmul.f32 %v7108_v11, %v3772_v0  ;;  %v773_v24 = vadd.f32 %v771_v4, %v715_v61  ;;  %v7111_v28 = vstv %s3534_s13  ;;  %v7112_v46 = vstv %s3536_s10  ;;  %s7118_s13 = sld [smem:[#allocation143_spill]]  ;;  %s7124_s10 = sld [smem:[#allocation145_spill]] }
 0x1b2   : > { %v4606_v55 = vmul.f32 %v3947_v33, %v7111_v28  ;;  %v4611_v56 = vmul.f32 %v7112_v46, %v4325_v1  ;;  %v1277_v44 = vadd.f32 %v4471_v43, %v1219_v29  ;;  %v7115_v39 = vstv %s3542_s2  ;;  %s7123_s2 = sld [smem:[#allocation144_spill]] }
 0x1b3   : > { %v4617_v35 = vmul.f32 %v7115_v39, %v4334_v54  ;;  %v512_v0 = vadd.f32 %v510_v38, %v454_v47  ;;  %v7116_v13 = vstv %s3550_s7  ;;  %v1064_v20 = vadd.f32 %v1062_v30, %v1006_v52  ;;  %v7131_v39 = vld [vmem:[#allocation168_spill] sm:$0xff] }
 0x1b4   : > { %v626_v4 = vmul.f32 %v7116_v13, %v6993_v14  ;;  %v831_v31 = vadd.f32 %v829_v19, %v773_v24  ;;  %v7119_v62 = vstv %s7105_s0  ;;  %v7120_v61 = vstv %s7106_s22 }
 0x1b5   : > { %v684_v22 = vmul.f32 %v7119_v62, %v6996_v34  ;;  %v742_v27 = vmul.f32 %v7120_v61, %v3929_v18  ;;  %v1335_v43 = vadd.f32 %v4477_v21, %v1277_v44  ;;  %v570_v29 = vadd.f32 %v568_v57, %v512_v0  ;;  %v4653_v0 = vld [vmem:[#allocation2 + $0x1] sm:$0xff] }
 0x1b6   : > { %v7121_v47 = vstv %s7109_s8  ;;  %v7122_v38 = vstv %s7110_s27  ;;  %v1122_v30 = vadd.f32 %v1120_v60, %v1064_v20  ;;  %v889_v19 = vadd.f32 %v887_v51, %v831_v31 }
 0x1b7   : > { %v800_v26 = vmul.f32 %v7121_v47, %v4268_v17  ;;  %v858_v14 = vmul.f32 %v7122_v38, %v4276_v59  ;;  %v7125_v34 = vstv %s7113_s15  ;;  %v7127_v52 = vstv %s7114_s17  ;;  %v7140_v38 = vld [vmem:[#allocation180_spill] sm:$0xff] }
 0x1b8   : > { %v916_v11 = vmul.f32 %v7125_v34, %v7071_v3  ;;  %v974_v24 = vmul.f32 %v7127_v52, %v7073_v42  ;;  %v1393_v21 = vadd.f32 %v4482_v49, %v1335_v43  ;;  %v628_v57 = vadd.f32 %v626_v4, %v570_v29  ;;  %v7138_v43 = vld [vmem:[#allocation169_spill] sm:$0xff] }
 0x1b9   : > { %v7128_v28 = vstv %s7117_s25  ;;  %v7129_v44 = vstv %s7118_s13  ;;  %v1180_v51 = vadd.f32 %v1178_v40, %v1122_v30  ;;  %v947_v3 = vadd.f32 %v7131_v39, %v889_v19 }
 0x1ba   : > { %v4645_v46 = vmul.f32 %v7128_v28, %v7076_v37  ;;  %v4650_v60 = vmul.f32 %v7129_v44, %v7007_v58  ;;  %v7133_v42 = vstv %s6726_s23  ;;  %v7134_v13 = vstv %s3526_s1  ;;  %1461 = vrot.lane.b32.xlu0 %v1393_v21, %s2999_s9  ;;  %s4700_s1 = sld [smem:[#allocation8 + $0x4a]]  ;;  %s7150_s23 = sld [smem:[#allocation146_spill]] }
 0x1bb   : > { %v451_v49 = vmul.f32 %v4653_v0, %v7133_v42  ;;  %v509_v4 = vmul.f32 %v7134_v13, %v7011_v9  ;;  %v686_v37 = vadd.f32 %v684_v22, %v628_v57  ;;  %v7135_v58 = vstv %s7123_s2  ;;  %v7139_v22 = vld [vmem:[#allocation174_spill] sm:$0xff] }
 0x1bc   : > { %v4665_v20 = vmul.f32 %v7135_v58, %v7015_v16  ;;  %v7136_v40 = vstv %s7124_s10  ;;  %v7137_v62 = vstv %s7126_s14  ;;  %v1238_v9 = vadd.f32 %v4534_v2, %v1180_v51 }
 0x1bd   : > { %v4670_v31 = vmul.f32 %v7136_v40, %v7017_v7  ;;  %v4675_v61 = vmul.f32 %v3949_v25, %v7137_v62  ;;  %v1005_v29 = vadd.f32 %v7138_v43, %v947_v3  ;;  %v453_v47 = vadd.f32 %v451_v49, %v7139_v22  ;;  %v4715_v40 = vld [vmem:[#allocation2 + $0x48] sm:$0xff] }
 0x1be   : > { %v7141_v16 = vstv %s3544_s5  ;;  %v744_v19 = vadd.f32 %v742_v27, %v686_v37  ;;  %v7142_v7 = vstv %s7130_s20  ;;  %v7143_v52 = vstv %s7132_s28  ;;  %s4711_s5 = sld [smem:[#allocation8 + $0x4d]] }
 0x1bf   : > { %v567_v30 = vmul.f32 %v7141_v16, %v7140_v38  ;;  %v4686_v34 = vmul.f32 %v7142_v7, %v4292_v10  ;;  %v4691_v21 = vmul.f32 %v7143_v52, %v4302_v41  ;;  %v7144_v57 = vstv %s3550_s7  ;;  %s4722_s7 = sld [smem:[#allocation8 + $0x50]]  ;;  %v4747_v52 = vld [vmem:[#allocation2 + $0x8] sm:$0xff] }
 0x1c0   : > { %v625_v2 = vmul.f32 %v7144_v57, %v7026_v36  ;;  %v1296_v28 = vadd.f32 %v4539_v53, %v1238_v9  ;;  %v1063_v44 = vadd.f32 %v1061_v50, %v1005_v29  ;;  %v511_v51 = vadd.f32 %v509_v4, %v453_v47  ;;  %v7149_v50 = vld [vmem:[#allocation177_spill] sm:$0xff]  ;;  %v4724_v9 = vld [vmem:[#allocation2 + $0x49] sm:$0xff] }
 0x1c1   : > { %v7145_v39 = vstv %s7105_s0  ;;  %v802_v3 = vadd.f32 %v800_v26, %v744_v19  ;;  %v7146_v42 = vstv %s7106_s22  ;;  %v7147_v13 = vstv %s7109_s8  ;;  %s7174_s0 = sld [smem:[#allocation150_spill]]  ;;  %s7175_s22 = sld [smem:[#allocation155_spill]] }
 0x1c2   : > { %v683_v27 = vmul.f32 %v7145_v39, %v7028_v63  ;;  %v741_v49 = vmul.f32 %v7146_v42, %v3927_v48  ;;  %v799_v37 = vmul.f32 %v7147_v13, %v4294_v45  ;;  %v7148_v36 = vstv %s7110_s27  ;;  %v4762_v42 = vld [vmem:[#allocation2 + $0x9] sm:$0xff]  ;;  %s4884_s8 = sld [smem:[#allocation8 + $0x71]]  ;;  %s4886_s27 = sld [smem:[#allocation8 + $0x74]] }
 0x1c3   : > { %v857_v53 = vmul.f32 %v7148_v36, %v4309_v6  ;;  %v1354_v4 = vadd.f32 %v7149_v50, %v1296_v28  ;;  %v1121_v63 = vadd.f32 %v4575_v32, %v1063_v44  ;;  %v569_v58 = vadd.f32 %v567_v30, %v511_v51  ;;  %v4731_v32 = vld [vmem:[#allocation2 + $0x4a] sm:$0xff] }
 0x1c4   : > { %v7151_v26 = vstv %s7113_s15  ;;  %v860_v62 = vadd.f32 %v858_v14, %v802_v3  ;;  %v7153_v43 = vstv %s7114_s17  ;;  %v7154_v22 = vstv %s7117_s25  ;;  %v7156_v14 = vld [vmem:[#allocation178_spill] sm:$0xff]  ;;  %s4914_s15 = sld [smem:[#allocation8 + $0x77]]  ;;  %s4938_s17 = sld [smem:[#allocation8 + $0x7a]] }
 0x1c5   : > { %v4720_v48 = vmul.f32 %v4715_v40, %v7151_v26  ;;  %v4729_v29 = vmul.f32 %v4724_v9, %v7153_v43  ;;  %v4736_v47 = vmul.f32 %v4731_v32, %v7154_v22  ;;  %v7155_v38 = vstv %s7118_s13  ;;  %v4781_v26 = vld [vmem:[#allocation2 + $0xa] sm:$0xff]  ;;  %s4940_s25 = sld [smem:[#allocation8 + $0x7d]]  ;;  %s4951_s13 = sld [smem:[#allocation8 + $0x80]] }
 0x1c6   : > { %v4741_v16 = vmul.f32 %v7155_v38, %v7040_v8  ;;  %v1412_v30 = vadd.f32 %v7156_v14, %v1354_v4  ;;  %v1179_v19 = vadd.f32 %v4588_v23, %v1121_v63  ;;  %v627_v7 = vadd.f32 %v625_v2, %v569_v58  ;;  %7166 = vst [vmem:[#allocation175_spill] sm:$0xff] %v4781_v26 }
 0x1c7   : > { %v7157_v57 = vstv %s7150_s23  ;;  %v918_v44 = vadd.f32 %v916_v11, %v860_v62  ;;  %v7159_v51 = vstv %s7123_s2  ;;  %v7161_v39 = vstv %s7124_s10  ;;  %s4965_s2 = sld [smem:[#allocation8 + $0x83]]  ;;  %s4980_s10 = sld [smem:[#allocation8 + $0x86]] }
 0x1c8   : > { %v420_v28 = vmul.f32 %v4747_v52, %v7157_v57  ;;  %v4755_v8 = vmul.f32 %v7159_v51, %v7102_v12  ;;  %v4760_v3 = vmul.f32 %v7161_v39, %v4090_v5  ;;  %v7162_v23 = vstv %s7152_s30  ;;  %1491 = vrot.lane.b32.xlu1 %v1412_v30, %s2999_s9  ;;  %v4805_v57 = vld [vmem:[#allocation2 + $0x21] sm:$0xff] }
 0x1c9   : > { %v470_v2 = vmul.f32 %v4762_v42, %v7162_v23  ;;  %v1237_v13 = vadd.f32 %v4593_v15, %v1179_v19  ;;  %v685_v11 = vadd.f32 %v683_v27, %v627_v7  ;;  %v7163_v36 = vstv %s7126_s14  ;;  %v4786_v27 = vld [vmem:[#allocation2 + $0x20] sm:$0xff]  ;;  %s4993_s14 = sld [smem:[#allocation8 + $0x8f]] }
 0x1ca   : > { %v4772_v12 = vmul.f32 %v3947_v33, %v7163_v36  ;;  %v7164_v50 = vstv %s7130_s20  ;;  %v976_v63 = vadd.f32 %v974_v24, %v918_v44  ;;  %v7167_v62 = vstv %s7158_s6  ;;  %v4814_v39 = vld [vmem:[#allocation2 + $0x22] sm:$0xff]  ;;  %s5007_s20 = sld [smem:[#allocation8 + $0x89]] }
 0x1cb   : > { %v4777_v4 = vmul.f32 %v7164_v50, %v4325_v1  ;;  %v472_v58 = vadd.f32 %v470_v2, %v420_v28  ;;  %v528_v15 = vmul.f32 %v4781_v26, %v7167_v62  ;;  %v7168_v43 = vstv %s7160_s4 }
 0x1cc   : > { %v586_v33 = vmul.f32 %v4786_v27, %v7168_v43  ;;  %v1295_v24 = vadd.f32 %v4606_v55, %v1237_v13  ;;  %v743_v22 = vadd.f32 %v741_v49, %v685_v11  ;;  %v7170_v38 = vstv %s7132_s28  ;;  %s5009_s28 = sld [smem:[#allocation8 + $0x8c]] }
 0x1cd   : > { %v4799_v14 = vmul.f32 %v7170_v38, %v4334_v54  ;;  %v758_v30 = vstv %s4700_s1  ;;  %v1034_v19 = vadd.f32 %v4645_v46, %v976_v63  ;;  %v530_v7 = vadd.f32 %v528_v15, %v472_v58  ;;  %v4829_v58 = vld [vmem:[#allocation2 + $0x50] sm:$0xff]  ;;  %s5015_s1 = sld [smem:[#allocation8 + $0x92]] }
 0x1ce   : > { %v7171_v28 = vstv %s7165_s29  ;;  %v816_v55 = vstv %s4711_s5  ;;  %v1353_v49 = vadd.f32 %v4611_v56, %v1295_v24  ;;  %v801_v51 = vadd.f32 %v799_v37, %v743_v22  ;;  %7176 = vst [vmem:[#allocation156_spill] sm:$0xff] %v4829_v58  ;;  %v4847_v22 = vld [vmem:[#allocation2 + $0x52] sm:$0xff]  ;;  %s5025_s5 = sld [smem:[#allocation8 + $0x95]] }
 0x1cf   : > { %v644_v44 = vmul.f32 %v4805_v57, %v7171_v28  ;;  %v7173_v23 = vstv %s7169_s26  ;;  %v6447_v2 = vstv %s4722_s7  ;;  %v1092_v13 = vadd.f32 %v4650_v60, %v1034_v19  ;;  %7180 = vst [vmem:[#allocation182_spill] sm:$0xff] %v4847_v22  ;;  %v4854_v19 = vld [vmem:[#allocation2 + $0x68] sm:$0xff] }
 0x1d0   : > { %v702_v46 = vmul.f32 %v4814_v39, %v7173_v23  ;;  %v588_v11 = vadd.f32 %v586_v33, %v530_v7  ;;  %v760_v36 = vmul.f32 %v758_v30, %v3929_v18  ;;  %v6446_v50 = vstv %s4743_s24  ;;  %7182 = vst [vmem:[#allocation171_spill] sm:$0xff] %v4854_v19 }
 0x1d1   : > { %v1411_v56 = vadd.f32 %v4617_v35, %v1353_v49  ;;  %v859_v37 = vadd.f32 %v857_v53, %v801_v51  ;;  %v818_v63 = vmul.f32 %v816_v55, %v4268_v17  ;;  %v7177_v62 = vstv %s7172_s3  ;;  %v4838_v35 = vld [vmem:[#allocation2 + $0x51] sm:$0xff] }
 0x1d2   : > { %v934_v60 = vmul.f32 %v4829_v58, %v7177_v62  ;;  %v1150_v15 = vadd.f32 %v4665_v20, %v1092_v13  ;;  %v646_v43 = vadd.f32 %v644_v44, %v588_v11  ;;  %v876_v18 = vmul.f32 %v6447_v2, %v4276_v59  ;;  %7178 = vst [vmem:[#allocation188_spill] sm:$0xff] %v4838_v35  ;;  %v4867_v11 = vld [vmem:[#allocation2] sm:$0xff]  ;;  %v4902_v2 = vld [vmem:[#allocation2 + $0x6a] sm:$0xff] }
 0x1d3   : > { %v7179_v53 = vstv %s7174_s0  ;;  %1489 = vrot.lane.b32.xlu0 %v1411_v56, %s2999_s9  ;;  %v917_v24 = vadd.f32 %v4720_v48, %v859_v37  ;;  %v7181_v20 = vstv %s7175_s22  ;;  %v4859_v7 = vmul.f32 %v4854_v19, %v6446_v50  ;;  %7183 = vst [vmem:[#allocation157_spill] sm:$0xff] %v4867_v11  ;;  %s4875_s9 = sld [smem:[#allocation8 + $0x6e]]  ;;  %7191 = vst [vmem:[#allocation167_spill] sm:$0xff] %v4902_v2 }
 0x1d4   : > { %v4843_v33 = vmul.f32 %v4838_v35, %v7179_v53  ;;  %v4852_v38 = vmul.f32 %v4847_v22, %v7181_v20  ;;  %v1164_v28 = vstv %s4779_s19  ;;  %v1208_v44 = vadd.f32 %v4670_v31, %v1150_v15  ;;  %s5120_s19 = sld [smem:[#allocation11 + $0x6]] }
 0x1d5   : > { %v704_v49 = vadd.f32 %v702_v46, %v646_v43  ;;  %v6451_v51 = vstv %s4791_s16  ;;  %v6449_v48 = vstv %s4793_s12  ;;  %v975_v23 = vadd.f32 %v4729_v29, %v917_v24  ;;  %v4879_v43 = vld [vmem:[#allocation2 + $0x2] sm:$0xff] }
 0x1d6   : > { %v6448_v13 = vstv %s4802_s21  ;;  %v7184_v56 = vstv %s7150_s23  ;;  %v7185_v62 = vstv %s7152_s30  ;;  %v1266_v31 = vadd.f32 %v4675_v61, %v1208_v44  ;;  %7186 = vst [vmem:[#allocation186_spill] sm:$0xff] %v4879_v43  ;;  %v4896_v44 = vld [vmem:[#allocation2 + $0x18] sm:$0xff]  ;;  %s5029_s23 = sld [smem:[#allocation8 + $0x98]]  ;;  %s5047_s30 = sld [smem:[#allocation8 + $0x9e]] }
 0x1d7   : > { %v419_v37 = vmul.f32 %v4867_v11, %v7184_v56  ;;  %v469_v53 = vmul.f32 %v4653_v0, %v7185_v62  ;;  %v762_v46 = vadd.f32 %v760_v36, %v704_v49  ;;  %v6450_v15 = vstv %s4811_s18  ;;  %v4889_v56 = vld [vmem:[#allocation2 + $0x69] sm:$0xff]  ;;  %7189 = vst [vmem:[#allocation191_spill] sm:$0xff] %v4896_v44 }
 0x1d8   : > { %v7187_v29 = vstv %s7158_s6  ;;  %v1033_v20 = vadd.f32 %v4736_v47, %v975_v23  ;;  %7188 = vst [vmem:[#allocation189_spill] sm:$0xff] %v4889_v56  ;;  %v4894_v61 = vmul.f32 %v4889_v56, %v1164_v28  ;;  %v7190_v49 = vstv %s7160_s4  ;;  %s5112_s6 = sld [smem:[#allocation11]]  ;;  %s5114_s4 = sld [smem:[#allocation11 + $0x3]] }
 0x1d9   : > { %v527_v24 = vmul.f32 %v4879_v43, %v7187_v29  ;;  %v471_v36 = vadd.f32 %v469_v53, %v419_v37  ;;  %v585_v62 = vmul.f32 %v4896_v44, %v7190_v49  ;;  %v1324_v29 = vadd.f32 %v4686_v34, %v1266_v31 }
 0x1da   : > { %v820_v50 = vadd.f32 %v818_v63, %v762_v46  ;;  %v4907_v47 = vmul.f32 %v4902_v2, %v6451_v51  ;;  %v4912_v23 = vmul.f32 %v3949_v25, %v6449_v48  ;;  %v1091_v37 = vadd.f32 %v4741_v16, %v1033_v20  ;;  %v4928_v46 = vld [vmem:[#allocation2 + $0x19] sm:$0xff] }
 0x1db   : > { %v4920_v34 = vmul.f32 %v6448_v13, %v4292_v10  ;;  %v4925_v63 = vmul.f32 %v6450_v15, %v4302_v41  ;;  %v529_v53 = vadd.f32 %v527_v24, %v471_v36  ;;  %v1382_v31 = vadd.f32 %v4691_v21, %v1324_v29  ;;  %7192 = vst [vmem:[#allocation176_spill] sm:$0xff] %v4928_v46  ;;  %v4933_v20 = vld [vmem:[#allocation2 + $0x1a] sm:$0xff] }
 0x1dc   : > { %v878_v25 = vadd.f32 %v876_v18, %v820_v50  ;;  %v7193_v49 = vstv %s7165_s29  ;;  %7194 = vst [vmem:[#allocation181_spill] sm:$0xff] %v4933_v20  ;;  %v7195_v13 = vstv %s7169_s26  ;;  %v1149_v21 = vadd.f32 %v4755_v8, %v1091_v37  ;;  %v4943_v18 = vld [vmem:[#allocation2 + $0x30] sm:$0xff]  ;;  %s5134_s29 = sld [smem:[#allocation11 + $0x9]]  ;;  %s5142_s26 = sld [smem:[#allocation11 + $0xf]] }
 0x1dd   : > { %v643_v16 = vmul.f32 %v4928_v46, %v7193_v49  ;;  %v701_v48 = vmul.f32 %v4933_v20, %v7195_v13  ;;  %v587_v50 = vadd.f32 %v585_v62, %v529_v53  ;;  %7196 = vst [vmem:[#allocation185_spill] sm:$0xff] %v4943_v18  ;;  %v759_v24 = vmul.f32 %v4943_v18, %v758_v30 }
 0x1de   : > { %v817_v36 = vmul.f32 %v816_v55, %v4294_v45  ;;  %1425 = vrot.lane.b32.xlu1 %v1382_v31, %s3000_s11  ;;  %v936_v13 = vadd.f32 %v934_v60, %v878_v25  ;;  %v7197_v8 = vstv %s4722_s7  ;;  %v7198_v62 = vstv %s7172_s3  ;;  %v4973_v31 = vld [vmem:[#allocation2 + $0x60] sm:$0xff]  ;;  %s5031_s7 = sld [smem:[#allocation8 + $0x9b]]  ;;  %s5160_s3 = sld [smem:[#allocation11 + $0x18]] }
 0x1df   : > { %v875_v29 = vmul.f32 %v7197_v8, %v4309_v6  ;;  %v933_v37 = vmul.f32 %v4715_v40, %v7198_v62  ;;  %v7199_v53 = vstv %s7174_s0  ;;  %v1207_v55 = vadd.f32 %v4760_v3, %v1149_v21  ;;  %7201 = vst [vmem:[#allocation192_spill] sm:$0xff] %v4973_v31  ;;  %s5200_s0 = sld [smem:[#allocation11 + $0x1e]] }
 0x1e0   : > { %v4963_v30 = vmul.f32 %v4724_v9, %v7199_v53  ;;  %v645_v49 = vadd.f32 %v643_v16, %v587_v50  ;;  %v7200_v15 = vstv %s7175_s22  ;;  %v7202_v25 = vstv %s4743_s24  ;;  %s5054_s24 = sld [smem:[#allocation8 + $0xa1]] }
 0x1e1   : > { %v4971_v60 = vmul.f32 %v4731_v32, %v7200_v15  ;;  %v4978_v8 = vmul.f32 %v4973_v31, %v7202_v25  ;;  %v994_v62 = vadd.f32 %v4843_v33, %v936_v13  ;;  %v6454_v53 = vstv %s4875_s9  ;;  %v4996_v13 = vld [vmem:[#allocation2 + $0x61] sm:$0xff]  ;;  %s5202_s22 = sld [smem:[#allocation11 + $0x21]] }
 0x1e2   : > { %v6452_v3 = vstv %s4884_s8  ;;  %v6453_v16 = vstv %s4886_s27  ;;  %v1265_v21 = vadd.f32 %v4772_v12, %v1207_v55  ;;  %v703_v15 = vadd.f32 %v701_v48, %v645_v49  ;;  %7203 = vst [vmem:[#allocation194_spill] sm:$0xff] %v4996_v13 }
 0x1e3   : > { %v432_v50 = vmul.f32 %v4747_v52, %v6454_v53  ;;  %v488_v51 = vmul.f32 %v4762_v42, %v6452_v3  ;;  %v1052_v33 = vadd.f32 %v4852_v38, %v994_v62  ;;  %v5001_v25 = vmul.f32 %v4996_v13, %v1164_v28 }
 0x1e4   : > { %v546_v12 = vmul.f32 %v4781_v26, %v6453_v16  ;;  %v6460_v48 = vstv %s4914_s15  ;;  %v1323_v55 = vadd.f32 %v4777_v4, %v1265_v21  ;;  %v761_v49 = vadd.f32 %v759_v24, %v703_v15 }
 0x1e5   : > { %v490_v3 = vadd.f32 %v488_v51, %v432_v50  ;;  %v604_v38 = vmul.f32 %v4786_v27, %v6460_v48  ;;  %v1110_v28 = vadd.f32 %v4859_v7, %v1052_v33  ;;  %v7204_v62 = vstv %s4791_s16  ;;  %v5034_v7 = vld [vmem:[#allocation2 + $0x78] sm:$0xff]  ;;  %s5136_s16 = sld [smem:[#allocation11 + $0xc]] }
 0x1e6   : > { %v5021_v16 = vmul.f32 %v7204_v62, %v4090_v5  ;;  %v6457_v53 = vstv %s4938_s17  ;;  %v6456_v26 = vstv %s4940_s25  ;;  %v1381_v4 = vadd.f32 %v4799_v14, %v1323_v55  ;;  %7205 = vst [vmem:[#allocation160_spill] sm:$0xff] %v5034_v7 }
 0x1e7   : > { %v819_v51 = vadd.f32 %v817_v36, %v761_v49  ;;  %v548_v24 = vadd.f32 %v546_v12, %v490_v3  ;;  %v6458_v21 = vstv %s4951_s13  ;;  %v1168_v5 = vadd.f32 %v4894_v61, %v1110_v28 }
 0x1e8   : > { %v7206_v15 = vstv %s4793_s12  ;;  %v7207_v14 = vstv %s4802_s21  ;;  %v6459_v3 = vstv %s4965_s2  ;;  %1423 = vrot.lane.b32.xlu0 %v1381_v4, %s3000_s11  ;;  %v662_v12 = vmul.f32 %v4805_v57, %v6457_v53  ;;  %s5144_s12 = sld [smem:[#allocation11 + $0x12]]  ;;  %s5158_s21 = sld [smem:[#allocation11 + $0x15]] }
 0x1e9   : > { %v5039_v50 = vmul.f32 %v5034_v7, %v7206_v15  ;;  %v5044_v36 = vmul.f32 %v7207_v14, %v4325_v1  ;;  %v877_v33 = vadd.f32 %v875_v29, %v819_v51  ;;  %v606_v61 = vadd.f32 %v604_v38, %v548_v24  ;;  %v5065_v29 = vld [vmem:[#allocation2 + $0x38] sm:$0xff] }
 0x1ea   : > { %v892_v55 = vstv %s4980_s10  ;;  %v1226_v49 = vadd.f32 %v4907_v47, %v1168_v5  ;;  %v7208_v28 = vstv %s4811_s18  ;;  %v720_v4 = vmul.f32 %v4814_v39, %v6456_v26  ;;  %s5191_s18 = sld [smem:[#allocation11 + $0x1b]]  ;;  %s5329_s10 = sld [smem:[#allocation11 + $0x3c]] }
 0x1eb   : > { %v5060_v62 = vmul.f32 %v7208_v28, %v4334_v54  ;;  %v778_v38 = vmul.f32 %v5065_v29, %v6458_v21  ;;  %v935_v51 = vadd.f32 %v933_v37, %v877_v33  ;;  %v664_v24 = vadd.f32 %v662_v12, %v606_v61 }
 0x1ec   : > { %v836_v15 = vmul.f32 %v6459_v3, %v4268_v17  ;;  %v1066_v47 = vstv %s4993_s14  ;;  %v1284_v5 = vadd.f32 %v4912_v23, %v1226_v49  ;;  %v894_v14 = vmul.f32 %v892_v55, %v4276_v59  ;;  %s5331_s14 = sld [smem:[#allocation11 + $0x3f]] }
 0x1ed   : > { %v950_v28 = vstv %s5007_s20  ;;  %v1008_v26 = vstv %s5009_s28  ;;  %v993_v53 = vadd.f32 %v4963_v30, %v935_v51  ;;  %v722_v21 = vadd.f32 %v720_v4, %v664_v24  ;;  %s5342_s20 = sld [smem:[#allocation11 + $0x42]]  ;;  %s5346_s28 = sld [smem:[#allocation11 + $0x45]] }
 0x1ee   : > { %v952_v37 = vmul.f32 %v4829_v58, %v950_v28  ;;  %v1124_v33 = vstv %s5015_s1  ;;  %v1342_v17 = vadd.f32 %v4920_v34, %v1284_v5  ;;  %v1010_v61 = vmul.f32 %v4838_v35, %v1008_v26  ;;  %s5351_s1 = sld [smem:[#allocation11 + $0x48]] }
 0x1ef   : > { %v1068_v23 = vmul.f32 %v4847_v22, %v1066_v47  ;;  %v1182_v12 = vstv %s5025_s5  ;;  %v1051_v59 = vadd.f32 %v4971_v60, %v993_v53  ;;  %v780_v49 = vadd.f32 %v778_v38, %v722_v21  ;;  %v5104_v21 = vld [vmem:[#allocation2 + $0x80] sm:$0xff]  ;;  %s5355_s5 = sld [smem:[#allocation11 + $0x4b]] }
 0x1f0   : > { %v1240_v3 = vstv %s5029_s23  ;;  %v1298_v48 = vstv %s5031_s7  ;;  %v1400_v30 = vadd.f32 %v4925_v63, %v1342_v17  ;;  %v1126_v4 = vmul.f32 %v4854_v19, %v1124_v33  ;;  %7211 = vst [vmem:[#allocation193_spill] sm:$0xff] %v5104_v21  ;;  %s5366_s23 = sld [smem:[#allocation11 + $0x4e]]  ;;  %s5377_s7 = sld [smem:[#allocation12]] }
 0x1f1   : > { %v1356_v51 = vstv %s5047_s30  ;;  %v7209_v24 = vstv %s4875_s9  ;;  %v1109_v34 = vadd.f32 %v4978_v8, %v1051_v59  ;;  %v838_v5 = vadd.f32 %v836_v15, %v780_v49  ;;  %s5215_s9 = sld [smem:[#allocation11 + $0x24]]  ;;  %s5424_s30 = sld [smem:[#allocation12 + $0x2]] }
 0x1f2   : > { %v431_v58 = vmul.f32 %v4867_v11, %v7209_v24  ;;  %v1414_v22 = vstv %s5054_s24  ;;  %v7210_v35 = vstv %s4884_s8  ;;  %1453 = vrot.lane.b32.xlu1 %v1400_v30, %s3000_s11  ;;  %v1184_v63 = vmul.f32 %v4889_v56, %v1182_v12  ;;  %s5217_s8 = sld [smem:[#allocation11 + $0x27]]  ;;  %s5426_s24 = sld [smem:[#allocation8]] }
 0x1f3   : > { %v487_v60 = vmul.f32 %v4653_v0, %v7210_v35  ;;  %v5102_v53 = vmul.f32 %v4902_v2, %v1240_v3  ;;  %v5107_v38 = vmul.f32 %v5104_v21, %v1298_v48  ;;  %v7212_v8 = vstv %s4886_s27  ;;  %s5243_s27 = sld [smem:[#allocation11 + $0x2a]]  ;;  %v5302_v21 = vld [vmem:[#allocation3 + $0x30] sm:$0xff] }
 0x1f4   : > { %v545_v15 = vmul.f32 %v4879_v43, %v7212_v8  ;;  %v1167_v0 = vadd.f32 %v5001_v25, %v1109_v34  ;;  %v896_v35 = vadd.f32 %v894_v14, %v838_v5  ;;  %v7213_v59 = vstv %s4914_s15  ;;  %s5245_s15 = sld [smem:[#allocation11 + $0x2d]] }
 0x1f5   : > { %v489_v17 = vadd.f32 %v487_v60, %v431_v58  ;;  %v603_v49 = vmul.f32 %v4896_v44, %v7213_v59  ;;  %v5123_v30 = vmul.f32 %v1356_v51, %v4292_v10  ;;  %v5126_v24 = vmul.f32 %v1414_v22, %v4302_v41 }
 0x1f6   : > { %v7214_v8 = vstv %s4938_s17  ;;  %v7215_v43 = vstv %s4940_s25  ;;  %v1225_v58 = vadd.f32 %v5021_v16, %v1167_v0  ;;  %v954_v14 = vadd.f32 %v952_v37, %v896_v35  ;;  %s5277_s17 = sld [smem:[#allocation11 + $0x30]]  ;;  %s5284_s25 = sld [smem:[#allocation11 + $0x33]] }
 0x1f7   : > { %v661_v11 = vmul.f32 %v4928_v46, %v7214_v8  ;;  %v719_v25 = vmul.f32 %v4933_v20, %v7215_v43  ;;  %v547_v34 = vadd.f32 %v545_v15, %v489_v17  ;;  %v7216_v5 = vstv %s4951_s13  ;;  %v5207_v8 = vld [vmem:[#allocation3 + $0xa] sm:$0xff]  ;;  %s5315_s13 = sld [smem:[#allocation11 + $0x36]] }
 0x1f8   : > { %v777_v10 = vmul.f32 %v4943_v18, %v7216_v5  ;;  %v7217_v41 = vstv %s4965_s2  ;;  %v5150_v43 = vmul.f32 %v892_v55, %v4309_v6  ;;  %v5153_v59 = vmul.f32 %v4715_v40, %v950_v28  ;;  %v5294_v18 = vld [vmem:[#allocation3 + $0x1a] sm:$0xff]  ;;  %s5317_s2 = sld [smem:[#allocation11 + $0x39]] }
 0x1f9   : > { %v835_v60 = vmul.f32 %v7217_v41, %v4294_v45  ;;  %v5156_v16 = vmul.f32 %v4724_v9, %v1008_v26  ;;  %v1283_v37 = vadd.f32 %v5039_v50, %v1225_v58  ;;  %v1012_v15 = vadd.f32 %v1010_v61, %v954_v14  ;;  %v5172_v9 = vld [vmem:[#allocation2 + $0x62] sm:$0xff]  ;;  %v5220_v41 = vld [vmem:[#allocation3 + $0x20] sm:$0xff] }
 0x1fa   : > { %v605_v0 = vadd.f32 %v603_v49, %v547_v34  ;;  %v5164_v45 = vmul.f32 %v4731_v32, %v1066_v47  ;;  %v5167_v6 = vmul.f32 %v4973_v31, %v1124_v33  ;;  %v5170_v40 = vmul.f32 %v4996_v13, %v1182_v12  ;;  %7218 = vst [vmem:[#allocation187_spill] sm:$0xff] %v5172_v9  ;;  %v5212_v34 = vld [vmem:[#allocation3 + $0x9] sm:$0xff] }
 0x1fb   : > { %v5175_v26 = vmul.f32 %v5172_v9, %v1240_v3  ;;  %v391_v55 = vlaneseq  ;;  %v1341_v50 = vadd.f32 %v5044_v36, %v1283_v37  ;;  %v1070_v28 = vadd.f32 %v1068_v23, %v1012_v15  ;;  %v5223_v15 = vld [vmem:[#allocation3 + $0x21] sm:$0xff] }
 0x1fc   : > { %v663_v32 = vadd.f32 %v661_v11, %v605_v0  ;;  %v5179_v47 = vmul.f32 %v5034_v7, %v1298_v48  ;;  %v5182_v33 = vmul.f32 %v1356_v51, %v4325_v1  ;;  %v5185_v61 = vmul.f32 %v1414_v22, %v4334_v54  ;;  %v5195_v1 = vld [vmem:[#allocation3 + $0x8] sm:$0xff]  ;;  %v5270_v9 = vld [vmem:[#allocation3] sm:$0xff] }
 0x1fd   : > { %v1557_v12 = vstv %s5112_s6  ;;  %v1595_v35 = vstv %s5114_s4  ;;  %v1399_v3 = vadd.f32 %v5060_v62, %v1341_v50  ;;  %v1128_v36 = vadd.f32 %v1126_v4, %v1070_v28  ;;  %v5231_v28 = vld [vmem:[#allocation3 + $0x38] sm:$0xff]  ;;  %s5428_s6 = sld [smem:[#allocation8 + $0x3]]  ;;  %s5430_s4 = sld [smem:[#allocation8 + $0x9]] }
 0x1fe   : > { %v721_v17 = vadd.f32 %v719_v25, %v663_v32  ;;  %v1651_v23 = vstv %s5120_s19  ;;  %v5193_v11 = vand.u32 127, %v391_v55  ;;  %v1559_v54 = vmul.f32 %v5195_v1, %v1557_v12  ;;  %v5226_v55 = vld [vmem:[#allocation3 + $0x22] sm:$0xff]  ;;  %s5432_s19 = sld [smem:[#allocation8 + $0xc]] }
 0x1ff   : > { %v1707_v22 = vstv %s5134_s29  ;;  %v1763_v48 = vstv %s5136_s16  ;;  %1451 = vrot.lane.b32.xlu0 %v1399_v3, %s3000_s11  ;;  %v1186_v62 = vadd.f32 %v1184_v63, %v1128_v36  ;;  %v6469_v51 = vstv %s5142_s26  ;;  %s5438_s29 = sld [smem:[#allocation8 + $0xf]]  ;;  %s5440_s16 = sld [smem:[#allocation8 + $0x12]] }
 0x200   : > { %v779_v4 = vadd.f32 %v777_v10, %v721_v17  ;;  %v6466_v49 = vstv %s5144_s12  ;;  %v1653_v25 = vmul.f32 %v5207_v8, %v1651_v23  ;;  %v6467_v58 = vstv %s5158_s21 }
 0x201   : > { %v6468_v14 = vstv %s5160_s3  ;;  %v1597_v5 = vmul.f32 %v5212_v34, %v1595_v35  ;;  %v1244_v63 = vadd.f32 %v5102_v53, %v1186_v62  ;;  %v1709_v37 = vmul.f32 %v5220_v41, %v1707_v22  ;;  %v5249_v62 = vld [vmem:[#allocation3 + $0x3a] sm:$0xff] }
 0x202   : > { %v837_v10 = vadd.f32 %v835_v60, %v779_v4  ;;  %v1765_v0 = vmul.f32 %v5223_v15, %v1763_v48  ;;  %v1821_v50 = vmul.f32 %v5226_v55, %v6469_v51  ;;  %v1877_v53 = vmul.f32 %v5231_v28, %v6466_v49  ;;  %v5236_v60 = vld [vmem:[#allocation3 + $0x39] sm:$0xff]  ;;  %v5256_v49 = vld [vmem:[#allocation3 + $0x1] sm:$0xff] }
 0x203   : > { %v5241_v32 = vmul.f32 %v5236_v60, %v6467_v58  ;;  %v1599_v3 = vadd.f32 %v1597_v5, %v1559_v54  ;;  %v1302_v36 = vadd.f32 %v5107_v38, %v1244_v63  ;;  %v5254_v4 = vmul.f32 %v5249_v62, %v6468_v14  ;;  %v5259_v58 = vld [vmem:[#allocation3 + $0x2] sm:$0xff]  ;;  %v5262_v63 = vld [vmem:[#allocation3 + $0x18] sm:$0xff] }
 0x204   : > { %v895_v17 = vadd.f32 %v5150_v43, %v837_v10  ;;  %v1596_v54 = vmul.f32 %v5256_v49, %v1595_v35  ;;  %v1652_v38 = vmul.f32 %v5259_v58, %v1651_v23  ;;  %v1708_v43 = vmul.f32 %v5262_v63, %v1707_v22  ;;  %v5265_v10 = vld [vmem:[#allocation3 + $0x19] sm:$0xff] }
 0x205   : > { %v1655_v5 = vadd.f32 %v1653_v25, %v1599_v3  ;;  %v1764_v14 = vmul.f32 %v5265_v10, %v1763_v48  ;;  %v1360_v51 = vadd.f32 %v5123_v30, %v1302_v36  ;;  %v1558_v35 = vmul.f32 %v5270_v9, %v1557_v12  ;;  %v5281_v36 = vpop.permute.xlu1 %2056 }
 0x206   : > { %v953_v7 = vadd.f32 %v5153_v59, %v895_v17  ;;  %v1569_v25 = vstv %s5191_s18  ;;  %v1613_v13 = vstv %s5200_s0  ;;  %v1669_v22 = vstv %s5202_s22  ;;  %v5286_v17 = vpop.permute.xlu0 %2054  ;;  %s5455_s18 = sld [smem:[#allocation8 + $0x1e]]  ;;  %s5459_s0 = sld [smem:[#allocation8 + $0x21]] }
 0x207   : > { %v1711_v23 = vadd.f32 %v1709_v37, %v1655_v5  ;;  %v1571_v3 = vmul.f32 %v5195_v1, %v1569_v25  ;;  %v1418_v48 = vadd.f32 %v5126_v24, %v1360_v51  ;;  %v1598_v59 = vadd.f32 %v1596_v54, %v1558_v35  ;;  %s5461_s22 = sld [smem:[#allocation8 + $0x24]] }
 0x208   : > { %v1011_v30 = vadd.f32 %v5156_v16, %v953_v7  ;;  %v1615_v12 = vmul.f32 %v5212_v34, %v1613_v13  ;;  %v1671_v5 = vmul.f32 %v5207_v8, %v1669_v22  ;;  %v1725_v31 = vstv %s5215_s9  ;;  %s5472_s9 = sld [smem:[#allocation8 + $0x27]] }
 0x209   : > { %v1767_v37 = vadd.f32 %v1765_v0, %v1711_v23  ;;  %v1781_v24 = vstv %s5217_s8  ;;  %1481 = vrot.lane.b32.xlu1 %v1418_v48, %s3000_s11  ;;  %v1654_v16 = vadd.f32 %v1652_v38, %v1598_v59  ;;  %v1727_v54 = vmul.f32 %v5220_v41, %v1725_v31  ;;  %s5478_s8 = sld [smem:[#allocation8 + $0x2a]] }
 0x20a   : > { %v1069_v7 = vadd.f32 %v5164_v45, %v1011_v30  ;;  %v1617_v51 = vadd.f32 %v1615_v12, %v1571_v3  ;;  %v7219_v0 = vstv %s5142_s26  ;;  %v1837_v20 = vstv %s5243_s27  ;;  %v5308_v30 = vld [vmem:[#allocation3 + $0x31] sm:$0xff]  ;;  %s5443_s26 = sld [smem:[#allocation8 + $0x15]] }
 0x20b   : > { %v1823_v35 = vadd.f32 %v1821_v50, %v1767_v37  ;;  %v1820_v23 = vmul.f32 %v5294_v18, %v7219_v0  ;;  %v1893_v46 = vstv %s5245_s15  ;;  %v7220_v48 = vstv %s5144_s12  ;;  %s5445_s12 = sld [smem:[#allocation8 + $0x18]]  ;;  %s5482_s27 = sld [smem:[#allocation8 + $0x2d]] }
 0x20c   : > { %v1127_v44 = vadd.f32 %v5167_v6, %v1069_v7  ;;  %v1876_v45 = vmul.f32 %v5302_v21, %v7220_v48  ;;  %v1710_v38 = vadd.f32 %v1708_v43, %v1654_v16  ;;  %v1673_v3 = vadd.f32 %v1671_v5, %v1617_v51  ;;  %v5321_v16 = vpop.permute.xlu1 %2084  ;;  %s5488_s15 = sld [smem:[#allocation8 + $0x30]] }
 0x20d   : > { %vm393_vm4 = vcmp.ne.s32.totalorder %v5193_v11, 0  ;;  %v1879_v50 = vadd.f32 %v1877_v53, %v1823_v35  ;;  %v7221_v59 = vstv %s5158_s21  ;;  %v1783_v37 = vmul.f32 %v5223_v15, %v1781_v24  ;;  %s5450_s21 = sld [smem:[#allocation8 + $0x6]] }
 0x20e   : > { %v1932_v12 = vmul.f32 %v5308_v30, %v7221_v59  ;;  %v1839_v6 = vmul.f32 %v5226_v55, %v1837_v20  ;;  %v1185_v43 = vadd.f32 %v5170_v40, %v1127_v44  ;;  %v1766_v5 = vadd.f32 %v1764_v14, %v1710_v38  ;;  %v5327_v59 = vpop.permute.xlu0 %2082  ;;  %v5335_v38 = vld [vmem:[#allocation3 + $0x32] sm:$0xff] }
 0x20f   : > { %v1729_v7 = vadd.f32 %v1727_v54, %v1673_v3  ;;  %v1895_v53 = vmul.f32 %v5231_v28, %v1893_v46  ;;  %v1935_v51 = vadd.f32 %v5241_v32, %v1879_v50  ;;  %v1949_v35 = vstv %s5277_s17  ;;  %s5506_s17 = sld [smem:[#allocation8 + $0x36]] }
 0x210   : > { %v1570_v0 = vmul.f32 %v5270_v9, %v1569_v25  ;;  %v1614_v48 = vmul.f32 %v5256_v49, %v1613_v13  ;;  %v1243_v44 = vadd.f32 %v5175_v26, %v1185_v43  ;;  %v1822_v40 = vadd.f32 %v1820_v23, %v1766_v5  ;;  %v5357_v5 = vpop.permute.xlu1 %2112 }
 0x211   : > { %v1785_v14 = vadd.f32 %v1783_v37, %v1729_v7  ;;  %v2005_v54 = vstv %s5284_s25  ;;  %v7222_v3 = vstv %s5160_s3  ;;  %v1670_v25 = vmul.f32 %v5259_v58, %v1669_v22  ;;  %s5452_s3 = sld [smem:[#allocation8 + $0x1b]]  ;;  %s5525_s25 = sld [smem:[#allocation8 + $0x39]] }
 0x212   : > { %v1988_v32 = vmul.f32 %v5335_v38, %v7222_v3  ;;  %v1616_v50 = vadd.f32 %v1614_v48, %v1570_v0  ;;  %v1726_v13 = vmul.f32 %v5262_v63, %v1725_v31  ;;  %v1301_v2 = vadd.f32 %v5179_v47, %v1243_v44 }
 0x213   : > { %v1878_v56 = vadd.f32 %v1876_v45, %v1822_v40  ;;  %v1841_v19 = vadd.f32 %v1839_v6, %v1785_v14  ;;  %v1951_v26 = vmul.f32 %v5236_v60, %v1949_v35  ;;  %v1991_v23 = vadd.f32 %v5254_v4, %v1935_v51 }
 0x214   : > { %v2007_v37 = vmul.f32 %v5249_v62, %v2005_v54  ;;  %v1672_v43 = vadd.f32 %v1670_v25, %v1616_v50  ;;  %v1782_v22 = vmul.f32 %v5265_v10, %v1781_v24  ;;  %v1359_v31 = vadd.f32 %v5182_v33, %v1301_v2  ;;  %v5362_v24 = vpop.permute.xlu0 %2110 }
 0x215   : > { %v1934_v47 = vadd.f32 %v1932_v12, %v1878_v56  ;;  %v1897_v45 = vadd.f32 %v1895_v53, %v1841_v19  ;;  %v1838_v6 = vmul.f32 %v5294_v18, %v1837_v20  ;;  %v1894_v7 = vmul.f32 %v5302_v21, %v1893_v46 }
 0x216   : > { %v1728_v4 = vadd.f32 %v1726_v13, %v1672_v43  ;;  %v1581_v51 = vstv %s5315_s13  ;;  %v1631_v0 = vstv %s5317_s2  ;;  %v1417_v48 = vadd.f32 %v5185_v61, %v1359_v31  ;;  %v2047_v13 = vpop.permute.xlu1 %2046  ;;  %s5527_s13 = sld [smem:[#allocation8 + $0x3c]]  ;;  %s5531_s2 = sld [smem:[#allocation8 + $0x33]] }
 0x217   : > { %v1990_v2 = vadd.f32 %v1988_v32, %v1934_v47  ;;  %v1953_v19 = vadd.f32 %v1951_v26, %v1897_v45  ;;  %v1583_v56 = vmul.f32 %v5195_v1, %v1581_v51  ;;  %v1633_v33 = vmul.f32 %v5212_v34, %v1631_v0 }
 0x218   : > { %v1784_v20 = vadd.f32 %v1782_v22, %v1728_v4  ;;  %v1687_v12 = vstv %s5329_s10  ;;  %v1743_v53 = vstv %s5331_s14  ;;  %1479 = vrot.lane.b32.xlu0 %v1417_v48, %s3000_s11  ;;  %v2041_v46 = vsel %vm393_vm4, %v1991_v23, 0.0  ;;  %s5386_s11 = sld [smem:[#allocation12 + $0x1]]  ;;  %s5541_s10 = sld [smem:[#allocation8 + $0x3f]] }
 0x219   : > { %v2009_v61 = vadd.f32 %v2007_v37, %v1953_v19  ;;  %v1689_v44 = vmul.f32 %v5207_v8, %v1687_v12  ;;  %v1635_v14 = vadd.f32 %v1633_v33, %v1583_v56  ;;  %v1745_v1 = vmul.f32 %v5220_v41, %v1743_v53  ;;  %v2045_v41 = vpop.permute.xlu0 %2044  ;;  %s5562_s14 = sld [smem:[#allocation8 + $0x42]] }
 0x21a   : > { %v1840_v40 = vadd.f32 %v1838_v6, %v1784_v20  ;;  %v1799_v3 = vstv %s5342_s20  ;;  %v2061_v34 = vadd.f32 %v5281_v36, %v2041_v46  ;;  %v1950_v32 = vmul.f32 %v5308_v30, %v1949_v35  ;;  %s5580_s20 = sld [smem:[#allocation8 + $0x45]] }
 0x21b   : > { %v2006_v50 = vmul.f32 %v5335_v38, %v2005_v54  ;;  %v1855_v25 = vstv %s5346_s28  ;;  %v2040_v8 = vsel %vm393_vm4, %v1990_v2, 0.0  ;;  %v1691_v23 = vadd.f32 %v1689_v44, %v1635_v14  ;;  %s5582_s28 = sld [smem:[#allocation8 + $0x48]] }
 0x21c   : > { %v1896_v26 = vadd.f32 %v1894_v7, %v1840_v40  ;;  %v1911_v37 = vstv %s5351_s1  ;;  %v2060_v43 = vadd.f32 %v5286_v17, %v2040_v8  ;;  %v2069_v36 = vsel %vm393_vm4, %v2009_v61, 0.0  ;;  %s5620_s1 = sld [smem:[#allocation8 + $0x4b]] }
 0x21d   : > { %v1801_v35 = vmul.f32 %v5223_v15, %v1799_v3  ;;  %v1967_v54 = vstv %s5355_s5  ;;  %v2089_v22 = vadd.f32 %v5321_v16, %v2069_v36  ;;  %v1747_v47 = vadd.f32 %v1745_v1, %v1691_v23  ;;  %s5633_s5 = sld [smem:[#allocation8 + $0x4e]] }
 0x21e   : > { %v1952_v31 = vadd.f32 %v1950_v32, %v1896_v26  ;;  %v1857_v45 = vmul.f32 %v5226_v55, %v1855_v25  ;;  %v1913_v6 = vmul.f32 %v5231_v28, %v1911_v37  ;;  %v2023_v4 = vstv %s5366_s23  ;;  %v2075_v28 = vpop.permute.xlu1 %2074  ;;  %s5652_s23 = sld [smem:[#allocation8 + $0x51]] }
 0x21f   : > { %v1582_v7 = vmul.f32 %v5270_v9, %v1581_v51  ;;  %v1632_v17 = vmul.f32 %v5256_v49, %v1631_v0  ;;  %v1803_v2 = vadd.f32 %v1801_v35, %v1747_v47  ;;  %v1969_v15 = vmul.f32 %v5236_v60, %v1967_v54  ;;  %v2073_v0 = vpop.permute.xlu0 %2072 }
 0x220   : > { %v2008_v48 = vadd.f32 %v2006_v50, %v1952_v31  ;;  %v1688_v19 = vmul.f32 %v5259_v58, %v1687_v12  ;;  %v1744_v56 = vmul.f32 %v5262_v63, %v1743_v53  ;;  %v1800_v55 = vmul.f32 %v5265_v10, %v1799_v3 }
 0x221   : > { %v1634_v16 = vadd.f32 %v1632_v17, %v1582_v7  ;;  %vm394_vm5 = vcmp.ne.s32.totalorder %v5193_v11, 15  ;;  %v1859_v49 = vadd.f32 %v1857_v45, %v1803_v2  ;;  %v2065_v51 = vstv %s5377_s7  ;;  %s5672_s7 = sld [smem:[#allocation8 + $0x54]] }
 0x222   : > { %v2068_v9 = vsel %vm393_vm4, %v2008_v48, 0.0  ;;  %v2051_v60 = vsel %vm394_vm5, %v2047_v13, 0.0  ;;  %v2050_v63 = vsel %vm394_vm5, %v2045_v41, 0.0  ;;  %v2093_v53 = vstv %s5386_s11  ;;  %s5693_s11 = sld [smem:[#allocation8 + $0x57]] }
 0x223   : > { %v2088_v58 = vadd.f32 %v5327_v59, %v2068_v9  ;;  %v1690_v20 = vadd.f32 %v1688_v19, %v1634_v16  ;;  %v2063_v33 = vadd.f32 %v2061_v34, %v2051_v60  ;;  %v1915_v10 = vadd.f32 %v1913_v6, %v1859_v49  ;;  %v2101_v7 = vpop.permute.xlu0 %2100 }
 0x224   : > { %v2062_v12 = vadd.f32 %v2060_v43, %v2050_v63  ;;  %v2079_v46 = vsel %vm394_vm5, %v2075_v28, 0.0  ;;  %v2078_v14 = vsel %vm394_vm5, %v2073_v0, 0.0  ;;  %v2025_v59 = vmul.f32 %v5249_v62, %v2023_v4  ;;  %v2103_v43 = vpop.permute.xlu1 %2102 }
 0x225   : > { %v1746_v61 = vadd.f32 %v1744_v56, %v1690_v20  ;;  %v2067_v44 = vadd.f32 %v2065_v51, %v2063_v33  ;;  %v2091_v40 = vadd.f32 %v2089_v22, %v2079_v46  ;;  %v1971_v1 = vadd.f32 %v1969_v15, %v1915_v10  ;;  %v5517_v10 = vld [vmem:[#allocation2 + $0x3a] sm:$0xff] }
 0x226   : > { %v2066_v3 = vadd.f32 %v2065_v51, %v2062_v12  ;;  %v2090_v34 = vadd.f32 %v2088_v58, %v2078_v14  ;;  %v1856_v50 = vmul.f32 %v5294_v18, %v1855_v25  ;;  %v1912_v13 = vmul.f32 %v5302_v21, %v1911_v37 }
 0x227   : > { %v1802_v32 = vadd.f32 %v1800_v55, %v1746_v61  ;;  %v2598_v8 = vmul.f32 -1.442695, %v2067_v44  ;;  %v2027_v26 = vadd.f32 %v2025_v59, %v1971_v1  ;;  %v2095_v41 = vadd.f32 %v2093_v53, %v2091_v40  ;;  %v7223_v44 = vld [vmem:[#allocation175_spill] sm:$0xff]  ;;  %v7224_v59 = vld [vmem:[#allocation156_spill] sm:$0xff] }
 0x228   : > { %v2597_v23 = vmul.f32 -1.442695, %v2066_v3  ;;  %v2094_v36 = vadd.f32 %v2093_v53, %v2090_v34  ;;  %v2107_v25 = vsel %vm394_vm5, %v2103_v43, 0.0  ;;  %v1968_v22 = vmul.f32 %v5308_v30, %v1967_v54 }
 0x229   : > { %v1858_v62 = vadd.f32 %v1856_v50, %v1802_v32  ;;  %v2097_v18 = vsel %vm393_vm4, %v2027_v26, 0.0  ;;  %2714 = vpow2.f32 %v2598_v8  ;;  %v2602_v35 = vmul.f32 -1.442695, %v2095_v41  ;;  %v7225_v50 = vld [vmem:[#allocation188_spill] sm:$0xff]  ;;  %v7227_v41 = vld [vmem:[#allocation182_spill] sm:$0xff] }
 0x22a   : > { %v2117_v37 = vadd.f32 %v5357_v5, %v2097_v18  ;;  %2716 = vpow2.f32 %v2597_v23  ;;  %v2601_v31 = vmul.f32 -1.442695, %v2094_v36  ;;  %v6484_v45 = vstv %s5424_s30 }
 0x22b   : > { %v1914_v21 = vadd.f32 %v1912_v13, %v1858_v62  ;;  %2718 = vpow2.f32 %v2602_v35  ;;  %v398_v6 = vstv %s5426_s24  ;;  %v438_v30 = vstv %s5428_s6  ;;  %v7228_v62 = vld [vmem:[#allocation171_spill] sm:$0xff]  ;;  %s5695_s24 = sld [smem:[#allocation8 + $0x5a]]  ;;  %s5706_s6 = sld [smem:[#allocation8 + $0x5d]] }
 0x22c   : > { %v2119_v47 = vadd.f32 %v2117_v37, %v2107_v25  ;;  %v2024_v54 = vmul.f32 %v5335_v38, %v2023_v4  ;;  %2720 = vpow2.f32 %v2601_v31  ;;  %v400_v17 = vmul.f32 %v4747_v52, %v398_v6  ;;  %v7230_v31 = vld [vmem:[#allocation167_spill] sm:$0xff] }
 0x22d   : > { %v1970_v5 = vadd.f32 %v1968_v22, %v1914_v21  ;;  %v440_v48 = vmul.f32 %v4762_v42, %v438_v30  ;;  %v554_v15 = vstv %s5430_s4  ;;  %v612_v19 = vstv %s5432_s19  ;;  %v7229_v21 = vld [vmem:[#allocation189_spill] sm:$0xff]  ;;  %s5728_s4 = sld [smem:[#allocation8 + $0x60]]  ;;  %s5730_s19 = sld [smem:[#allocation8 + $0x63]] }
 0x22e   : > { %v2123_v2 = vadd.f32 %v6484_v45, %v2119_v47  ;;  %v670_v4 = vstv %s5438_s29  ;;  %v728_v52 = vstv %s5440_s16  ;;  %v2106_v42 = vsel %vm394_vm5, %v2101_v7, 0.0  ;;  %s5754_s29 = sld [smem:[#allocation8 + $0x66]]  ;;  %s5783_s16 = sld [smem:[#allocation8 + $0x6c]] }
 0x22f   : > { %v2026_v38 = vadd.f32 %v2024_v54, %v1970_v5  ;;  %v786_v16 = vstv %s5443_s26  ;;  %v844_v56 = vstv %s5445_s12  ;;  %v442_v28 = vadd.f32 %v440_v48, %v400_v17  ;;  %v5575_v5 = vld [vmem:[#allocation2 + $0x1] sm:$0xff]  ;;  %s5785_s26 = sld [smem:[#allocation8 + $0x6f]]  ;;  %s5793_s12 = sld [smem:[#allocation8 + $0x72]] }
 0x230   : > { %v496_v9 = vstv %s5450_s21  ;;  %v556_v49 = vmul.f32 %v4786_v27, %v554_v15  ;;  %v614_v51 = vmul.f32 %v4805_v57, %v612_v19  ;;  %v2608_v0 = vmul.f32 -1.442695, %v2123_v2  ;;  %v5510_v57 = vld [vmem:[#allocation2 + $0x39] sm:$0xff]  ;;  %s5808_s21 = sld [smem:[#allocation8 + $0x75]] }
 0x231   : > { %v672_v58 = vmul.f32 %v4814_v39, %v670_v4  ;;  %v5503_v20 = vmul.f32 %v5065_v29, %v728_v52  ;;  %v902_v33 = vstv %s5452_s3  ;;  %v2096_v27 = vsel %vm393_vm4, %v2026_v38, 0.0  ;;  %v7231_v17 = vld [vmem:[#allocation193_spill] sm:$0xff]  ;;  %v7232_v38 = vld [vmem:[#allocation186_spill] sm:$0xff]  ;;  %s5812_s3 = sld [smem:[#allocation8 + $0x69]] }
 0x232   : > { %v5515_v63 = vmul.f32 %v5510_v57, %v786_v16  ;;  %v5522_v39 = vmul.f32 %v5517_v10, %v844_v56  ;;  %v960_v12 = vstv %s5455_s18  ;;  %v1018_v46 = vstv %s5459_s0  ;;  %s5836_s18 = sld [smem:[#allocation8 + $0x78]]  ;;  %s5858_s0 = sld [smem:[#allocation8 + $0x7b]] }
 0x233   : > { %v2715_v55 = vpop.eup %2714  ;;  %v1076_v61 = vstv %s5461_s22  ;;  %v498_v40 = vmul.f32 %v7223_v44, %v496_v9  ;;  %v2116_v14 = vadd.f32 %v5362_v24, %v2096_v27  ;;  %v5538_v3 = vmul.f32 %v7224_v59, %v902_v33  ;;  %s5860_s22 = sld [smem:[#allocation8 + $0x7e]] }
 0x234   : > { %v2717_v60 = vpop.eup %2716  ;;  %v2133_v53 = vadd.f32 1.0, %v2715_v55  ;;  %v1134_v34 = vstv %s5472_s9  ;;  %2722 = vpow2.f32 %v2608_v0  ;;  %v5546_v13 = vmul.f32 %v7225_v50, %v960_v12  ;;  %v7233_v55 = vld [vmem:[#allocation157_spill] sm:$0xff]  ;;  %s5884_s9 = sld [smem:[#allocation8 + $0x81]] }
 0x235   : > { %v2132_v1 = vadd.f32 1.0, %v2717_v60  ;;  %v2719_v32 = vpop.eup %2718  ;;  %v1192_v8 = vstv %s5478_s8  ;;  %v500_v24 = vadd.f32 %v498_v40, %v442_v28  ;;  %v5549_v23 = vadd.f32 %v2116_v14, %v2106_v42  ;;  %v5604_v40 = vld [vmem:[#allocation2 + $0x9] sm:$0xff]  ;;  %s5895_s8 = sld [smem:[#allocation8 + $0x84]] }
 0x236   : > { %v2721_v26 = vpop.eup %2720  ;;  %v5554_v43 = vmul.f32 %v7227_v41, %v1018_v46  ;;  %v5559_v36 = vmul.f32 %v7228_v62, %v1076_v61  ;;  %v1250_v18 = vstv %s5482_s27  ;;  %2724 = vrcp.f32 %v2133_v53  ;;  %v5599_v53 = vld [vmem:[#allocation2 + $0x8] sm:$0xff]  ;;  %v5628_v41 = vld [vmem:[#allocation2 + $0x20] sm:$0xff]  ;;  %s5906_s27 = sld [smem:[#allocation8 + $0x87]] }
 0x237   : > { %7226 = vst [vmem:[#allocation195_spill] sm:$0xff] %v5549_v23  ;;  %v5567_v25 = vmul.f32 %v7229_v21, %v1134_v34  ;;  %v1308_v37 = vstv %s5488_s15  ;;  %v558_v35 = vadd.f32 %v556_v49, %v500_v24  ;;  %2726 = vrcp.f32 %v2132_v1  ;;  %v5623_v24 = vld [vmem:[#allocation2 + $0xa] sm:$0xff]  ;;  %v5635_v62 = vld [vmem:[#allocation2 + $0x82] sm:$0xff]  ;;  %s5919_s15 = sld [smem:[#allocation8 + $0x8a]] }
 0x238   : > { %v2151_v22 = vadd.f32 1.0, %v2719_v32  ;;  %v5573_v47 = vmul.f32 %v7230_v31, %v1192_v8  ;;  %v439_v54 = vmul.f32 %v5575_v5, %v438_v30  ;;  %v5584_v7 = vadd.f32 1.0, %v2721_v26 }
 0x239   : > { %v5589_v48 = vmul.f32 %v7231_v17, %v1250_v18  ;;  %v616_v2 = vadd.f32 %v614_v51, %v558_v35  ;;  %v497_v42 = vmul.f32 %v7232_v38, %v496_v9  ;;  %v399_v30 = vmul.f32 %v7233_v55, %v398_v6  ;;  %v5609_v51 = vld [vmem:[#allocation2 + $0x81] sm:$0xff] }
 0x23a   : > { %v410_v28 = vstv %s5506_s17  ;;  %v456_v49 = vstv %s5525_s25  ;;  %v514_v60 = vstv %s5527_s13  ;;  %v1366_v0 = vstv %s5531_s2  ;;  %7234 = vst [vmem:[#allocation170_spill] sm:$0xff] %v5609_v51  ;;  %v7238_v55 = vld [vmem:[#allocation181_spill] sm:$0xff]  ;;  %s5921_s17 = sld [smem:[#allocation8 + $0x8d]]  ;;  %s5940_s25 = sld [smem:[#allocation8 + $0x90]] }
 0x23b   : > { %v674_v27 = vadd.f32 %v672_v58, %v616_v2  ;;  %v412_v44 = vmul.f32 %v5599_v53, %v410_v28  ;;  %v458_v9 = vmul.f32 %v5604_v40, %v456_v49  ;;  %v5614_v6 = vmul.f32 %v5609_v51, %v1308_v37  ;;  %v7235_v58 = vld [vmem:[#allocation191_spill] sm:$0xff]  ;;  %v7237_v2 = vld [vmem:[#allocation176_spill] sm:$0xff]  ;;  %s5951_s13 = sld [smem:[#allocation8 + $0x93]]  ;;  %s5953_s2 = sld [smem:[#allocation8 + $0x96]] }
 0x23c   : > { %v555_v14 = vmul.f32 %v7235_v58, %v554_v15  ;;  %v441_v1 = vadd.f32 %v439_v54, %v399_v30  ;;  %v572_v59 = vstv %s5541_s10  ;;  %v516_v26 = vmul.f32 %v5623_v24, %v514_v60  ;;  %s5981_s10 = sld [smem:[#allocation8 + $0x99]] }
 0x23d   : > { %v732_v32 = vadd.f32 %v5503_v20, %v674_v27  ;;  %v460_v50 = vadd.f32 %v458_v9, %v412_v44  ;;  %v574_v15 = vmul.f32 %v5628_v41, %v572_v59  ;;  %2728 = vrcp.f32 %v2151_v22  ;;  %v7239_v27 = vld [vmem:[#allocation185_spill] sm:$0xff] }
 0x23e   : > { %v5640_v20 = vmul.f32 %v5635_v62, %v1366_v0  ;;  %v499_v21 = vadd.f32 %v497_v42, %v441_v1  ;;  %v6489_v35 = vstv %s5562_s14  ;;  %v5643_v31 = vpop.eup %2722  ;;  %v613_v38 = vmul.f32 %v7237_v2, %v612_v19  ;;  %v5662_v19 = vld [vmem:[#allocation2 + $0x31] sm:$0xff] }
 0x23f   : > { %7236 = vst [vmem:[#allocation179_spill] sm:$0xff] %v5643_v31  ;;  %v790_v54 = vadd.f32 %v5515_v63, %v732_v32  ;;  %v671_v22 = vmul.f32 %v7238_v55, %v670_v4  ;;  %v518_v30 = vadd.f32 %v516_v26, %v460_v50  ;;  %v729_v44 = vmul.f32 %v7239_v27, %v728_v52  ;;  %v5667_v50 = vld [vmem:[#allocation2 + $0x21] sm:$0xff]  ;;  %v5676_v26 = vld [vmem:[#allocation2 + $0x32] sm:$0xff] }
 0x240   : > { %v557_v42 = vadd.f32 %v555_v14, %v499_v21  ;;  %v6486_v9 = vstv %s5580_s20  ;;  %v6485_v58 = vstv %s5582_s28  ;;  %v5659_v1 = vpop.eup %2724  ;;  %v787_v4 = vmul.f32 %v5662_v19, %v786_v16  ;;  %v5681_v16 = vld [vmem:[#allocation2 + $0x48] sm:$0xff] }
 0x241   : > { %7240 = vst [vmem:[#allocation172_spill] sm:$0xff] %v5659_v1  ;;  %v848_v63 = vadd.f32 %v5522_v39, %v790_v54  ;;  %v576_v32 = vadd.f32 %v574_v15, %v518_v30  ;;  %v632_v52 = vmul.f32 %v5667_v50, %v6489_v35  ;;  %v5674_v14 = vpop.eup %2726  ;;  %v845_v39 = vmul.f32 %v5676_v26, %v844_v56  ;;  %v5686_v21 = vld [vmem:[#allocation2 + $0x49] sm:$0xff] }
 0x242   : > { %7241 = vst [vmem:[#allocation183_spill] sm:$0xff] %v5674_v14  ;;  %v903_v15 = vmul.f32 %v5681_v16, %v902_v33  ;;  %v5691_v54 = vmul.f32 %v5686_v21, %v960_v12  ;;  %v615_v2 = vadd.f32 %v613_v38, %v557_v42  ;;  %v5698_v30 = vld [vmem:[#allocation2 + $0x22] sm:$0xff]  ;;  %v748_v12 = vmul.f32 %v5065_v29, %v6485_v58  ;;  %v5708_v38 = vld [vmem:[#allocation2 + $0x4a] sm:$0xff] }
 0x243   : > { %v906_v56 = vadd.f32 %v5538_v3, %v848_v63  ;;  %v634_v55 = vadd.f32 %v632_v52, %v576_v32  ;;  %v690_v33 = vmul.f32 %v5698_v30, %v6486_v9  ;;  %v5713_v27 = vmul.f32 %v5708_v38, %v1018_v46  ;;  %v7242_v3 = vld [vmem:[#allocation192_spill] sm:$0xff]  ;;  %v7243_v29 = vld [vmem:[#allocation194_spill] sm:$0xff]  ;;  %v7244_v46 = vld [vmem:[#allocation187_spill] sm:$0xff] }
 0x244   : > { %v5718_v42 = vmul.f32 %v7242_v3, %v1076_v61  ;;  %v673_v63 = vadd.f32 %v671_v22, %v615_v2  ;;  %v6488_v32 = vstv %s5620_s1  ;;  %v5725_v45 = vmul.f32 %v7243_v29, %v1134_v34  ;;  %v7245_v22 = vld [vmem:[#allocation160_spill] sm:$0xff]  ;;  %v5778_v35 = vld [vmem:[#allocation2 + $0x2] sm:$0xff] }
 0x245   : > { %v964_v52 = vadd.f32 %v5546_v13, %v906_v56  ;;  %v692_v58 = vadd.f32 %v690_v33, %v634_v55  ;;  %v6487_v9 = vstv %s5633_s5  ;;  %v5735_v61 = vmul.f32 %v7244_v46, %v1192_v8  ;;  %v5742_v2 = vld [vmem:[#allocation2 + $0x79] sm:$0xff] }
 0x246   : > { %v5740_v13 = vmul.f32 %v7245_v22, %v1250_v18  ;;  %v5747_v34 = vmul.f32 %v5742_v2, %v1308_v37  ;;  %v731_v56 = vadd.f32 %v729_v44, %v673_v63  ;;  %v806_v8 = vmul.f32 %v5510_v57, %v6488_v32  ;;  %v5761_v44 = vld [vmem:[#allocation2 + $0x50] sm:$0xff] }
 0x247   : > { %v1022_v55 = vadd.f32 %v5554_v43, %v964_v52  ;;  %v750_v33 = vadd.f32 %v748_v12, %v692_v58  ;;  %v6490_v3 = vstv %s5652_s23  ;;  %v5756_v18 = vpop.eup %2728  ;;  %v864_v37 = vmul.f32 %v5517_v10, %v6487_v9  ;;  %v5766_v58 = vld [vmem:[#allocation2] sm:$0xff] }
 0x248   : > { %7246 = vst [vmem:[#allocation184_spill] sm:$0xff] %v5756_v18  ;;  %v789_v29 = vadd.f32 %v787_v4, %v731_v56  ;;  %v922_v43 = vmul.f32 %v5761_v44, %v6490_v3  ;;  %v411_v12 = vmul.f32 %v5766_v58, %v410_v28  ;;  %v6491_v22 = vstv %s5672_s7  ;;  %v5840_v18 = vld [vmem:[#allocation2 + $0x6a] sm:$0xff] }
 0x249   : > { %v1080_v63 = vadd.f32 %v5559_v36, %v1022_v55  ;;  %v808_v52 = vadd.f32 %v806_v8, %v750_v33  ;;  %v457_v4 = vmul.f32 %v5575_v5, %v456_v49  ;;  %v6492_v9 = vstv %s5693_s11  ;;  %v5788_v49 = vld [vmem:[#allocation2 + $0x18] sm:$0xff] }
 0x24a   : > { %v847_v56 = vadd.f32 %v845_v39, %v789_v29  ;;  %v6493_v32 = vstv %s5695_s24  ;;  %v515_v3 = vmul.f32 %v5778_v35, %v514_v60  ;;  %v6494_v28 = vstv %s5706_s6  ;;  %v5796_v60 = vld [vmem:[#allocation2 + $0x7a] sm:$0xff] }
 0x24b   : > { %v866_v36 = vadd.f32 %v864_v37, %v808_v52  ;;  %v459_v55 = vadd.f32 %v457_v4, %v411_v12  ;;  %v573_v39 = vmul.f32 %v5788_v49, %v572_v59  ;;  %v1138_v33 = vadd.f32 %v5567_v25, %v1080_v63  ;;  %v5803_v37 = vld [vmem:[#allocation2 + $0x51] sm:$0xff] }
 0x24c   : > { %v5801_v8 = vmul.f32 %v5796_v60, %v1366_v0  ;;  %v905_v29 = vadd.f32 %v903_v15, %v847_v56  ;;  %v980_v59 = vmul.f32 %v5803_v37, %v6491_v22  ;;  %v5815_v4 = vld [vmem:[#allocation2 + $0x52] sm:$0xff]  ;;  %v5820_v56 = vld [vmem:[#allocation2 + $0x68] sm:$0xff]  ;;  %v7247_v63 = vstv %s5562_s14  ;;  %s5983_s14 = sld [smem:[#allocation8 + $0x9c]] }
 0x24d   : > { %v924_v12 = vadd.f32 %v922_v43, %v866_v36  ;;  %v517_v52 = vadd.f32 %v515_v3, %v459_v55  ;;  %v1038_v15 = vmul.f32 %v5815_v4, %v6492_v9  ;;  %v1096_v43 = vmul.f32 %v5820_v56, %v6493_v32  ;;  %v5825_v36 = vld [vmem:[#allocation2 + $0x69] sm:$0xff]  ;;  %v5831_v22 = vld [vmem:[#allocation2 + $0x19] sm:$0xff] }
 0x24e   : > { %v963_v0 = vadd.f32 %v5691_v54, %v905_v29  ;;  %v1154_v3 = vmul.f32 %v5825_v36, %v6494_v28  ;;  %v631_v9 = vmul.f32 %v5831_v22, %v7247_v63  ;;  %v1196_v32 = vadd.f32 %v5573_v47, %v1138_v33  ;;  %v5848_v54 = vld [vmem:[#allocation2 + $0x1a] sm:$0xff] }
 0x24f   : > { %v982_v55 = vadd.f32 %v980_v59, %v924_v12  ;;  %v575_v29 = vadd.f32 %v573_v39, %v517_v52  ;;  %v7248_v59 = vstv %s5728_s4  ;;  %v7249_v39 = vstv %s5730_s19 }
 0x250   : > { %v1021_v25 = vadd.f32 %v5713_v27, %v963_v0  ;;  %v1212_v12 = vmul.f32 %v5840_v18, %v7248_v59  ;;  %v1270_v52 = vmul.f32 %v7231_v17, %v7249_v39  ;;  %v7250_v14 = vstv %s5580_s20  ;;  %v5853_v27 = vld [vmem:[#allocation2 + $0x30] sm:$0xff]  ;;  %v5862_v17 = vpop.permute.xlu1 %1435  ;;  %s5997_s20 = sld [smem:[#allocation9]] }
 0x251   : > { %v1040_v28 = vadd.f32 %v1038_v15, %v982_v55  ;;  %v633_v63 = vadd.f32 %v631_v9, %v575_v29  ;;  %v689_v47 = vmul.f32 %v5848_v54, %v7250_v14  ;;  %v7251_v33 = vstv %s5582_s28  ;;  %s6011_s28 = sld [smem:[#allocation9 + $0x1]] }
 0x252   : > { %v747_v0 = vmul.f32 %v5853_v27, %v7251_v33  ;;  %v1079_v9 = vadd.f32 %v5718_v42, %v1021_v25  ;;  %v7252_v15 = vstv %s5754_s29  ;;  %v422_v55 = vstv %s5783_s16  ;;  %s7275_s16 = sld [smem:[#allocation201_spill]] }
 0x253   : > { %v1328_v14 = vmul.f32 %v5609_v51, %v7252_v15  ;;  %v474_v29 = vstv %s5785_s26  ;;  %v1098_v59 = vadd.f32 %v1096_v43, %v1040_v28  ;;  %v691_v39 = vadd.f32 %v689_v47, %v633_v63 }
 0x254   : > { %v424_v33 = vmul.f32 %v5599_v53, %v422_v55  ;;  %v532_v1 = vstv %s5793_s12  ;;  %v1254_v31 = vadd.f32 %v5589_v48, %v1196_v32  ;;  %v1137_v23 = vadd.f32 %v5725_v45, %v1079_v9  ;;  %v5886_v53 = vpop.permute.xlu0 %1433 }
 0x255   : > { %v476_v42 = vmul.f32 %v5604_v40, %v474_v29  ;;  %v590_v25 = vstv %s5808_s21  ;;  %v1156_v15 = vadd.f32 %v1154_v3, %v1098_v59  ;;  %v1384_v51 = vstv %s5812_s3  ;;  %s3001_s3 = smov [#allocation14]  }
 0x256   : > { %v749_v28 = vadd.f32 %v747_v0, %v691_v39  ;;  %v7253_v43 = vstv %s5620_s1  ;;  %v1195_v48 = vadd.f32 %v5735_v61, %v1137_v23  ;;  %v534_v40 = vmul.f32 %v5623_v24, %v532_v1  ;;  %v5904_v39 = vpop.permute.xlu1 %1463  ;;  %s7263_s1 = sld [smem:[#allocation29_spill]] }
 0x257   : > { %v805_v63 = vmul.f32 %v5662_v19, %v7253_v43  ;;  %v478_v45 = vadd.f32 %v476_v42, %v424_v33  ;;  %v592_v32 = vmul.f32 %v5628_v41, %v590_v25  ;;  %v1214_v3 = vadd.f32 %v1212_v12, %v1156_v15 }
 0x258   : > { %v7254_v0 = vstv %s5633_s5  ;;  %v648_v23 = vstv %s5836_s18  ;;  %v1312_v61 = vadd.f32 %v5614_v6, %v1254_v31  ;;  %v1253_v59 = vadd.f32 %v5740_v13, %v1195_v48  ;;  %s6031_s5 = sld [smem:[#allocation8 + $0x9f]]  ;;  %s2914_s18 = sshll.u32 %s3001_s3, 4  ;;  %s2915_s18 = int_to_ptr.vmem [resolvable:$false] %s2914_s18 }
 0x259   : > { %v807_v47 = vadd.f32 %v805_v63, %v749_v28  ;;  %v863_v9 = vmul.f32 %v5676_v26, %v7254_v0  ;;  %v1386_v24 = vmul.f32 %v5635_v62, %v1384_v51  ;;  %v536_v41 = vadd.f32 %v534_v40, %v478_v45  ;;  %v5933_v0 = vpop.permute.xlu0 %1461 }
 0x25a   : > { %v7255_v33 = vstv %s5652_s23  ;;  %v6497_v15 = vstv %s5858_s0  ;;  %v6496_v28 = vstv %s5860_s22  ;;  %v1272_v43 = vadd.f32 %v1270_v52, %v1214_v3  ;;  %v5927_v3 = vld [vmem:[#allocation2 + $0x60] sm:$0xff] }
 0x25b   : > { %v865_v12 = vadd.f32 %v863_v9, %v807_v47  ;;  %v921_v42 = vmul.f32 %v5681_v16, %v7255_v33  ;;  %v7256_v6 = vstv %s5672_s7  ;;  %v594_v13 = vadd.f32 %v592_v32, %v536_v41  ;;  %v5942_v33 = vld [vmem:[#allocation2 + $0x61] sm:$0xff] }
 0x25c   : > { %v979_v31 = vmul.f32 %v5686_v21, %v7256_v6  ;;  %v650_v63 = vmul.f32 %v5667_v50, %v648_v23  ;;  %v1311_v48 = vadd.f32 %v5747_v34, %v1253_v59  ;;  %v7257_v40 = vstv %s5693_s11  ;;  %v2815_v59 = vld [vmem:[#allocation2 + $0x38] sm:$0xff]  ;;  %s2617_s23 = smul.u32 48, %s7263_s1  ;;  %s6077_s11 = sld [smem:[#allocation9 + $0x2]] }
 0x25d   : > { %v923_v45 = vadd.f32 %v921_v42, %v865_v12  ;;  %v1037_v52 = vmul.f32 %v5708_v38, %v7257_v40  ;;  %v7258_v47 = vstv %s5695_s24  ;;  %v1370_v50 = vadd.f32 %v5640_v20, %v1312_v61  ;;  %s2179_s12 = scalar_lea.sflag [#allocation6], %s7263_s1 }
 0x25e   : > { %v1095_v32 = vmul.f32 %v5927_v3, %v7258_v47  ;;  %v652_v9 = vadd.f32 %v650_v63, %v594_v13  ;;  %v708_v34 = vmul.f32 %v5698_v30, %v6497_v15  ;;  %v766_v41 = vmul.f32 %v2815_v59, %v6496_v28  ;;  %v5955_v63 = vld [vmem:[#allocation2 + $0x78] sm:$0xff]  ;;  %v5961_v59 = vpop.permute.xlu1 %1491  ;;  %s6063_s7 = scalar_lea.vmem [#allocation14], %s2617_s23 }
 0x25f   : > { %v981_v12 = vadd.f32 %v979_v31, %v923_v45  ;;  %v7259_v42 = vstv %s5706_s6  ;;  %v7260_v61 = vstv %s5728_s4  ;;  %v822_v13 = vstv %s5884_s9  ;;  %s2192_s4 = sshll.u32 %s6063_s7, 4  ;;  %s6153_s4 = int_to_ptr.vmem [resolvable:$true] %s2192_s4 }
 0x260   : > { %v1153_v20 = vmul.f32 %v5942_v33, %v7259_v42  ;;  %v1211_v6 = vmul.f32 %v7244_v46, %v7260_v61  ;;  %v1330_v30 = vadd.f32 %v1328_v14, %v1272_v43  ;;  %v7261_v31 = vstv %s5730_s19  ;;  %s2910_s21 = scalar_lea.vmem %s6153_s4, 768  ;;  %p2917_p3 = scmp.lt.s32.totalorder %s6153_s4, %s2915_s18 }
 0x261   : > { %v1269_v45 = vmul.f32 %v5955_v63, %v7261_v31  ;;  %v710_v40 = vadd.f32 %v708_v34, %v652_v9  ;;  %v880_v47 = vstv %s5895_s8  ;;  %v1369_v46 = vadd.f32 %v5801_v8, %v1311_v48  ;;  %p2911_p7 = scmp.ne.s32.totalorder %s6153_s4, %s2910_s21 }
 0x262   : > { %v1039_v42 = vadd.f32 %v1037_v52, %v981_v12  ;;  %v7262_v61 = vstv %s5754_s29  ;;  %v1385_v14 = vmul.f32 %v5796_v60, %v1384_v51  ;;  %v1420_v43 = vsel %vm393_vm4, %v1370_v50, 0.0 }
 0x263   : > { %v1327_v28 = vmul.f32 %v5742_v2, %v7262_v61  ;;  %v768_v15 = vadd.f32 %v766_v41, %v710_v40  ;;  %v824_v9 = vmul.f32 %v5510_v57, %v822_v13  ;;  %v938_v34 = vstv %s5906_s27  ;;  %p2912_p11 = pnand %p2911_p7, %p3145_p6 }
 0x264   : > { %v1440_v8 = vadd.f32 %v5862_v17, %v1420_v43  ;;  %v1097_v48 = vadd.f32 %v1095_v32, %v1039_v42  ;;  %v882_v52 = vmul.f32 %v5517_v10, %v880_v47  ;;  %v940_v51 = vmul.f32 %v5761_v44, %v938_v34  ;;  %v5987_v32 = vpop.permute.xlu0 %1489 }
 0x265   : > { %v1388_v50 = vadd.f32 %v1386_v24, %v1330_v30  ;;  %v826_v57 = vadd.f32 %v824_v9, %v768_v15  ;;  %v996_v41 = vstv %s5919_s15  ;;  %v1054_v17 = vstv %s5921_s17  ;;  %p2913_p0 = pneg %p2912_p11 }
 0x266   : > { %v1419_v10 = vsel %vm393_vm4, %v1369_v46, 0.0  ;;  %v1155_v12 = vadd.f32 %v1153_v20, %v1097_v48  ;;  %v998_v44 = vmul.f32 %v5803_v37, %v996_v41  ;;  %v423_v31 = vmul.f32 %v5766_v58, %v422_v55  ;;  %v1426_v20 = vpop.permute.xlu1 %1425 }
 0x267   : > { %v884_v24 = vadd.f32 %v882_v52, %v826_v57  ;;  %v1112_v15 = vstv %s5940_s25  ;;  %v475_v30 = vmul.f32 %v5575_v5, %v474_v29  ;;  %v533_v40 = vmul.f32 %v5778_v35, %v532_v1 }
 0x268   : > { %v1213_v46 = vadd.f32 %v1211_v6, %v1155_v12  ;;  %v1056_v37 = vmul.f32 %v5815_v4, %v1054_v17  ;;  %v1170_v42 = vstv %s5951_s13  ;;  %v1228_v58 = vstv %s5953_s2 }
 0x269   : > { %v1448_v55 = vsel %vm393_vm4, %v1388_v50, 0.0  ;;  %v942_v5 = vadd.f32 %v940_v51, %v884_v24  ;;  %v477_v29 = vadd.f32 %v475_v30, %v423_v31  ;;  %v591_v35 = vmul.f32 %v5788_v49, %v590_v25  ;;  %v1424_v49 = vpop.permute.xlu0 %1423 }
 0x26a   : > { %v1439_v1 = vadd.f32 %v5886_v53, %v1419_v10  ;;  %v1468_v4 = vadd.f32 %v5904_v39, %v1448_v55  ;;  %v1271_v6 = vadd.f32 %v1269_v45, %v1213_v46  ;;  %v1114_v61 = vmul.f32 %v5820_v56, %v1112_v15  ;;  %v1454_v10 = vpop.permute.xlu1 %1453 }
 0x26b   : > { %v1000_v43 = vadd.f32 %v998_v44, %v942_v5  ;;  %v1172_v9 = vmul.f32 %v5825_v36, %v1170_v42  ;;  %v1230_v48 = vmul.f32 %v5840_v18, %v1228_v58  ;;  %v535_v52 = vadd.f32 %v533_v40, %v477_v29 }
 0x26c   : > { %v1329_v25 = vadd.f32 %v1327_v28, %v1271_v6  ;;  %v1286_v53 = vstv %s5981_s10  ;;  %v1344_v51 = vstv %s5983_s14  ;;  %v649_v39 = vmul.f32 %v5831_v22, %v648_v23 }
 0x26d   : > { %v1058_v56 = vadd.f32 %v1056_v37, %v1000_v43  ;;  %v593_v45 = vadd.f32 %v591_v35, %v535_v52  ;;  %v7264_v50 = vstv %s5858_s0  ;;  %v7265_v57 = vstv %s5860_s22  ;;  %s2916_s0 = scalar_lea.vmem %s2915_s18, 1536 }
 0x26e   : > { %v707_v36 = vmul.f32 %v5848_v54, %v7264_v50  ;;  %v765_v18 = vmul.f32 %v5853_v27, %v7265_v57  ;;  %v1387_v12 = vadd.f32 %v1385_v14, %v1329_v25  ;;  %v1444_v28 = vstv %s5997_s20  ;;  %p2918_p12 = scmp.lt.s32.totalorder %s2916_s0, %s2910_s21 }
 0x26f   : > { %v1430_v44 = vsel %vm394_vm5, %v1426_v20, 0.0  ;;  %v1429_v22 = vsel %vm394_vm5, %v1424_v49, 0.0  ;;  %v1116_v23 = vadd.f32 %v1114_v61, %v1058_v56  ;;  %v651_v31 = vadd.f32 %v649_v39, %v593_v45  ;;  %v7267_v39 = vld [vmem:[#allocation195_spill] sm:$0xff] }
 0x270   : > { %v1442_v24 = vadd.f32 %v1440_v8, %v1430_v44  ;;  %v1441_v30 = vadd.f32 %v1439_v1, %v1429_v22  ;;  %v1447_v54 = vsel %vm393_vm4, %v1387_v12, 0.0  ;;  %v1472_v27 = vstv %s6011_s28  ;;  %v2818_v8 = vld [vmem:[#allocation2 + $0x80] sm:$0xff]  ;;  %v7270_v22 = vld [vmem:[#allocation172_spill] sm:$0xff]  ;;  %p2919_p9 = por %p2918_p12, %p2917_p3 }
 0x271   : > { %v1458_v14 = vsel %vm394_vm5, %v1454_v10, 0.0  ;;  %v1467_v40 = vadd.f32 %v5933_v0, %v1447_v54  ;;  %v1174_v20 = vadd.f32 %v1172_v9, %v1116_v23  ;;  %v709_v46 = vadd.f32 %v707_v36, %v651_v31  ;;  %v1452_v55 = vpop.permute.xlu0 %1451  ;;  %v7269_v10 = vld [vmem:[#allocation179_spill] sm:$0xff] }
 0x272   : > { %v1446_v37 = vadd.f32 %v1444_v28, %v1442_v24  ;;  %v1288_v5 = vmul.f32 %v2818_v8, %v1286_v53  ;;  %v1445_v29 = vadd.f32 %v1444_v28, %v1441_v30  ;;  %v1470_v35 = vadd.f32 %v1468_v4, %v1458_v14  ;;  %v7266_v4 = vld [vmem:[#allocation170_spill] sm:$0xff]  ;;  %p2920_p13 = pnand %p2919_p9, %p2913_p0 }
 0x273   : > { %v1457_v1 = vsel %vm394_vm5, %v1452_v55, 0.0  ;;  %v1232_v6 = vadd.f32 %v1230_v48, %v1174_v20  ;;  %v767_v61 = vadd.f32 %v765_v18, %v709_v46  ;;  %v823_v0 = vmul.f32 %v5662_v19, %v822_v13 }
 0x274   : > { %1505 = vst.msk [vmem:[%s6063_s7 + $0x8] sm:$0xff] %vm1503_vm6, %v1446_v37  ;;  %v1469_v43 = vadd.f32 %v1467_v40, %v1457_v1  ;;  %2730 = vrcp.f32 %v5584_v7  ;;  %v1346_v9 = vmul.f32 %v7266_v4, %v1344_v51  ;;  %v1402_v48 = vstv %s6031_s5  ;;  %1504 = vst.msk [vmem:[%s6063_s7] sm:$0xff] %vm1503_vm6, %v1445_v29  ;;  %v2819_v29 = vld [vmem:[#allocation2 + $0x62] sm:$0xff] }
 0x275   : > { %v1474_v19 = vadd.f32 %v1472_v27, %v1470_v35  ;;  %v1290_v13 = vadd.f32 %v1288_v5, %v1232_v6  ;;  %v825_v52 = vadd.f32 %v823_v0, %v767_v61  ;;  %v881_v49 = vmul.f32 %v5676_v26, %v880_v47 }
 0x276   : > { %v1473_v25 = vadd.f32 %v1472_v27, %v1469_v43  ;;  %v7268_v7 = vstv %s5424_s30  ;;  %v1404_v50 = vmul.f32 %v5635_v62, %v1402_v48  ;;  %v939_v57 = vmul.f32 %v5681_v16, %v938_v34  ;;  %s7273_s30 = sld [smem:[#allocation24_spill]] }
 0x277   : > { %v2122_v56 = vadd.f32 %v7268_v7, %v7267_v39  ;;  %2512 = vst.msk [vmem:[%s6063_s7 + $0x18] sm:$0xff] %vm1503_vm6, %v1474_v19  ;;  %v1348_v45 = vadd.f32 %v1346_v9, %v1290_v13  ;;  %v883_v36 = vadd.f32 %v881_v49, %v825_v52  ;;  %v997_v18 = vmul.f32 %v5686_v21, %v996_v41  ;;  %v7271_v41 = vld [vmem:[#allocation183_spill] sm:$0xff] }
 0x278   : > { %2511 = vst.msk [vmem:[%s6063_s7 + $0x10] sm:$0xff] %vm1503_vm6, %v1473_v25  ;;  %v2169_v12 = vadd.f32 1.0, %v7269_v10  ;;  %v1055_v34 = vmul.f32 %v5708_v38, %v1054_v17  ;;  %v1113_v14 = vmul.f32 %v5927_v3, %v1112_v15  ;;  %v1500_v17 = vstv %s6077_s11 }
 0x279   : > { %v1406_v26 = vadd.f32 %v1404_v50, %v1348_v45  ;;  %v941_v47 = vadd.f32 %v939_v57, %v883_v36  ;;  %v2607_v28 = vmul.f32 -1.442695, %v2122_v56  ;;  %v1171_v3 = vmul.f32 %v5942_v33, %v1170_v42 }
 0x27a   : > { %v1229_v35 = vmul.f32 %v2819_v29, %v1228_v58  ;;  %v1287_v6 = vmul.f32 %v5955_v63, %v1286_v53  ;;  %v1345_v33 = vmul.f32 %v5742_v2, %v1344_v51  ;;  %v1403_v0 = vmul.f32 %v5796_v60, %v1402_v48 }
 0x27b   : > { %v2125_v44 = vld [vmem:[%s6063_s7 + $0x8] sm:$0xff]  ;;  %v1476_v62 = vsel %vm393_vm4, %v1406_v26, 0.0  ;;  %v999_v16 = vadd.f32 %v997_v18, %v941_v47  ;;  %v2124_v31 = vld [vmem:[%s6063_s7] sm:$0xff]  ;;  %v1482_v24 = vpop.permute.xlu1 %1481  ;;  %2732 = vpow2.f32 %v2607_v28 }
 0x27c   : > { %v2139_v23 = vmul.f32 %v7270_v22, %v2125_v44  ;;  %v1496_v21 = vadd.f32 %v5961_v59, %v1476_v62  ;;  %v2138_v30 = vmul.f32 %v7271_v41, %v2124_v31  ;;  %v1486_v54 = vsel %vm394_vm5, %v1482_v24, 0.0  ;;  %v7272_v59 = vld [vmem:[#allocation184_spill] sm:$0xff]  ;;  %s2618_s6 = smul.u32 768, %s7273_s30 }
 0x27d   : > { %v1057_v27 = vadd.f32 %v1055_v34, %v999_v16  ;;  %2734 = vrcp.f32 %v2169_v12 }
 0x27e   : > { %2141 = vst.msk [vmem:[%s6063_s7 + $0x8] sm:$0xff] %vm1503_vm6, %v2139_v23  ;;  %v2600_v38 = vld [vmem:[%s6063_s7 + $0x18] sm:$0xff]  ;;  %v2731_v40 = vpop.eup %2730  ;;  %2140 = vst.msk [vmem:[%s6063_s7] sm:$0xff] %vm1503_vm6, %v2138_v30  ;;  %v1498_v37 = vadd.f32 %v1496_v21, %v1486_v54  ;;  %s6151_s26 = scalar_lea.hbm %s7275_s16, %s2618_s6 }
 0x27f   : > { %v2157_v20 = vmul.f32 %v7272_v59, %v2600_v38  ;;  %v2599_v46 = vld [vmem:[%s6063_s7 + $0x10] sm:$0xff]  ;;  %v1115_v55 = vadd.f32 %v1113_v14, %v1057_v27 }
 0x280   : > { %v2156_v15 = vmul.f32 %v2731_v40, %v2599_v46  ;;  %v1502_v8 = vadd.f32 %v1500_v17, %v1498_v37 }
 0x281   : > { %2604 = vst.msk [vmem:[%s6063_s7 + $0x18] sm:$0xff] %vm1503_vm6, %v2157_v20  ;;  %v1173_v5 = vadd.f32 %v1171_v3, %v1115_v55 }
 0x282   : > { %2603 = vst.msk [vmem:[%s6063_s7 + $0x10] sm:$0xff] %vm1503_vm6, %v2156_v15  ;;  %2514 = vst.msk [vmem:[%s6063_s7 + $0x28] sm:$0xff] %vm1503_vm6, %v1502_v8 }
 0x283   : > { %v1231_v1 = vadd.f32 %v1229_v35, %v1173_v5 }
 0x285   : > { %v1289_v61 = vadd.f32 %v1287_v6, %v1231_v1  ;;  %v2733_v43 = vpop.eup %2732 }
 0x286   : > { %v2168_v52 = vadd.f32 1.0, %v2733_v43 }
 0x287   : > { %v1347_v42 = vadd.f32 %v1345_v33, %v1289_v61  ;;  %v2735_v58 = vpop.eup %2734 }
 0x288   : > { %2736 = vrcp.f32 %v2168_v52 }
 0x289   : > { %v1405_v4 = vadd.f32 %v1403_v0, %v1347_v42  ;;  %v2606_v9 = vld [vmem:[%s6063_s7 + $0x28] sm:$0xff] }
 0x28a   : > { %v1480_v19 = vpop.permute.xlu0 %1479  ;;  %v2175_v13 = vmul.f32 %v2735_v58, %v2606_v9 }
 0x28b   : > { %v1475_v63 = vsel %vm393_vm4, %v1405_v4, 0.0  ;;  %v1485_v2 = vsel %vm394_vm5, %v1480_v19, 0.0 }
 0x28c   : > { %v1495_v60 = vadd.f32 %v5987_v32, %v1475_v63  ;;  %2610 = vst.msk [vmem:[%s6063_s7 + $0x28] sm:$0xff] %vm1503_vm6, %v2175_v13 }
 0x28e   : > { %v1497_v53 = vadd.f32 %v1495_v60, %v1485_v2 }
 0x290   : > { %v1501_v51 = vadd.f32 %v1500_v17, %v1497_v53 }
 0x292   : > { %2513 = vst.msk [vmem:[%s6063_s7 + $0x20] sm:$0xff] %vm1503_vm6, %v1501_v51  ;;  %v2737_v48 = vpop.eup %2736 }
 0x299   : > { %v2605_v49 = vld [vmem:[%s6063_s7 + $0x20] sm:$0xff] }
 0x29a   : > { %v2174_v11 = vmul.f32 %v2737_v48, %v2605_v49 }
 0x29c   : > { %2609 = vst.msk [vmem:[%s6063_s7 + $0x20] sm:$0xff] %vm1503_vm6, %v2174_v11 }
 0x29d   : > { %2923 = shalt.err (!%p2920_p13)
}
 0x29e   : > { %s2924_s22 = scalar_lea.hbm %s6151_s26, 768  ;;  %s2928_s27 = scalar_lea.hbm %s7275_s16, 3072 }
 0x29f   : > { %p2925_p10 = scmp.ne.s32.totalorder %s6151_s26, %s2924_s22  ;;  %p2929_p5 = scmp.lt.u32.totalorder %s6151_s26, %s7275_s16 }
 0x2a0   : > { %p2930_p4 = scmp.lt.u32.totalorder %s2928_s27, %s2924_s22  ;;  %p2932_p7 = scmp.lt.u32.totalorder %s2924_s22, %s6151_s26 }
 0x2a1   : > { %p2926_p1 = pnand %p2925_p10, %p3145_p6 }
 0x2a2   : > { %p2931_p8 = por %p2930_p4, %p2929_p5 }
 0x2a3   : > { %p2927_p2 = pneg %p2926_p1 }
 0x2a4   : > { %p2933_p11 = por %p2932_p7, %p2931_p8 }
 0x2a6   : > { %p2934_p0 = pnand %p2933_p11, %p2927_p2 }
 0x2a8   : > { %2937 = shalt.err (!%p2934_p0)
}
 0x2a9   : > { %s3002_s25 = smov 128   ;;  %s3003_s13 = smov 8  }
 0x2aa   : > { %2637 = dma.vmem_to_hbm [thread:$0]  (%p3145_p6), %s6153_s4, 768, %s6151_s26, %s2179_s12, %s3002_s25, %s3002_s25, %s3003_s13  }
 0x2ab PF: > { %s7276_s2 = sld [smem:[#allocation23_spill]]  ;;  %s7277_s10 = sld [smem:[#allocation20_spill]] }
 0x2ac   : > { %s7278_s14 = sld [smem:[#allocation25_spill]] }
 0x2b1   : > { %p2669_p3 = scmp.ge.s32.totalorder %s7276_s2, 2  ;;  %s2207_s20 = sand.u32 1, %s7277_s10  }
 0x2b2   : > { %p7279_p12 = scmp.ne.s32.totalorder %s7278_s14, 0  ;;  %s2208_s28 = scalar_lea.sflag [#allocation6], %s2207_s20 }
 0x2b4   : > { %p2657_p9 = pnand %p2669_p3, %p7279_p12 }
 0x2b6   : > { %2971 = dma.done.wait (!%p2657_p9), %s2208_s28, 768  }
 0x2b7   : > { %2973 = vsyncadd (!%p2657_p9), %s2208_s28, 4294966528  ;;  %s7280_s21 = sld [smem:[#allocation26_spill]]  ;;  %s7281_s18 = sld [smem:[#allocation21_spill]] }
 0x2b8   : > { %s7282_s19 = sld [smem:[#allocation22_spill]]  ;;  %s7283_s20 = sld [smem:[#allocation27_spill]] }
 0x2bd   : > { %p21_p13 = scmp.ge.s32.totalorder %s7280_s21, 6  }
 0x2bf   :  { %23 = sbr.rel (!%p21_p13) target bundleno = 15 (0xf), region = 133 }
 0x2c6   :  { %2213 = vsyncpa [#allocation5], 1 }
 0x2c7   :  { %2215 = vsyncpa [#allocation5 + $0x1], 1 }
 0x2c8   :  { %2216 = vsyncpa [#allocation6], 1 }
 0x2c9   :  { %2218 = vsyncpa [#allocation6 + $0x1], 1 }
 0x2ca   :  { %2219 = vsyncpa [#allocation7], 1 }
 0x2cb   :  { %2221 = vsyncpa [#allocation7 + $0x1], 1 }
 0x2cc   :  { %2222 = vsyncpa [#allocation10], 1 }
 0x2cd   :  { %2223 = vsyncpa [#allocation13], 1 }

</bundles_post_ra>
